<compile_context>
chip_gen: v5e
topology: v5e:2x2
jax: 0.10.0
libtpu: 0.0.40
codegen_flags: <defaults>
</compile_context>

<pallas_src>
import functools

import jax
import jax.numpy as jnp
import numpy as np
from jax import lax
from jax.experimental import pallas as pl
from jax.experimental.pallas import tpu as pltpu

LANE = 128


def _round_up(x, m):
    return (x + m - 1) // m * m


def _detect_row_tile_cap():
    # Generation-aware M-tile cap: big tiles on 128 MiB-VMEM parts (v5e/v6e),
    # conservative 512 on v7x's 64 MiB.
    try:
        vmem = getattr(pltpu.get_tpu_info(), "vmem_capacity_bytes", 0)
        if vmem >= (100 << 20):
            return 2048
    except Exception:
        pass
    return 512


MAX_TILE_M = _detect_row_tile_cap()


def _pick_tile_m(m):
    # >= 2 grid steps (v7x megacore + BlockSpec pipelining); tiles are a
    # multiple of 16 (bf16 sublane packing), capped per generation.
    half = _round_up(-(-m // 2), 16)
    return max(16, min(MAX_TILE_M, half))


# ----------------------------- Pallas kernels ----------------------------- #

def _matmul_bias_kernel(x_ref, w_ref, b_ref, o_ref, *, relu_out):
    """out = [relu]( x @ w + b ); bf16 MXU inputs, f32 accumulation."""
    acc = jnp.dot(x_ref[...], w_ref[...], preferred_element_type=jnp.float32)
    acc = acc + b_ref[...]
    if relu_out:
        acc = jnp.maximum(acc, 0.0)
    o_ref[...] = acc.astype(o_ref.dtype)


def _stack_kernel(x_ref, w1_ref, b1_ref, rw1_ref, rw2_ref, o_ref, xp_ref,
                  *, H, W, C, n_layers):
    """Fused conv_1 (3x3+bias) -> L x residual block -> stack ReLU.

    One batch image per grid step.  The zero-padded activation lives in a VMEM
    scratch; each 3x3 conv is formed in-kernel as 9 shifted-slab matmuls (no
    HBM im2col).  The residual carrier `x_cur` stays f32 for the whole stack.
    """
    HW = H * W

    def conv3x3(get_w, n_out):
        acc = jnp.zeros((HW, n_out), jnp.float32)
        for k in range(9):
            dh, dw = divmod(k, 3)
            slab = xp_ref[dh:dh + H, dw:dw + W, :].reshape(HW, C)
            acc = acc + jnp.dot(slab.astype(jnp.bfloat16), get_w(k),
                                preferred_element_type=jnp.float32)
        return acc

    # Zero once per image; only the interior is rewritten between convs, so the
    # 1-pixel halo stays zero (== "same" conv padding).
    xp_ref[...] = jnp.zeros(xp_ref.shape, xp_ref.dtype)

    # conv_1: 3x3 / stride 1 / pad 1, + bias, no activation.
    xp_ref[1:H + 1, 1:W + 1, :] = x_ref[0]
    x_cur = conv3x3(lambda k: w1_ref[k], C) + b1_ref[...]

    # Residual stack: x <- x + Conv1x1(ReLU(Conv3x3(ReLU(x)))).
    for l in range(n_layers):
        xp_ref[1:H + 1, 1:W + 1, :] = jnp.maximum(x_cur, 0.0).reshape(H, W, C)
        h = conv3x3(lambda k, l=l: rw1_ref[l, k], rw1_ref.shape[-1])
        h = jnp.maximum(h, 0.0).astype(jnp.bfloat16)
        x_cur = x_cur + jnp.dot(h, rw2_ref[l],
                                preferred_element_type=jnp.float32)

    # Stack-level F.relu.
    o_ref[...] = jnp.maximum(x_cur, 0.0).reshape(1, H, W, C).astype(o_ref.dtype)


# --------------------------- pallas_call wrappers -------------------------- #

def fused_conv_residual_stack(x_nhwc, w1, b1, rw1, rw2):
    n, h, w, c = x_nhwc.shape
    n_layers = rw1.shape[0]
    kernel = functools.partial(_stack_kernel, H=h, W=w, C=c, n_layers=n_layers)
    return pl.pallas_call(
        kernel,
        grid=(n,),
        in_specs=[
            pl.BlockSpec((1, h, w, c), lambda i: (i, 0, 0, 0)),   # one image/step
            pl.BlockSpec(w1.shape, lambda i: (0, 0, 0)),          # resident weights
            pl.BlockSpec(b1.shape, lambda i: (0, 0)),
            pl.BlockSpec(rw1.shape, lambda i: (0, 0, 0, 0)),
            pl.BlockSpec(rw2.shape, lambda i: (0, 0, 0)),
        ],
        out_specs=pl.BlockSpec((1, h, w, c), lambda i: (i, 0, 0, 0)),
        out_shape=jax.ShapeDtypeStruct((n, h, w, c), jnp.bfloat16),
        scratch_shapes=[pltpu.VMEM((h + 2, w + 2, c), jnp.float32)],
        compiler_params=pltpu.CompilerParams(
            dimension_semantics=("parallel",)),
    )(x_nhwc, w1, b1, rw1, rw2)


def _fused_matmul(x2d, w2d, bias_row, *, relu_out, out_dtype):
    """Row-tiled matmul+bias[+relu]; weights/bias stay VMEM-resident."""
    m, k = x2d.shape
    kw, n_cols = w2d.shape
    assert k == kw and k % LANE == 0 and n_cols % LANE == 0
    tm = _pick_tile_m(m)
    kernel = functools.partial(_matmul_bias_kernel, relu_out=relu_out)
    return pl.pallas_call(
        kernel,
        grid=(pl.cdiv(m, tm),),
        in_specs=[
            pl.BlockSpec((tm, k), lambda i: (i, 0)),         # streamed row tiles
            pl.BlockSpec((k, n_cols), lambda i: (0, 0)),     # resident weights
            pl.BlockSpec((1, n_cols), lambda i: (0, 0)),     # resident bias
        ],
        out_specs=pl.BlockSpec((tm, n_cols), lambda i: (i, 0)),
        out_shape=jax.ShapeDtypeStruct((m, n_cols), out_dtype),
        compiler_params=pltpu.CompilerParams(
            dimension_semantics=("parallel",)),
    )(x2d, w2d, bias_row)


def conv_transpose2d_polyphase(x_nhwc, wm, bias_row, *, relu_out, out_dtype):
    """ConvTranspose2d(k=4, s=2, p=1) via polyphase decomposition.

    One matmul over 2x2 windows of the un-dilated input (K = 4*Cin), columns
    are the 4 output phases x padded channels; phases interleaved wrapper-side.
    """
    n, hi, wi, cin = x_nhwc.shape
    assert wm.shape[0] == 4 * cin
    cout_pad = wm.shape[1] // 4

    xpad = jnp.pad(x_nhwc, ((0, 0), (1, 1), (1, 1), (0, 0)))
    cols = [xpad[:, a:a + hi + 1, b:b + wi + 1, :]
            for a in range(2) for b in range(2)]
    patches = jnp.concatenate(cols, axis=-1)
    patches = patches.reshape(n * (hi + 1) * (wi + 1), 4 * cin)
    patches = patches.astype(jnp.bfloat16)

    out2d = _fused_matmul(patches, wm, bias_row,
                          relu_out=relu_out, out_dtype=out_dtype)

    r = out2d.reshape(n, hi + 1, wi + 1, 2, 2, cout_pad)
    big = jnp.transpose(r, (0, 1, 3, 2, 4, 5))
    big = big.reshape(n, 2 * hi + 2, 2 * wi + 2, cout_pad)
    return big[:, 1:2 * hi + 1, 1:2 * wi + 1, :]


# ------------------------- one-time weight prepare ------------------------- #

def _polyphase_weight(w_iohw, cin_pad, cout_pad):
    """(Cin,Cout,4,4) ConvT weights -> dense (4*cin_pad, 4*cout_pad) matrix.

    Rows ordered (a, b, ci) over the 2x2 input window; columns (r, c, co) over
    the 2x2 output phase: Wm[(a,b,ci),(r,c,co)] = W[ci, co, 2+r-2a, 2+c-2b].
    """
    cin, cout, kh, kw = w_iohw.shape
    assert (kh, kw) == (4, 4)
    wp = jnp.pad(w_iohw, ((0, cin_pad - cin), (0, cout_pad - cout),
                          (0, 0), (0, 0)))
    blocks = []
    for a in range(2):
        for b in range(2):
            sub = wp[:, :, 2 - 2 * a:4 - 2 * a, 2 - 2 * b:4 - 2 * b]
            blocks.append(jnp.transpose(sub, (0, 2, 3, 1))
                          .reshape(cin_pad, 4 * cout_pad))
    return jnp.concatenate(blocks, axis=0).astype(jnp.bfloat16)


def _polyphase_bias(bias, cout_pad):
    b = jnp.pad(bias, (0, cout_pad - bias.shape[0]))
    return jnp.tile(b, 4).reshape(1, 4 * cout_pad).astype(jnp.float32)


def prepare_decoder_params(params):
    """One-time layout transforms / padding / bf16 cast (hoisted out of jit)."""
    ch, cin = params["conv1_w"].shape[:2]
    assert cin <= ch and ch % (LANE // 4) == 0, "unsupported channel config"
    crh_pad = LANE                                   # lane-dense residual hidden

    # conv_1: OIHW -> tap-major (9, ch, ch); input channels zero-padded to ch.
    w1 = jnp.pad(params["conv1_w"], ((0, 0), (0, ch - cin), (0, 0), (0, 0)))
    w1 = jnp.transpose(w1, (2, 3, 1, 0)).reshape(9, ch, ch).astype(jnp.bfloat16)
    b1 = params["conv1_b"].reshape(1, ch).astype(jnp.float32)

    rw1, rw2 = [], []
    for layer in params["res"]:
        a = jnp.transpose(layer["w1"], (2, 3, 1, 0)).reshape(9, ch, -1)
        rw1.append(jnp.pad(a, ((0, 0), (0, 0), (0, crh_pad - a.shape[-1]))))
        b = jnp.transpose(layer["w2"][:, :, 0, 0])                 # (crh, ch)
        rw2.append(jnp.pad(b, ((0, crh_pad - b.shape[0]), (0, 0))))
    rw1 = jnp.stack(rw1).astype(jnp.bfloat16)        # (L, 9, ch, 128)
    rw2 = jnp.stack(rw2).astype(jnp.bfloat16)        # (L, 128, ch)

    ct1_cout_pad = _round_up(params["convt1_w"].shape[1], LANE // 4)
    ct2_cout_pad = _round_up(params["convt2_w"].shape[1], LANE // 4)

    return {
        "conv1_w": w1, "conv1_b": b1, "rw1": rw1, "rw2": rw2,
        "ct1_w": _polyphase_weight(params["convt1_w"], ch, ct1_cout_pad),
        "ct1_b": _polyphase_bias(params["convt1_b"], ct1_cout_pad),
        "ct2_w": _polyphase_weight(params["convt2_w"], ct1_cout_pad, ct2_cout_pad),
        "ct2_b": _polyphase_bias(params["convt2_b"], ct2_cout_pad),
    }


# ------------------------------ Decoder model ------------------------------ #

def init_decoder_params(key, in_channels, num_hiddens,
                        num_residual_layers, num_residual_hiddens):
    keys = jax.random.split(key, 6 + 2 * num_residual_layers)
    s = 0.05

    def w(k, shape):
        return s * jax.random.normal(k, shape, jnp.float32)

    params = {
        "conv1_w": w(keys[0], (num_hiddens, in_channels, 3, 3)),
        "conv1_b": w(keys[1], (num_hiddens,)),
        # ConvTranspose2d weight layout (PyTorch): (Cin, Cout, KH, KW)
        "convt1_w": w(keys[2], (num_hiddens, num_hiddens // 2, 4, 4)),
        "convt1_b": w(keys[3], (num_hiddens // 2,)),
        "convt2_w": w(keys[4], (num_hiddens // 2, 3, 4, 4)),
        "convt2_b": w(keys[5], (3,)),
        "res": [],
    }
    for i in range(num_residual_layers):
        k1, k2 = keys[6 + 2 * i], keys[7 + 2 * i]
        params["res"].append({
            "w1": w(k1, (num_residual_hiddens, num_hiddens, 3, 3)),
            "w2": w(k2, (num_hiddens, num_residual_hiddens, 1, 1)),
        })
    return params


def decoder_forward_pallas(prepared, x_nchw, *, out_channels=3):
    x = jnp.transpose(x_nchw, (0, 2, 3, 1)).astype(jnp.float32)   # NCHW -> NHWC
    ch = prepared["conv1_w"].shape[-1]
    x = jnp.pad(x, ((0, 0), (0, 0), (0, 0), (0, ch - x.shape[-1])))

    # conv_1 + residual stack + stack ReLU: one fused pallas_call.
    x = fused_conv_residual_stack(x, prepared["conv1_w"], prepared["conv1_b"],
                                  prepared["rw1"], prepared["rw2"])

    # conv_trans_1 (4x4/s2/p1) + fused ReLU; bf16 channel-padded inter-layer.
    x = conv_transpose2d_polyphase(x, prepared["ct1_w"], prepared["ct1_b"],
                                   relu_out=True, out_dtype=jnp.bfloat16)
    # conv_trans_2 (4x4/s2/p1), final f32 output.
    x = conv_transpose2d_polyphase(x, prepared["ct2_w"], prepared["ct2_b"],
                                   relu_out=False, out_dtype=jnp.float32)

    x = x[..., :out_channels]                                      # drop padding
    return jnp.transpose(x, (0, 3, 1, 2))                          # NHWC -> NCHW


# --------------------------- Pure-JAX reference ---------------------------- #

def _conv_ref(x, w, b, stride, pad):
    out = lax.conv_general_dilated(
        x, w, (stride, stride), [(pad, pad), (pad, pad)],
        dimension_numbers=("NCHW", "OIHW", "NCHW"),
        precision=lax.Precision.HIGHEST)
    if b is not None:
        out = out + b.reshape(1, -1, 1, 1)
    return out


def _conv_transpose_ref(x, w_iohw, b, stride, pad):
    k = w_iohw.shape[2]
    w_eq = jnp.flip(jnp.transpose(w_iohw, (1, 0, 2, 3)), axis=(2, 3))
    out = lax.conv_general_dilated(
        x, w_eq, (1, 1), [(k - 1 - pad, k - 1 - pad)] * 2,
        lhs_dilation=(stride, stride),
        dimension_numbers=("NCHW", "OIHW", "NCHW"),
        precision=lax.Precision.HIGHEST)
    return out + b.reshape(1, -1, 1, 1)


def decoder_forward_ref(params, x):
    x = _conv_ref(x, params["conv1_w"], params["conv1_b"], 1, 1)
    for layer in params["res"]:
        h = jnp.maximum(x, 0.0)
        h = _conv_ref(h, layer["w1"], None, 1, 1)
        h = jnp.maximum(h, 0.0)
        h = _conv_ref(h, layer["w2"], None, 1, 0)
        x = x + h
    x = jnp.maximum(x, 0.0)
    x = _conv_transpose_ref(x, params["convt1_w"], params["convt1_b"], 2, 1)
    x = jnp.maximum(x, 0.0)
    x = _conv_transpose_ref(x, params["convt2_w"], params["convt2_b"], 2, 1)
    return x


# ---------------------------------- main ----------------------------------- #

if __name__ == "__main__":
    in_channels = 4              # latent/embedding channels feeding the decoder
    num_hiddens = 32
    num_residual_layers = 2
    num_residual_hiddens = 16
    batch, spatial = 2, 8        # decoder upsamples 8 -> 16 -> 32

    key = jax.random.PRNGKey(0)
    k_params, k_x = jax.random.split(key)
    params = init_decoder_params(k_params, in_channels, num_hiddens,
                                 num_residual_layers, num_residual_hiddens)
    x = jax.random.normal(k_x, (batch, in_channels, spatial, spatial),
                          jnp.float32)

    prepared = prepare_decoder_params(params)     # one-time weight preprocessing
    fwd = jax.jit(decoder_forward_pallas)
    out = jax.block_until_ready(fwd(prepared, x))

    ref = decoder_forward_ref(params, x)
    # bf16 MXU inputs / bf16 inter-layer activations (f32 accumulation).
    np.testing.assert_allclose(np.asarray(out), np.asarray(ref),
                               rtol=3e-2, atol=3e-3)
    assert out.shape == (batch, 3, spatial * 4, spatial * 4)

    print("KERNEL_OK")
</pallas_src>

<mosaic_0001>
module attributes {stable_mosaic.version = 11 : i64} {
  func.func @_stack_kernel(%arg0: i32, %arg1: memref<1x8x8x32xf32, #tpu.memory_space<vmem>>, %arg2: memref<9x32x32xbf16, #tpu.memory_space<vmem>>, %arg3: memref<1x32xf32, #tpu.memory_space<vmem>>, %arg4: memref<2x9x32x128xbf16, #tpu.memory_space<vmem>>, %arg5: memref<2x128x32xbf16, #tpu.memory_space<vmem>>, %arg6: memref<1x8x8x32xbf16, #tpu.memory_space<vmem>>, %arg7: memref<10x10x32xf32, #tpu.memory_space<vmem>>) attributes {dimension_semantics = [#tpu.dimension_semantics<parallel>], iteration_bounds = array<i64: 2>, scalar_prefetch = 0 : i64, scratch_operands = 1 : i64, tpu.core_type = #tpu.core_type<tc>, window_params = [{transform_indices = @transform_0, window_bounds = array<i64: 1, 8, 8, 32>}, {pipeline_mode = #tpu.pipeline_mode<synchronous>, transform_indices = @transform_1, window_bounds = array<i64: 9, 32, 32>}, {pipeline_mode = #tpu.pipeline_mode<synchronous>, transform_indices = @transform_2, window_bounds = array<i64: 1, 32>}, {pipeline_mode = #tpu.pipeline_mode<synchronous>, transform_indices = @transform_3, window_bounds = array<i64: 2, 9, 32, 128>}, {pipeline_mode = #tpu.pipeline_mode<synchronous>, transform_indices = @transform_4, window_bounds = array<i64: 2, 128, 32>}, {transform_indices = @transform_5, window_bounds = array<i64: 1, 8, 8, 32>}]} {
    %cst = arith.constant 0.000000e+00 : f32
    %0 = vector.broadcast %cst : f32 to vector<10x10x32xf32>
    %c0 = arith.constant 0 : index
    %c0_0 = arith.constant 0 : index
    %c0_1 = arith.constant 0 : index
    %1 = vector.load %arg7[%c0, %c0_0, %c0_1] : memref<10x10x32xf32, #tpu.memory_space<vmem>>, vector<10x10x32xf32>
    tpu.vector_store %arg7[%c0, %c0_0, %c0_1], %0 {strides = array<i32>} : memref<10x10x32xf32, #tpu.memory_space<vmem>>, vector<10x10x32xf32>,
    %c0_2 = arith.constant 0 : index
    %c0_3 = arith.constant 0 : index
    %c0_4 = arith.constant 0 : index
    %c0_5 = arith.constant 0 : index
    %2 = vector.load %arg1[%c0_2, %c0_3, %c0_4, %c0_5] : memref<1x8x8x32xf32, #tpu.memory_space<vmem>>, vector<1x8x8x32xf32>
    %3 = vector.shape_cast %2 : vector<1x8x8x32xf32> to vector<8x8x32xf32>
    %c1 = arith.constant 1 : index
    %c1_6 = arith.constant 1 : index
    %c0_7 = arith.constant 0 : index
    %4 = vector.load %arg7[%c1, %c1_6, %c0_7] : memref<10x10x32xf32, #tpu.memory_space<vmem>>, vector<8x8x32xf32>
    tpu.vector_store %arg7[%c1, %c1_6, %c0_7], %3 {strides = array<i32>} : memref<10x10x32xf32, #tpu.memory_space<vmem>>, vector<8x8x32xf32>,
    %cst_8 = arith.constant 0.000000e+00 : f32
    %5 = vector.broadcast %cst_8 : f32 to vector<64x32xf32>
    %c0_9 = arith.constant 0 : index
    %c0_10 = arith.constant 0 : index
    %c0_11 = arith.constant 0 : index
    %6 = vector.load %arg7[%c0_9, %c0_10, %c0_11] : memref<10x10x32xf32, #tpu.memory_space<vmem>>, vector<8x8x32xf32>
    %7 = vector.shape_cast %6 : vector<8x8x32xf32> to vector<64x32xf32>
    %8 = arith.truncf %7 : vector<64x32xf32> to vector<64x32xbf16>
    %c0_12 = arith.constant 0 : index
    %c0_13 = arith.constant 0 : index
    %c0_14 = arith.constant 0 : index
    %9 = vector.load %arg2[%c0_12, %c0_13, %c0_14] : memref<9x32x32xbf16, #tpu.memory_space<vmem>>, vector<1x32x32xbf16>
    %10 = vector.shape_cast %9 : vector<1x32x32xbf16> to vector<32x32xbf16>
    %cst_15 = arith.constant dense<0.000000e+00> : vector<64x32xf32>
    %11 = tpu.matmul %8, %10, %cst_15 {dimension_numbers = #tpu.dot_dimension_numbers<[1], [0], [0], [1], [0, 0, 1, 1], [], []>} : vector<64x32xbf16>, vector<32x32xbf16>, vector<64x32xf32> -> vector<64x32xf32>
    %12 = arith.addf %5, %11 : vector<64x32xf32>
    %c0_16 = arith.constant 0 : index
    %c1_17 = arith.constant 1 : index
    %c0_18 = arith.constant 0 : index
    %13 = vector.load %arg7[%c0_16, %c1_17, %c0_18] : memref<10x10x32xf32, #tpu.memory_space<vmem>>, vector<8x8x32xf32>
    %14 = vector.shape_cast %13 : vector<8x8x32xf32> to vector<64x32xf32>
    %15 = arith.truncf %14 : vector<64x32xf32> to vector<64x32xbf16>
    %c1_19 = arith.constant 1 : index
    %c0_20 = arith.constant 0 : index
    %c0_21 = arith.constant 0 : index
    %16 = vector.load %arg2[%c1_19, %c0_20, %c0_21] : memref<9x32x32xbf16, #tpu.memory_space<vmem>>, vector<1x32x32xbf16>
    %17 = vector.shape_cast %16 : vector<1x32x32xbf16> to vector<32x32xbf16>
    %cst_22 = arith.constant dense<0.000000e+00> : vector<64x32xf32>
    %18 = tpu.matmul %15, %17, %cst_22 {dimension_numbers = #tpu.dot_dimension_numbers<[1], [0], [0], [1], [0, 0, 1, 1], [], []>} : vector<64x32xbf16>, vector<32x32xbf16>, vector<64x32xf32> -> vector<64x32xf32>
    %19 = arith.addf %12, %18 : vector<64x32xf32>
    %c0_23 = arith.constant 0 : index
    %c2 = arith.constant 2 : index
    %c0_24 = arith.constant 0 : index
    %20 = vector.load %arg7[%c0_23, %c2, %c0_24] : memref<10x10x32xf32, #tpu.memory_space<vmem>>, vector<8x8x32xf32>
    %21 = vector.shape_cast %20 : vector<8x8x32xf32> to vector<64x32xf32>
    %22 = arith.truncf %21 : vector<64x32xf32> to vector<64x32xbf16>
    %c2_25 = arith.constant 2 : index
    %c0_26 = arith.constant 0 : index
    %c0_27 = arith.constant 0 : index
    %23 = vector.load %arg2[%c2_25, %c0_26, %c0_27] : memref<9x32x32xbf16, #tpu.memory_space<vmem>>, vector<1x32x32xbf16>
    %24 = vector.shape_cast %23 : vector<1x32x32xbf16> to vector<32x32xbf16>
    %cst_28 = arith.constant dense<0.000000e+00> : vector<64x32xf32>
    %25 = tpu.matmul %22, %24, %cst_28 {dimension_numbers = #tpu.dot_dimension_numbers<[1], [0], [0], [1], [0, 0, 1, 1], [], []>} : vector<64x32xbf16>, vector<32x32xbf16>, vector<64x32xf32> -> vector<64x32xf32>
    %26 = arith.addf %19, %25 : vector<64x32xf32>
    %c1_29 = arith.constant 1 : index
    %c0_30 = arith.constant 0 : index
    %c0_31 = arith.constant 0 : index
    %27 = vector.load %arg7[%c1_29, %c0_30, %c0_31] : memref<10x10x32xf32, #tpu.memory_space<vmem>>, vector<8x8x32xf32>
    %28 = vector.shape_cast %27 : vector<8x8x32xf32> to vector<64x32xf32>
    %29 = arith.truncf %28 : vector<64x32xf32> to vector<64x32xbf16>
    %c3 = arith.constant 3 : index
    %c0_32 = arith.constant 0 : index
    %c0_33 = arith.constant 0 : index
    %30 = vector.load %arg2[%c3, %c0_32, %c0_33] : memref<9x32x32xbf16, #tpu.memory_space<vmem>>, vector<1x32x32xbf16>
    %31 = vector.shape_cast %30 : vector<1x32x32xbf16> to vector<32x32xbf16>
    %cst_34 = arith.constant dense<0.000000e+00> : vector<64x32xf32>
    %32 = tpu.matmul %29, %31, %cst_34 {dimension_numbers = #tpu.dot_dimension_numbers<[1], [0], [0], [1], [0, 0, 1, 1], [], []>} : vector<64x32xbf16>, vector<32x32xbf16>, vector<64x32xf32> -> vector<64x32xf32>
    %33 = arith.addf %26, %32 : vector<64x32xf32>
    %c1_35 = arith.constant 1 : index
    %c1_36 = arith.constant 1 : index
    %c0_37 = arith.constant 0 : index
    %34 = vector.load %arg7[%c1_35, %c1_36, %c0_37] : memref<10x10x32xf32, #tpu.memory_space<vmem>>, vector<8x8x32xf32>
    %35 = vector.shape_cast %34 : vector<8x8x32xf32> to vector<64x32xf32>
    %36 = arith.truncf %35 : vector<64x32xf32> to vector<64x32xbf16>
    %c4 = arith.constant 4 : index
    %c0_38 = arith.constant 0 : index
    %c0_39 = arith.constant 0 : index
    %37 = vector.load %arg2[%c4, %c0_38, %c0_39] : memref<9x32x32xbf16, #tpu.memory_space<vmem>>, vector<1x32x32xbf16>
    %38 = vector.shape_cast %37 : vector<1x32x32xbf16> to vector<32x32xbf16>
    %cst_40 = arith.constant dense<0.000000e+00> : vector<64x32xf32>
    %39 = tpu.matmul %36, %38, %cst_40 {dimension_numbers = #tpu.dot_dimension_numbers<[1], [0], [0], [1], [0, 0, 1, 1], [], []>} : vector<64x32xbf16>, vector<32x32xbf16>, vector<64x32xf32> -> vector<64x32xf32>
    %40 = arith.addf %33, %39 : vector<64x32xf32>
    %c1_41 = arith.constant 1 : index
    %c2_42 = arith.constant 2 : index
    %c0_43 = arith.constant 0 : index
    %41 = vector.load %arg7[%c1_41, %c2_42, %c0_43] : memref<10x10x32xf32, #tpu.memory_space<vmem>>, vector<8x8x32xf32>
    %42 = vector.shape_cast %41 : vector<8x8x32xf32> to vector<64x32xf32>
    %43 = arith.truncf %42 : vector<64x32xf32> to vector<64x32xbf16>
    %c5 = arith.constant 5 : index
    %c0_44 = arith.constant 0 : index
    %c0_45 = arith.constant 0 : index
    %44 = vector.load %arg2[%c5, %c0_44, %c0_45] : memref<9x32x32xbf16, #tpu.memory_space<vmem>>, vector<1x32x32xbf16>
    %45 = vector.shape_cast %44 : vector<1x32x32xbf16> to vector<32x32xbf16>
    %cst_46 = arith.constant dense<0.000000e+00> : vector<64x32xf32>
    %46 = tpu.matmul %43, %45, %cst_46 {dimension_numbers = #tpu.dot_dimension_numbers<[1], [0], [0], [1], [0, 0, 1, 1], [], []>} : vector<64x32xbf16>, vector<32x32xbf16>, vector<64x32xf32> -> vector<64x32xf32>
    %47 = arith.addf %40, %46 : vector<64x32xf32>
    %c2_47 = arith.constant 2 : index
    %c0_48 = arith.constant 0 : index
    %c0_49 = arith.constant 0 : index
    %48 = vector.load %arg7[%c2_47, %c0_48, %c0_49] : memref<10x10x32xf32, #tpu.memory_space<vmem>>, vector<8x8x32xf32>
    %49 = vector.shape_cast %48 : vector<8x8x32xf32> to vector<64x32xf32>
    %50 = arith.truncf %49 : vector<64x32xf32> to vector<64x32xbf16>
    %c6 = arith.constant 6 : index
    %c0_50 = arith.constant 0 : index
    %c0_51 = arith.constant 0 : index
    %51 = vector.load %arg2[%c6, %c0_50, %c0_51] : memref<9x32x32xbf16, #tpu.memory_space<vmem>>, vector<1x32x32xbf16>
    %52 = vector.shape_cast %51 : vector<1x32x32xbf16> to vector<32x32xbf16>
    %cst_52 = arith.constant dense<0.000000e+00> : vector<64x32xf32>
    %53 = tpu.matmul %50, %52, %cst_52 {dimension_numbers = #tpu.dot_dimension_numbers<[1], [0], [0], [1], [0, 0, 1, 1], [], []>} : vector<64x32xbf16>, vector<32x32xbf16>, vector<64x32xf32> -> vector<64x32xf32>
    %54 = arith.addf %47, %53 : vector<64x32xf32>
    %c2_53 = arith.constant 2 : index
    %c1_54 = arith.constant 1 : index
    %c0_55 = arith.constant 0 : index
    %55 = vector.load %arg7[%c2_53, %c1_54, %c0_55] : memref<10x10x32xf32, #tpu.memory_space<vmem>>, vector<8x8x32xf32>
    %56 = vector.shape_cast %55 : vector<8x8x32xf32> to vector<64x32xf32>
    %57 = arith.truncf %56 : vector<64x32xf32> to vector<64x32xbf16>
    %c7 = arith.constant 7 : index
    %c0_56 = arith.constant 0 : index
    %c0_57 = arith.constant 0 : index
    %58 = vector.load %arg2[%c7, %c0_56, %c0_57] : memref<9x32x32xbf16, #tpu.memory_space<vmem>>, vector<1x32x32xbf16>
    %59 = vector.shape_cast %58 : vector<1x32x32xbf16> to vector<32x32xbf16>
    %cst_58 = arith.constant dense<0.000000e+00> : vector<64x32xf32>
    %60 = tpu.matmul %57, %59, %cst_58 {dimension_numbers = #tpu.dot_dimension_numbers<[1], [0], [0], [1], [0, 0, 1, 1], [], []>} : vector<64x32xbf16>, vector<32x32xbf16>, vector<64x32xf32> -> vector<64x32xf32>
    %61 = arith.addf %54, %60 : vector<64x32xf32>
    %c2_59 = arith.constant 2 : index
    %c2_60 = arith.constant 2 : index
    %c0_61 = arith.constant 0 : index
    %62 = vector.load %arg7[%c2_59, %c2_60, %c0_61] : memref<10x10x32xf32, #tpu.memory_space<vmem>>, vector<8x8x32xf32>
    %63 = vector.shape_cast %62 : vector<8x8x32xf32> to vector<64x32xf32>
    %64 = arith.truncf %63 : vector<64x32xf32> to vector<64x32xbf16>
    %c8 = arith.constant 8 : index
    %c0_62 = arith.constant 0 : index
    %c0_63 = arith.constant 0 : index
    %65 = vector.load %arg2[%c8, %c0_62, %c0_63] : memref<9x32x32xbf16, #tpu.memory_space<vmem>>, vector<1x32x32xbf16>
    %66 = vector.shape_cast %65 : vector<1x32x32xbf16> to vector<32x32xbf16>
    %cst_64 = arith.constant dense<0.000000e+00> : vector<64x32xf32>
    %67 = tpu.matmul %64, %66, %cst_64 {dimension_numbers = #tpu.dot_dimension_numbers<[1], [0], [0], [1], [0, 0, 1, 1], [], []>} : vector<64x32xbf16>, vector<32x32xbf16>, vector<64x32xf32> -> vector<64x32xf32>
    %68 = arith.addf %61, %67 : vector<64x32xf32>
    %c0_65 = arith.constant 0 : index
    %c0_66 = arith.constant 0 : index
    %69 = vector.load %arg3[%c0_65, %c0_66] : memref<1x32xf32, #tpu.memory_space<vmem>>, vector<1x32xf32>
    %70 = vector.broadcast %69 : vector<1x32xf32> to vector<64x32xf32>
    %71 = arith.addf %68, %70 : vector<64x32xf32>
    %cst_67 = arith.constant 0.000000e+00 : f32
    %72 = vector.broadcast %cst_67 : f32 to vector<64x32xf32>
    %73 = arith.maximumf %71, %72 : vector<64x32xf32>
    %74 = vector.shape_cast %73 : vector<64x32xf32> to vector<8x8x32xf32>
    %c1_68 = arith.constant 1 : index
    %c1_69 = arith.constant 1 : index
    %c0_70 = arith.constant 0 : index
    %75 = vector.load %arg7[%c1_68, %c1_69, %c0_70] : memref<10x10x32xf32, #tpu.memory_space<vmem>>, vector<8x8x32xf32>
    tpu.vector_store %arg7[%c1_68, %c1_69, %c0_70], %74 {strides = array<i32>} : memref<10x10x32xf32, #tpu.memory_space<vmem>>, vector<8x8x32xf32>,
    %cst_71 = arith.constant 0.000000e+00 : f32
    %76 = vector.broadcast %cst_71 : f32 to vector<64x128xf32>
    %c0_72 = arith.constant 0 : index
    %c0_73 = arith.constant 0 : index
    %c0_74 = arith.constant 0 : index
    %77 = vector.load %arg7[%c0_72, %c0_73, %c0_74] : memref<10x10x32xf32, #tpu.memory_space<vmem>>, vector<8x8x32xf32>
    %78 = vector.shape_cast %77 : vector<8x8x32xf32> to vector<64x32xf32>
    %79 = arith.truncf %78 : vector<64x32xf32> to vector<64x32xbf16>
    %c0_75 = arith.constant 0 : index
    %c0_76 = arith.constant 0 : index
    %c0_77 = arith.constant 0 : index
    %c0_78 = arith.constant 0 : index
    %80 = vector.load %arg4[%c0_75, %c0_76, %c0_77, %c0_78] : memref<2x9x32x128xbf16, #tpu.memory_space<vmem>>, vector<1x1x32x128xbf16>
    %81 = vector.shape_cast %80 : vector<1x1x32x128xbf16> to vector<32x128xbf16>
    %cst_79 = arith.constant dense<0.000000e+00> : vector<64x128xf32>
    %82 = tpu.matmul %79, %81, %cst_79 {dimension_numbers = #tpu.dot_dimension_numbers<[1], [0], [0], [1], [0, 0, 1, 1], [], []>} : vector<64x32xbf16>, vector<32x128xbf16>, vector<64x128xf32> -> vector<64x128xf32>
    %83 = arith.addf %76, %82 : vector<64x128xf32>
    %c0_80 = arith.constant 0 : index
    %c1_81 = arith.constant 1 : index
    %c0_82 = arith.constant 0 : index
    %84 = vector.load %arg7[%c0_80, %c1_81, %c0_82] : memref<10x10x32xf32, #tpu.memory_space<vmem>>, vector<8x8x32xf32>
    %85 = vector.shape_cast %84 : vector<8x8x32xf32> to vector<64x32xf32>
    %86 = arith.truncf %85 : vector<64x32xf32> to vector<64x32xbf16>
    %c0_83 = arith.constant 0 : index
    %c1_84 = arith.constant 1 : index
    %c0_85 = arith.constant 0 : index
    %c0_86 = arith.constant 0 : index
    %87 = vector.load %arg4[%c0_83, %c1_84, %c0_85, %c0_86] : memref<2x9x32x128xbf16, #tpu.memory_space<vmem>>, vector<1x1x32x128xbf16>
    %88 = vector.shape_cast %87 : vector<1x1x32x128xbf16> to vector<32x128xbf16>
    %cst_87 = arith.constant dense<0.000000e+00> : vector<64x128xf32>
    %89 = tpu.matmul %86, %88, %cst_87 {dimension_numbers = #tpu.dot_dimension_numbers<[1], [0], [0], [1], [0, 0, 1, 1], [], []>} : vector<64x32xbf16>, vector<32x128xbf16>, vector<64x128xf32> -> vector<64x128xf32>
    %90 = arith.addf %83, %89 : vector<64x128xf32>
    %c0_88 = arith.constant 0 : index
    %c2_89 = arith.constant 2 : index
    %c0_90 = arith.constant 0 : index
    %91 = vector.load %arg7[%c0_88, %c2_89, %c0_90] : memref<10x10x32xf32, #tpu.memory_space<vmem>>, vector<8x8x32xf32>
    %92 = vector.shape_cast %91 : vector<8x8x32xf32> to vector<64x32xf32>
    %93 = arith.truncf %92 : vector<64x32xf32> to vector<64x32xbf16>
    %c0_91 = arith.constant 0 : index
    %c2_92 = arith.constant 2 : index
    %c0_93 = arith.constant 0 : index
    %c0_94 = arith.constant 0 : index
    %94 = vector.load %arg4[%c0_91, %c2_92, %c0_93, %c0_94] : memref<2x9x32x128xbf16, #tpu.memory_space<vmem>>, vector<1x1x32x128xbf16>
    %95 = vector.shape_cast %94 : vector<1x1x32x128xbf16> to vector<32x128xbf16>
    %cst_95 = arith.constant dense<0.000000e+00> : vector<64x128xf32>
    %96 = tpu.matmul %93, %95, %cst_95 {dimension_numbers = #tpu.dot_dimension_numbers<[1], [0], [0], [1], [0, 0, 1, 1], [], []>} : vector<64x32xbf16>, vector<32x128xbf16>, vector<64x128xf32> -> vector<64x128xf32>
    %97 = arith.addf %90, %96 : vector<64x128xf32>
    %c1_96 = arith.constant 1 : index
    %c0_97 = arith.constant 0 : index
    %c0_98 = arith.constant 0 : index
    %98 = vector.load %arg7[%c1_96, %c0_97, %c0_98] : memref<10x10x32xf32, #tpu.memory_space<vmem>>, vector<8x8x32xf32>
    %99 = vector.shape_cast %98 : vector<8x8x32xf32> to vector<64x32xf32>
    %100 = arith.truncf %99 : vector<64x32xf32> to vector<64x32xbf16>
    %c0_99 = arith.constant 0 : index
    %c3_100 = arith.constant 3 : index
    %c0_101 = arith.constant 0 : index
    %c0_102 = arith.constant 0 : index
    %101 = vector.load %arg4[%c0_99, %c3_100, %c0_101, %c0_102] : memref<2x9x32x128xbf16, #tpu.memory_space<vmem>>, vector<1x1x32x128xbf16>
    %102 = vector.shape_cast %101 : vector<1x1x32x128xbf16> to vector<32x128xbf16>
    %cst_103 = arith.constant dense<0.000000e+00> : vector<64x128xf32>
    %103 = tpu.matmul %100, %102, %cst_103 {dimension_numbers = #tpu.dot_dimension_numbers<[1], [0], [0], [1], [0, 0, 1, 1], [], []>} : vector<64x32xbf16>, vector<32x128xbf16>, vector<64x128xf32> -> vector<64x128xf32>
    %104 = arith.addf %97, %103 : vector<64x128xf32>
    %c1_104 = arith.constant 1 : index
    %c1_105 = arith.constant 1 : index
    %c0_106 = arith.constant 0 : index
    %105 = vector.load %arg7[%c1_104, %c1_105, %c0_106] : memref<10x10x32xf32, #tpu.memory_space<vmem>>, vector<8x8x32xf32>
    %106 = vector.shape_cast %105 : vector<8x8x32xf32> to vector<64x32xf32>
    %107 = arith.truncf %106 : vector<64x32xf32> to vector<64x32xbf16>
    %c0_107 = arith.constant 0 : index
    %c4_108 = arith.constant 4 : index
    %c0_109 = arith.constant 0 : index
    %c0_110 = arith.constant 0 : index
    %108 = vector.load %arg4[%c0_107, %c4_108, %c0_109, %c0_110] : memref<2x9x32x128xbf16, #tpu.memory_space<vmem>>, vector<1x1x32x128xbf16>
    %109 = vector.shape_cast %108 : vector<1x1x32x128xbf16> to vector<32x128xbf16>
    %cst_111 = arith.constant dense<0.000000e+00> : vector<64x128xf32>
    %110 = tpu.matmul %107, %109, %cst_111 {dimension_numbers = #tpu.dot_dimension_numbers<[1], [0], [0], [1], [0, 0, 1, 1], [], []>} : vector<64x32xbf16>, vector<32x128xbf16>, vector<64x128xf32> -> vector<64x128xf32>
    %111 = arith.addf %104, %110 : vector<64x128xf32>
    %c1_112 = arith.constant 1 : index
    %c2_113 = arith.constant 2 : index
    %c0_114 = arith.constant 0 : index
    %112 = vector.load %arg7[%c1_112, %c2_113, %c0_114] : memref<10x10x32xf32, #tpu.memory_space<vmem>>, vector<8x8x32xf32>
    %113 = vector.shape_cast %112 : vector<8x8x32xf32> to vector<64x32xf32>
    %114 = arith.truncf %113 : vector<64x32xf32> to vector<64x32xbf16>
    %c0_115 = arith.constant 0 : index
    %c5_116 = arith.constant 5 : index
    %c0_117 = arith.constant 0 : index
    %c0_118 = arith.constant 0 : index
    %115 = vector.load %arg4[%c0_115, %c5_116, %c0_117, %c0_118] : memref<2x9x32x128xbf16, #tpu.memory_space<vmem>>, vector<1x1x32x128xbf16>
    %116 = vector.shape_cast %115 : vector<1x1x32x128xbf16> to vector<32x128xbf16>
    %cst_119 = arith.constant dense<0.000000e+00> : vector<64x128xf32>
    %117 = tpu.matmul %114, %116, %cst_119 {dimension_numbers = #tpu.dot_dimension_numbers<[1], [0], [0], [1], [0, 0, 1, 1], [], []>} : vector<64x32xbf16>, vector<32x128xbf16>, vector<64x128xf32> -> vector<64x128xf32>
    %118 = arith.addf %111, %117 : vector<64x128xf32>
    %c2_120 = arith.constant 2 : index
    %c0_121 = arith.constant 0 : index
    %c0_122 = arith.constant 0 : index
    %119 = vector.load %arg7[%c2_120, %c0_121, %c0_122] : memref<10x10x32xf32, #tpu.memory_space<vmem>>, vector<8x8x32xf32>
    %120 = vector.shape_cast %119 : vector<8x8x32xf32> to vector<64x32xf32>
    %121 = arith.truncf %120 : vector<64x32xf32> to vector<64x32xbf16>
    %c0_123 = arith.constant 0 : index
    %c6_124 = arith.constant 6 : index
    %c0_125 = arith.constant 0 : index
    %c0_126 = arith.constant 0 : index
    %122 = vector.load %arg4[%c0_123, %c6_124, %c0_125, %c0_126] : memref<2x9x32x128xbf16, #tpu.memory_space<vmem>>, vector<1x1x32x128xbf16>
    %123 = vector.shape_cast %122 : vector<1x1x32x128xbf16> to vector<32x128xbf16>
    %cst_127 = arith.constant dense<0.000000e+00> : vector<64x128xf32>
    %124 = tpu.matmul %121, %123, %cst_127 {dimension_numbers = #tpu.dot_dimension_numbers<[1], [0], [0], [1], [0, 0, 1, 1], [], []>} : vector<64x32xbf16>, vector<32x128xbf16>, vector<64x128xf32> -> vector<64x128xf32>
    %125 = arith.addf %118, %124 : vector<64x128xf32>
    %c2_128 = arith.constant 2 : index
    %c1_129 = arith.constant 1 : index
    %c0_130 = arith.constant 0 : index
    %126 = vector.load %arg7[%c2_128, %c1_129, %c0_130] : memref<10x10x32xf32, #tpu.memory_space<vmem>>, vector<8x8x32xf32>
    %127 = vector.shape_cast %126 : vector<8x8x32xf32> to vector<64x32xf32>
    %128 = arith.truncf %127 : vector<64x32xf32> to vector<64x32xbf16>
    %c0_131 = arith.constant 0 : index
    %c7_132 = arith.constant 7 : index
    %c0_133 = arith.constant 0 : index
    %c0_134 = arith.constant 0 : index
    %129 = vector.load %arg4[%c0_131, %c7_132, %c0_133, %c0_134] : memref<2x9x32x128xbf16, #tpu.memory_space<vmem>>, vector<1x1x32x128xbf16>
    %130 = vector.shape_cast %129 : vector<1x1x32x128xbf16> to vector<32x128xbf16>
    %cst_135 = arith.constant dense<0.000000e+00> : vector<64x128xf32>
    %131 = tpu.matmul %128, %130, %cst_135 {dimension_numbers = #tpu.dot_dimension_numbers<[1], [0], [0], [1], [0, 0, 1, 1], [], []>} : vector<64x32xbf16>, vector<32x128xbf16>, vector<64x128xf32> -> vector<64x128xf32>
    %132 = arith.addf %125, %131 : vector<64x128xf32>
    %c2_136 = arith.constant 2 : index
    %c2_137 = arith.constant 2 : index
    %c0_138 = arith.constant 0 : index
    %133 = vector.load %arg7[%c2_136, %c2_137, %c0_138] : memref<10x10x32xf32, #tpu.memory_space<vmem>>, vector<8x8x32xf32>
    %134 = vector.shape_cast %133 : vector<8x8x32xf32> to vector<64x32xf32>
    %135 = arith.truncf %134 : vector<64x32xf32> to vector<64x32xbf16>
    %c0_139 = arith.constant 0 : index
    %c8_140 = arith.constant 8 : index
    %c0_141 = arith.constant 0 : index
    %c0_142 = arith.constant 0 : index
    %136 = vector.load %arg4[%c0_139, %c8_140, %c0_141, %c0_142] : memref<2x9x32x128xbf16, #tpu.memory_space<vmem>>, vector<1x1x32x128xbf16>
    %137 = vector.shape_cast %136 : vector<1x1x32x128xbf16> to vector<32x128xbf16>
    %cst_143 = arith.constant dense<0.000000e+00> : vector<64x128xf32>
    %138 = tpu.matmul %135, %137, %cst_143 {dimension_numbers = #tpu.dot_dimension_numbers<[1], [0], [0], [1], [0, 0, 1, 1], [], []>} : vector<64x32xbf16>, vector<32x128xbf16>, vector<64x128xf32> -> vector<64x128xf32>
    %139 = arith.addf %132, %138 : vector<64x128xf32>
    %cst_144 = arith.constant 0.000000e+00 : f32
    %140 = vector.broadcast %cst_144 : f32 to vector<64x128xf32>
    %141 = arith.maximumf %139, %140 : vector<64x128xf32>
    %142 = arith.truncf %141 : vector<64x128xf32> to vector<64x128xbf16>
    %c0_145 = arith.constant 0 : index
    %c0_146 = arith.constant 0 : index
    %c0_147 = arith.constant 0 : index
    %143 = vector.load %arg5[%c0_145, %c0_146, %c0_147] : memref<2x128x32xbf16, #tpu.memory_space<vmem>>, vector<1x128x32xbf16>
    %144 = vector.shape_cast %143 : vector<1x128x32xbf16> to vector<128x32xbf16>
    %cst_148 = arith.constant dense<0.000000e+00> : vector<64x32xf32>
    %145 = tpu.matmul %142, %144, %cst_148 {dimension_numbers = #tpu.dot_dimension_numbers<[1], [0], [0], [1], [0, 0, 1, 1], [], []>} : vector<64x128xbf16>, vector<128x32xbf16>, vector<64x32xf32> -> vector<64x32xf32>
    %146 = arith.addf %71, %145 : vector<64x32xf32>
    %cst_149 = arith.constant 0.000000e+00 : f32
    %147 = vector.broadcast %cst_149 : f32 to vector<64x32xf32>
    %148 = arith.maximumf %146, %147 : vector<64x32xf32>
    %149 = vector.shape_cast %148 : vector<64x32xf32> to vector<8x8x32xf32>
    %c1_150 = arith.constant 1 : index
    %c1_151 = arith.constant 1 : index
    %c0_152 = arith.constant 0 : index
    %150 = vector.load %arg7[%c1_150, %c1_151, %c0_152] : memref<10x10x32xf32, #tpu.memory_space<vmem>>, vector<8x8x32xf32>
    tpu.vector_store %arg7[%c1_150, %c1_151, %c0_152], %149 {strides = array<i32>} : memref<10x10x32xf32, #tpu.memory_space<vmem>>, vector<8x8x32xf32>,
    %cst_153 = arith.constant 0.000000e+00 : f32
    %151 = vector.broadcast %cst_153 : f32 to vector<64x128xf32>
    %c0_154 = arith.constant 0 : index
    %c0_155 = arith.constant 0 : index
    %c0_156 = arith.constant 0 : index
    %152 = vector.load %arg7[%c0_154, %c0_155, %c0_156] : memref<10x10x32xf32, #tpu.memory_space<vmem>>, vector<8x8x32xf32>
    %153 = vector.shape_cast %152 : vector<8x8x32xf32> to vector<64x32xf32>
    %154 = arith.truncf %153 : vector<64x32xf32> to vector<64x32xbf16>
    %c1_157 = arith.constant 1 : index
    %c0_158 = arith.constant 0 : index
    %c0_159 = arith.constant 0 : index
    %c0_160 = arith.constant 0 : index
    %155 = vector.load %arg4[%c1_157, %c0_158, %c0_159, %c0_160] : memref<2x9x32x128xbf16, #tpu.memory_space<vmem>>, vector<1x1x32x128xbf16>
    %156 = vector.shape_cast %155 : vector<1x1x32x128xbf16> to vector<32x128xbf16>
    %cst_161 = arith.constant dense<0.000000e+00> : vector<64x128xf32>
    %157 = tpu.matmul %154, %156, %cst_161 {dimension_numbers = #tpu.dot_dimension_numbers<[1], [0], [0], [1], [0, 0, 1, 1], [], []>} : vector<64x32xbf16>, vector<32x128xbf16>, vector<64x128xf32> -> vector<64x128xf32>
    %158 = arith.addf %151, %157 : vector<64x128xf32>
    %c0_162 = arith.constant 0 : index
    %c1_163 = arith.constant 1 : index
    %c0_164 = arith.constant 0 : index
    %159 = vector.load %arg7[%c0_162, %c1_163, %c0_164] : memref<10x10x32xf32, #tpu.memory_space<vmem>>, vector<8x8x32xf32>
    %160 = vector.shape_cast %159 : vector<8x8x32xf32> to vector<64x32xf32>
    %161 = arith.truncf %160 : vector<64x32xf32> to vector<64x32xbf16>
    %c1_165 = arith.constant 1 : index
    %c1_166 = arith.constant 1 : index
    %c0_167 = arith.constant 0 : index
    %c0_168 = arith.constant 0 : index
    %162 = vector.load %arg4[%c1_165, %c1_166, %c0_167, %c0_168] : memref<2x9x32x128xbf16, #tpu.memory_space<vmem>>, vector<1x1x32x128xbf16>
    %163 = vector.shape_cast %162 : vector<1x1x32x128xbf16> to vector<32x128xbf16>
    %cst_169 = arith.constant dense<0.000000e+00> : vector<64x128xf32>
    %164 = tpu.matmul %161, %163, %cst_169 {dimension_numbers = #tpu.dot_dimension_numbers<[1], [0], [0], [1], [0, 0, 1, 1], [], []>} : vector<64x32xbf16>, vector<32x128xbf16>, vector<64x128xf32> -> vector<64x128xf32>
    %165 = arith.addf %158, %164 : vector<64x128xf32>
    %c0_170 = arith.constant 0 : index
    %c2_171 = arith.constant 2 : index
    %c0_172 = arith.constant 0 : index
    %166 = vector.load %arg7[%c0_170, %c2_171, %c0_172] : memref<10x10x32xf32, #tpu.memory_space<vmem>>, vector<8x8x32xf32>
    %167 = vector.shape_cast %166 : vector<8x8x32xf32> to vector<64x32xf32>
    %168 = arith.truncf %167 : vector<64x32xf32> to vector<64x32xbf16>
    %c1_173 = arith.constant 1 : index
    %c2_174 = arith.constant 2 : index
    %c0_175 = arith.constant 0 : index
    %c0_176 = arith.constant 0 : index
    %169 = vector.load %arg4[%c1_173, %c2_174, %c0_175, %c0_176] : memref<2x9x32x128xbf16, #tpu.memory_space<vmem>>, vector<1x1x32x128xbf16>
    %170 = vector.shape_cast %169 : vector<1x1x32x128xbf16> to vector<32x128xbf16>
    %cst_177 = arith.constant dense<0.000000e+00> : vector<64x128xf32>
    %171 = tpu.matmul %168, %170, %cst_177 {dimension_numbers = #tpu.dot_dimension_numbers<[1], [0], [0], [1], [0, 0, 1, 1], [], []>} : vector<64x32xbf16>, vector<32x128xbf16>, vector<64x128xf32> -> vector<64x128xf32>
    %172 = arith.addf %165, %171 : vector<64x128xf32>
    %c1_178 = arith.constant 1 : index
    %c0_179 = arith.constant 0 : index
    %c0_180 = arith.constant 0 : index
    %173 = vector.load %arg7[%c1_178, %c0_179, %c0_180] : memref<10x10x32xf32, #tpu.memory_space<vmem>>, vector<8x8x32xf32>
    %174 = vector.shape_cast %173 : vector<8x8x32xf32> to vector<64x32xf32>
    %175 = arith.truncf %174 : vector<64x32xf32> to vector<64x32xbf16>
    %c1_181 = arith.constant 1 : index
    %c3_182 = arith.constant 3 : index
    %c0_183 = arith.constant 0 : index
    %c0_184 = arith.constant 0 : index
    %176 = vector.load %arg4[%c1_181, %c3_182, %c0_183, %c0_184] : memref<2x9x32x128xbf16, #tpu.memory_space<vmem>>, vector<1x1x32x128xbf16>
    %177 = vector.shape_cast %176 : vector<1x1x32x128xbf16> to vector<32x128xbf16>
    %cst_185 = arith.constant dense<0.000000e+00> : vector<64x128xf32>
    %178 = tpu.matmul %175, %177, %cst_185 {dimension_numbers = #tpu.dot_dimension_numbers<[1], [0], [0], [1], [0, 0, 1, 1], [], []>} : vector<64x32xbf16>, vector<32x128xbf16>, vector<64x128xf32> -> vector<64x128xf32>
    %179 = arith.addf %172, %178 : vector<64x128xf32>
    %c1_186 = arith.constant 1 : index
    %c1_187 = arith.constant 1 : index
    %c0_188 = arith.constant 0 : index
    %180 = vector.load %arg7[%c1_186, %c1_187, %c0_188] : memref<10x10x32xf32, #tpu.memory_space<vmem>>, vector<8x8x32xf32>
    %181 = vector.shape_cast %180 : vector<8x8x32xf32> to vector<64x32xf32>
    %182 = arith.truncf %181 : vector<64x32xf32> to vector<64x32xbf16>
    %c1_189 = arith.constant 1 : index
    %c4_190 = arith.constant 4 : index
    %c0_191 = arith.constant 0 : index
    %c0_192 = arith.constant 0 : index
    %183 = vector.load %arg4[%c1_189, %c4_190, %c0_191, %c0_192] : memref<2x9x32x128xbf16, #tpu.memory_space<vmem>>, vector<1x1x32x128xbf16>
    %184 = vector.shape_cast %183 : vector<1x1x32x128xbf16> to vector<32x128xbf16>
    %cst_193 = arith.constant dense<0.000000e+00> : vector<64x128xf32>
    %185 = tpu.matmul %182, %184, %cst_193 {dimension_numbers = #tpu.dot_dimension_numbers<[1], [0], [0], [1], [0, 0, 1, 1], [], []>} : vector<64x32xbf16>, vector<32x128xbf16>, vector<64x128xf32> -> vector<64x128xf32>
    %186 = arith.addf %179, %185 : vector<64x128xf32>
    %c1_194 = arith.constant 1 : index
    %c2_195 = arith.constant 2 : index
    %c0_196 = arith.constant 0 : index
    %187 = vector.load %arg7[%c1_194, %c2_195, %c0_196] : memref<10x10x32xf32, #tpu.memory_space<vmem>>, vector<8x8x32xf32>
    %188 = vector.shape_cast %187 : vector<8x8x32xf32> to vector<64x32xf32>
    %189 = arith.truncf %188 : vector<64x32xf32> to vector<64x32xbf16>
    %c1_197 = arith.constant 1 : index
    %c5_198 = arith.constant 5 : index
    %c0_199 = arith.constant 0 : index
    %c0_200 = arith.constant 0 : index
    %190 = vector.load %arg4[%c1_197, %c5_198, %c0_199, %c0_200] : memref<2x9x32x128xbf16, #tpu.memory_space<vmem>>, vector<1x1x32x128xbf16>
    %191 = vector.shape_cast %190 : vector<1x1x32x128xbf16> to vector<32x128xbf16>
    %cst_201 = arith.constant dense<0.000000e+00> : vector<64x128xf32>
    %192 = tpu.matmul %189, %191, %cst_201 {dimension_numbers = #tpu.dot_dimension_numbers<[1], [0], [0], [1], [0, 0, 1, 1], [], []>} : vector<64x32xbf16>, vector<32x128xbf16>, vector<64x128xf32> -> vector<64x128xf32>
    %193 = arith.addf %186, %192 : vector<64x128xf32>
    %c2_202 = arith.constant 2 : index
    %c0_203 = arith.constant 0 : index
    %c0_204 = arith.constant 0 : index
    %194 = vector.load %arg7[%c2_202, %c0_203, %c0_204] : memref<10x10x32xf32, #tpu.memory_space<vmem>>, vector<8x8x32xf32>
    %195 = vector.shape_cast %194 : vector<8x8x32xf32> to vector<64x32xf32>
    %196 = arith.truncf %195 : vector<64x32xf32> to vector<64x32xbf16>
    %c1_205 = arith.constant 1 : index
    %c6_206 = arith.constant 6 : index
    %c0_207 = arith.constant 0 : index
    %c0_208 = arith.constant 0 : index
    %197 = vector.load %arg4[%c1_205, %c6_206, %c0_207, %c0_208] : memref<2x9x32x128xbf16, #tpu.memory_space<vmem>>, vector<1x1x32x128xbf16>
    %198 = vector.shape_cast %197 : vector<1x1x32x128xbf16> to vector<32x128xbf16>
    %cst_209 = arith.constant dense<0.000000e+00> : vector<64x128xf32>
    %199 = tpu.matmul %196, %198, %cst_209 {dimension_numbers = #tpu.dot_dimension_numbers<[1], [0], [0], [1], [0, 0, 1, 1], [], []>} : vector<64x32xbf16>, vector<32x128xbf16>, vector<64x128xf32> -> vector<64x128xf32>
    %200 = arith.addf %193, %199 : vector<64x128xf32>
    %c2_210 = arith.constant 2 : index
    %c1_211 = arith.constant 1 : index
    %c0_212 = arith.constant 0 : index
    %201 = vector.load %arg7[%c2_210, %c1_211, %c0_212] : memref<10x10x32xf32, #tpu.memory_space<vmem>>, vector<8x8x32xf32>
    %202 = vector.shape_cast %201 : vector<8x8x32xf32> to vector<64x32xf32>
    %203 = arith.truncf %202 : vector<64x32xf32> to vector<64x32xbf16>
    %c1_213 = arith.constant 1 : index
    %c7_214 = arith.constant 7 : index
    %c0_215 = arith.constant 0 : index
    %c0_216 = arith.constant 0 : index
    %204 = vector.load %arg4[%c1_213, %c7_214, %c0_215, %c0_216] : memref<2x9x32x128xbf16, #tpu.memory_space<vmem>>, vector<1x1x32x128xbf16>
    %205 = vector.shape_cast %204 : vector<1x1x32x128xbf16> to vector<32x128xbf16>
    %cst_217 = arith.constant dense<0.000000e+00> : vector<64x128xf32>
    %206 = tpu.matmul %203, %205, %cst_217 {dimension_numbers = #tpu.dot_dimension_numbers<[1], [0], [0], [1], [0, 0, 1, 1], [], []>} : vector<64x32xbf16>, vector<32x128xbf16>, vector<64x128xf32> -> vector<64x128xf32>
    %207 = arith.addf %200, %206 : vector<64x128xf32>
    %c2_218 = arith.constant 2 : index
    %c2_219 = arith.constant 2 : index
    %c0_220 = arith.constant 0 : index
    %208 = vector.load %arg7[%c2_218, %c2_219, %c0_220] : memref<10x10x32xf32, #tpu.memory_space<vmem>>, vector<8x8x32xf32>
    %209 = vector.shape_cast %208 : vector<8x8x32xf32> to vector<64x32xf32>
    %210 = arith.truncf %209 : vector<64x32xf32> to vector<64x32xbf16>
    %c1_221 = arith.constant 1 : index
    %c8_222 = arith.constant 8 : index
    %c0_223 = arith.constant 0 : index
    %c0_224 = arith.constant 0 : index
    %211 = vector.load %arg4[%c1_221, %c8_222, %c0_223, %c0_224] : memref<2x9x32x128xbf16, #tpu.memory_space<vmem>>, vector<1x1x32x128xbf16>
    %212 = vector.shape_cast %211 : vector<1x1x32x128xbf16> to vector<32x128xbf16>
    %cst_225 = arith.constant dense<0.000000e+00> : vector<64x128xf32>
    %213 = tpu.matmul %210, %212, %cst_225 {dimension_numbers = #tpu.dot_dimension_numbers<[1], [0], [0], [1], [0, 0, 1, 1], [], []>} : vector<64x32xbf16>, vector<32x128xbf16>, vector<64x128xf32> -> vector<64x128xf32>
    %214 = arith.addf %207, %213 : vector<64x128xf32>
    %cst_226 = arith.constant 0.000000e+00 : f32
    %215 = vector.broadcast %cst_226 : f32 to vector<64x128xf32>
    %216 = arith.maximumf %214, %215 : vector<64x128xf32>
    %217 = arith.truncf %216 : vector<64x128xf32> to vector<64x128xbf16>
    %c1_227 = arith.constant 1 : index
    %c0_228 = arith.constant 0 : index
    %c0_229 = arith.constant 0 : index
    %218 = vector.load %arg5[%c1_227, %c0_228, %c0_229] : memref<2x128x32xbf16, #tpu.memory_space<vmem>>, vector<1x128x32xbf16>
    %219 = vector.shape_cast %218 : vector<1x128x32xbf16> to vector<128x32xbf16>
    %cst_230 = arith.constant dense<0.000000e+00> : vector<64x32xf32>
    %220 = tpu.matmul %217, %219, %cst_230 {dimension_numbers = #tpu.dot_dimension_numbers<[1], [0], [0], [1], [0, 0, 1, 1], [], []>} : vector<64x128xbf16>, vector<128x32xbf16>, vector<64x32xf32> -> vector<64x32xf32>
    %221 = arith.addf %146, %220 : vector<64x32xf32>
    %cst_231 = arith.constant 0.000000e+00 : f32
    %222 = vector.broadcast %cst_231 : f32 to vector<64x32xf32>
    %223 = arith.maximumf %221, %222 : vector<64x32xf32>
    %224 = vector.shape_cast %223 : vector<64x32xf32> to vector<1x8x8x32xf32>
    %225 = arith.truncf %224 : vector<1x8x8x32xf32> to vector<1x8x8x32xbf16>
    %c0_232 = arith.constant 0 : index
    %c0_233 = arith.constant 0 : index
    %c0_234 = arith.constant 0 : index
    %c0_235 = arith.constant 0 : index
    %226 = vector.load %arg6[%c0_232, %c0_233, %c0_234, %c0_235] : memref<1x8x8x32xbf16, #tpu.memory_space<vmem>>, vector<1x8x8x32xbf16>
    tpu.vector_store %arg6[%c0_232, %c0_233, %c0_234, %c0_235], %225 {strides = array<i32>} : memref<1x8x8x32xbf16, #tpu.memory_space<vmem>>, vector<1x8x8x32xbf16>,
    return
  }
  func.func @transform_0(%arg0: i32) -> (i32, i32, i32, i32) {
    %c0_i32 = arith.constant 0 : i32
    %c0_i32_0 = arith.constant 0 : i32
    %c0_i32_1 = arith.constant 0 : i32
    %c0_i32_2 = arith.constant 0 : i32
    return %arg0, %c0_i32, %c0_i32_0, %c0_i32_1 : i32, i32, i32, i32
  }
  func.func @transform_1(%arg0: i32) -> (i32, i32, i32) {
    %c0_i32 = arith.constant 0 : i32
    %c0_i32_0 = arith.constant 0 : i32
    %c0_i32_1 = arith.constant 0 : i32
    %c0_i32_2 = arith.constant 0 : i32
    return %c0_i32, %c0_i32_0, %c0_i32_1 : i32, i32, i32
  }
  func.func @transform_2(%arg0: i32) -> (i32, i32) {
    %c0_i32 = arith.constant 0 : i32
    %c0_i32_0 = arith.constant 0 : i32
    %c0_i32_1 = arith.constant 0 : i32
    return %c0_i32, %c0_i32_0 : i32, i32
  }
  func.func @transform_3(%arg0: i32) -> (i32, i32, i32, i32) {
    %c0_i32 = arith.constant 0 : i32
    %c0_i32_0 = arith.constant 0 : i32
    %c0_i32_1 = arith.constant 0 : i32
    %c0_i32_2 = arith.constant 0 : i32
    %c0_i32_3 = arith.constant 0 : i32
    return %c0_i32, %c0_i32_0, %c0_i32_1, %c0_i32_2 : i32, i32, i32, i32
  }
  func.func @transform_4(%arg0: i32) -> (i32, i32, i32) {
    %c0_i32 = arith.constant 0 : i32
    %c0_i32_0 = arith.constant 0 : i32
    %c0_i32_1 = arith.constant 0 : i32
    %c0_i32_2 = arith.constant 0 : i32
    return %c0_i32, %c0_i32_0, %c0_i32_1 : i32, i32, i32
  }
  func.func @transform_5(%arg0: i32) -> (i32, i32, i32, i32) {
    %c0_i32 = arith.constant 0 : i32
    %c0_i32_0 = arith.constant 0 : i32
    %c0_i32_1 = arith.constant 0 : i32
    %c0_i32_2 = arith.constant 0 : i32
    return %arg0, %c0_i32, %c0_i32_0, %c0_i32_1 : i32, i32, i32, i32
  }
}

module attributes {stable_mosaic.version = 11 : i64} {
  func.func @_matmul_bias_kernel(%arg0: i32, %arg1: memref<96x128xbf16, #tpu.memory_space<vmem>>, %arg2: memref<128x128xbf16, #tpu.memory_space<vmem>>, %arg3: memref<1x128xf32, #tpu.memory_space<vmem>>, %arg4: memref<96x128xbf16, #tpu.memory_space<vmem>>) attributes {dimension_semantics = [#tpu.dimension_semantics<parallel>], iteration_bounds = array<i64: 2>, scalar_prefetch = 0 : i64, scratch_operands = 0 : i64, tpu.core_type = #tpu.core_type<tc>, window_params = [{transform_indices = @transform_0, window_bounds = array<i64: 96, 128>}, {pipeline_mode = #tpu.pipeline_mode<synchronous>, transform_indices = @transform_1, window_bounds = array<i64: 128, 128>}, {pipeline_mode = #tpu.pipeline_mode<synchronous>, transform_indices = @transform_2, window_bounds = array<i64: 1, 128>}, {transform_indices = @transform_3, window_bounds = array<i64: 96, 128>}]} {
    %c0 = arith.constant 0 : index
    %c0_0 = arith.constant 0 : index
    %0 = vector.load %arg1[%c0, %c0_0] : memref<96x128xbf16, #tpu.memory_space<vmem>>, vector<96x128xbf16>
    %c0_1 = arith.constant 0 : index
    %c0_2 = arith.constant 0 : index
    %1 = vector.load %arg2[%c0_1, %c0_2] : memref<128x128xbf16, #tpu.memory_space<vmem>>, vector<128x128xbf16>
    %cst = arith.constant dense<0.000000e+00> : vector<96x128xf32>
    %2 = tpu.matmul %0, %1, %cst {dimension_numbers = #tpu.dot_dimension_numbers<[1], [0], [0], [1], [0, 0, 1, 1], [], []>} : vector<96x128xbf16>, vector<128x128xbf16>, vector<96x128xf32> -> vector<96x128xf32>
    %c0_3 = arith.constant 0 : index
    %c0_4 = arith.constant 0 : index
    %3 = vector.load %arg3[%c0_3, %c0_4] : memref<1x128xf32, #tpu.memory_space<vmem>>, vector<1x128xf32>
    %4 = vector.broadcast %3 : vector<1x128xf32> to vector<96x128xf32>
    %5 = arith.addf %2, %4 : vector<96x128xf32>
    %cst_5 = arith.constant 0.000000e+00 : f32
    %6 = vector.broadcast %cst_5 : f32 to vector<96x128xf32>
    %7 = arith.maximumf %5, %6 : vector<96x128xf32>
    %8 = arith.truncf %7 : vector<96x128xf32> to vector<96x128xbf16>
    %c0_6 = arith.constant 0 : index
    %c0_7 = arith.constant 0 : index
    %9 = vector.load %arg4[%c0_6, %c0_7] : memref<96x128xbf16, #tpu.memory_space<vmem>>, vector<96x128xbf16>
    tpu.vector_store %arg4[%c0_6, %c0_7], %8 {strides = array<i32>} : memref<96x128xbf16, #tpu.memory_space<vmem>>, vector<96x128xbf16>,
    return
  }
  func.func @transform_0(%arg0: i32) -> (i32, i32) {
    %c0_i32 = arith.constant 0 : i32
    %c0_i32_0 = arith.constant 0 : i32
    return %arg0, %c0_i32 : i32, i32
  }
  func.func @transform_1(%arg0: i32) -> (i32, i32) {
    %c0_i32 = arith.constant 0 : i32
    %c0_i32_0 = arith.constant 0 : i32
    %c0_i32_1 = arith.constant 0 : i32
    return %c0_i32, %c0_i32_0 : i32, i32
  }
  func.func @transform_2(%arg0: i32) -> (i32, i32) {
    %c0_i32 = arith.constant 0 : i32
    %c0_i32_0 = arith.constant 0 : i32
    %c0_i32_1 = arith.constant 0 : i32
    return %c0_i32, %c0_i32_0 : i32, i32
  }
  func.func @transform_3(%arg0: i32) -> (i32, i32) {
    %c0_i32 = arith.constant 0 : i32
    %c0_i32_0 = arith.constant 0 : i32
    return %arg0, %c0_i32 : i32, i32
  }
}

module attributes {stable_mosaic.version = 11 : i64} {
  func.func @_matmul_bias_kernel(%arg0: i32, %arg1: memref<304x128xbf16, #tpu.memory_space<vmem>>, %arg2: memref<128x128xbf16, #tpu.memory_space<vmem>>, %arg3: memref<1x128xf32, #tpu.memory_space<vmem>>, %arg4: memref<304x128xf32, #tpu.memory_space<vmem>>) attributes {dimension_semantics = [#tpu.dimension_semantics<parallel>], iteration_bounds = array<i64: 2>, scalar_prefetch = 0 : i64, scratch_operands = 0 : i64, tpu.core_type = #tpu.core_type<tc>, window_params = [{transform_indices = @transform_0, window_bounds = array<i64: 304, 128>}, {pipeline_mode = #tpu.pipeline_mode<synchronous>, transform_indices = @transform_1, window_bounds = array<i64: 128, 128>}, {pipeline_mode = #tpu.pipeline_mode<synchronous>, transform_indices = @transform_2, window_bounds = array<i64: 1, 128>}, {transform_indices = @transform_3, window_bounds = array<i64: 304, 128>}]} {
    %c0 = arith.constant 0 : index
    %c0_0 = arith.constant 0 : index
    %0 = vector.load %arg1[%c0, %c0_0] : memref<304x128xbf16, #tpu.memory_space<vmem>>, vector<304x128xbf16>
    %c0_1 = arith.constant 0 : index
    %c0_2 = arith.constant 0 : index
    %1 = vector.load %arg2[%c0_1, %c0_2] : memref<128x128xbf16, #tpu.memory_space<vmem>>, vector<128x128xbf16>
    %cst = arith.constant dense<0.000000e+00> : vector<304x128xf32>
    %2 = tpu.matmul %0, %1, %cst {dimension_numbers = #tpu.dot_dimension_numbers<[1], [0], [0], [1], [0, 0, 1, 1], [], []>} : vector<304x128xbf16>, vector<128x128xbf16>, vector<304x128xf32> -> vector<304x128xf32>
    %c0_3 = arith.constant 0 : index
    %c0_4 = arith.constant 0 : index
    %3 = vector.load %arg3[%c0_3, %c0_4] : memref<1x128xf32, #tpu.memory_space<vmem>>, vector<1x128xf32>
    %4 = vector.broadcast %3 : vector<1x128xf32> to vector<304x128xf32>
    %5 = arith.addf %2, %4 : vector<304x128xf32>
    %c0_5 = arith.constant 0 : index
    %c0_6 = arith.constant 0 : index
    %6 = vector.load %arg4[%c0_5, %c0_6] : memref<304x128xf32, #tpu.memory_space<vmem>>, vector<304x128xf32>
    tpu.vector_store %arg4[%c0_5, %c0_6], %5 {strides = array<i32>} : memref<304x128xf32, #tpu.memory_space<vmem>>, vector<304x128xf32>,
    return
  }
  func.func @transform_0(%arg0: i32) -> (i32, i32) {
    %c0_i32 = arith.constant 0 : i32
    %c0_i32_0 = arith.constant 0 : i32
    return %arg0, %c0_i32 : i32, i32
  }
  func.func @transform_1(%arg0: i32) -> (i32, i32) {
    %c0_i32 = arith.constant 0 : i32
    %c0_i32_0 = arith.constant 0 : i32
    %c0_i32_1 = arith.constant 0 : i32
    return %c0_i32, %c0_i32_0 : i32, i32
  }
  func.func @transform_2(%arg0: i32) -> (i32, i32) {
    %c0_i32 = arith.constant 0 : i32
    %c0_i32_0 = arith.constant 0 : i32
    %c0_i32_1 = arith.constant 0 : i32
    return %c0_i32, %c0_i32_0 : i32, i32
  }
  func.func @transform_3(%arg0: i32) -> (i32, i32) {
    %c0_i32 = arith.constant 0 : i32
    %c0_i32_0 = arith.constant 0 : i32
    return %arg0, %c0_i32 : i32, i32
  }
}

</mosaic_0001>

<bundles_post_ra>
// kernel: decoder_forward_pallas.4
= control target key start
LH: loop header
LB: loop body
LE: loop exit
PB: predicated region body
PF: predicated region fallthrough
CT: control target
= control target key end

     0   :  { %8 = vsyncpa [#allocation3], 0  ;;  %s1298_s0 = inlined_call_operand.vmem [shape: bf16[162,128], index: 0, kind: input, shape index: {}]   ;;  %s1299_s1 = inlined_call_operand.hbm [shape: bf16[128,128], index: 1, kind: input, shape index: {}]   ;;  %s1300_s2 = inlined_call_operand.hbm [shape: f32[1,128], index: 2, kind: input, shape index: {}]   ;;  %s1301_s3 = inlined_call_operand.vmem [shape: bf16[162,128], index: 3, kind: output, shape index: {}]  }
   0x1   :  { %9 = vsyncpa [#allocation5], 0  ;;  %s1150_s12 = smov 0   ;;  %s1152_s13 = smov 0  }
   0x2   :  { %s1154_s14 = smov 0  }
   0x3 LB: > { %s1163_s15 = sadd.s32 4294967295, %s1092_s14   ;;  %s1165_s16 = sadd.s32 1, %s1092_s14   ;;  %s1092_s14 = sphi %s1154_s14, %s1310_s14   ;;  %s1088_s13 = sphi %s1152_s13, %s1309_s13   ;;  %s1084_s12 = sphi %s1150_s12, %s1308_s12  }
   0x4   : > { %s87_s17 = ssub.s32 %s1092_s14, %s1165_s16  ;;  %s90_s18 = sadd.s32 1, %s1088_s13 }
   0x5   : > { %p88_p0 = scmp.eq.s32.totalorder %s87_s17, 0  ;;  %p100_p1 = scmp.ne.s32.totalorder %s1088_s13, %s1084_s12 }
   0x6   : > { %p101_p2 = scmp.eq.s32.totalorder %s1163_s15, 1  ;;  %p700_p3 = scmp.ge.s32.totalorder %s1092_s14, 1 }
   0x7   : > { %s1173_s19 = scalar_select %p88_p0, %s1088_s13, %s90_s18  }
   0x8   : > { %p1175_p4 = por %p101_p2, %p100_p1  ;;  %p114_p5 = scmp.lt.s32.totalorder %s1092_s14, 3 }
   0x9   : > { %p866_p6 = scmp.eq.s32.totalorder %s1163_s15, 0  ;;  %s125_s24 = sshll.u32 %s1299_s1, 4  ;;  %s126_s24 = int_to_ptr.hbm [resolvable:$true] %s125_s24 }
   0xa   : > { %p1180_p7 = pnand %p700_p3, %p114_p5  ;;  %s1126_s25 = smov [#allocation2]  }
   0xb   : > { %s127_s26 = sshll.u32 %s1126_s25, 4  ;;  %s140_s29 = sshll.u32 %s1300_s2, 4  ;;  %s128_s26 = int_to_ptr.vmem [resolvable:$true] %s127_s26  ;;  %s141_s29 = int_to_ptr.hbm [resolvable:$true] %s140_s29 }
   0xc   : > { %p859_p8 = pneg %p1180_p7  ;;  %s1127_s30 = smov 64  }
   0xd   : > { %s1128_s4 = smov 4   ;;  %s1129_s5 = smov [#allocation4]  }
   0xe   : > { %p860_p9 = pnand %p866_p6, %p859_p8  ;;  %s142_s6 = sshll.u32 %s1129_s5, 4  ;;  %s143_s6 = int_to_ptr.vmem [resolvable:$true] %s142_s6 }
   0xf   : > { %172 = sbr.rel (%p1180_p7) target bundleno = 278 (0x116), region = 32 }
  0x10   : > { %862 = dma.hbm_to_vmem [thread:$0]  (!%p860_p9), %s126_s24, 1024, %s128_s26, [#allocation3], %s1127_s30, %s1127_s30, %s1128_s4  }
  0x11   : > { %865 = dma.hbm_to_vmem [thread:$0]  (!%p860_p9), %s141_s29, 16, %s143_s6, [#allocation5]  }
  0x14   : > { %1075 = dma.done.wait (%p866_p6), [#allocation3], 1024  }
  0x15   : > { %1077 = vsyncadd (%p866_p6), [#allocation3], 4294966272 }
  0x16   : > { %1079 = dma.done.wait (%p866_p6), [#allocation5], 16  }
  0x17   : > { %1081 = vsyncadd (%p866_p6), [#allocation5], 4294967280  ;;  %v789_v0 = vld [vmem:[#allocation2 + $0x38] sm:$0xff]  ;;  %v788_v1 = vld [vmem:[#allocation2 + $0x30] sm:$0xff]  ;;  %s1205_s7 = smul.u32 12, %s1163_s15  ;;  %s202_s17 = sand.u32 1, %s1084_s12  }
  0x18   : > { %827 = vmatpush.bf16.msra.mxu2 %v789_v0  ;;  %828 = vmatpush.bf16.msra.mxu3 %v789_v0  ;;  %v787_v2 = vld [vmem:[#allocation2 + $0x28] sm:$0xff]  ;;  %v786_v3 = vld [vmem:[#allocation2 + $0x20] sm:$0xff]  ;;  %v785_v4 = vld [vmem:[#allocation2 + $0x18] sm:$0xff]  ;;  %s850_s18 = smul.u32 48, %s202_s17 }
  0x19   : > { %340 = vmatpush.bf16.msra.mxu0 %v789_v0  ;;  %826 = vmatpush.bf16.msra.mxu1 %v789_v0  ;;  %p210_p10 = scmp.lt.s32.totalorder %s1205_s7, 20  ;;  %v784_v5 = vld [vmem:[#allocation2 + $0x10] sm:$0xff]  ;;  %v783_v6 = vld [vmem:[#allocation2 + $0x8] sm:$0xff]  ;;  %v782_v7 = vld [vmem:[#allocation2] sm:$0xff]  ;;  %s423_s12 = ssub.s32 (%p1175_p4), 21, %s1205_s7 }
  0x1a   : > { %v963_v16 = vld [vmem:[#allocation4] ss:$0 sm:$0xff]  ;;  %s1213_s21 = scalar_lea.vmem [#allocation6], %s850_s18   ;;  %s790_s22 = smul.u32 (%p1175_p4), 48, %s1163_s15 }
  0x1b   : > { %s211_s8 = scalar_select %p210_p10, %s1205_s7, 20 }
  0x1c   : > { %830 = vmatpush.bf16.msra.mxu2 %v788_v1  ;;  %831 = vmatpush.bf16.msra.mxu3 %v788_v1  ;;  %p424_p11 = scmp.lt.s32.totalorder (%p1175_p4), %s423_s12, 12  ;;  %s1228_s25 = scalar_lea.vmem (%p1175_p4), %s1301_s3, %s790_s22  }
  0x1d   : > { %341 = vmatpush.bf16.msra.mxu0 %v788_v1  ;;  %829 = vmatpush.bf16.msra.mxu1 %v788_v1  ;;  %s707_s9 = sshll.u32 %s211_s8, 2 }
  0x1e   : > { %s213_s14 = scalar_lea.vmem %s1298_s0, %s707_s9 }
  0x1f   : > { %v778_v8 = vld [vmem:[%s213_s14 + $0x10] sm:$0xff]  ;;  %v780_v9 = vld [vmem:[%s213_s14 + $0x20] sm:$0xff]  ;;  %v777_v11 = vld [vmem:[%s213_s14 + $0x8] sm:$0xff] }
  0x20   : > { %833 = vmatpush.bf16.msra.mxu2 %v787_v2  ;;  %834 = vmatpush.bf16.msra.mxu3 %v787_v2  ;;  %v776_v10 = vld [vmem:[%s213_s14] sm:$0xff]  ;;  %v779_v12 = vld [vmem:[%s213_s14 + $0x18] sm:$0xff]  ;;  %v781_v13 = vld [vmem:[%s213_s14 + $0x28] sm:$0xff] }
  0x21   : > { %342 = vmatpush.bf16.msra.mxu0 %v787_v2  ;;  %832 = vmatpush.bf16.msra.mxu1 %v787_v2 }
  0x24   : > { %836 = vmatpush.bf16.msra.mxu2 %v786_v3  ;;  %837 = vmatpush.bf16.msra.mxu3 %v786_v3 }
  0x25   : > { %343 = vmatpush.bf16.msra.mxu0 %v786_v3  ;;  %835 = vmatpush.bf16.msra.mxu1 %v786_v3 }
  0x28   : > { %839 = vmatpush.bf16.msra.mxu2 %v785_v4  ;;  %840 = vmatpush.bf16.msra.mxu3 %v785_v4 }
  0x29   : > { %344 = vmatpush.bf16.msra.mxu0 %v785_v4  ;;  %838 = vmatpush.bf16.msra.mxu1 %v785_v4 }
  0x2c   : > { %842 = vmatpush.bf16.msra.mxu2 %v784_v5  ;;  %843 = vmatpush.bf16.msra.mxu3 %v784_v5 }
  0x2d   : > { %345 = vmatpush.bf16.msra.mxu0 %v784_v5  ;;  %841 = vmatpush.bf16.msra.mxu1 %v784_v5 }
  0x30   : > { %845 = vmatpush.bf16.msra.mxu2 %v783_v6  ;;  %846 = vmatpush.bf16.msra.mxu3 %v783_v6 }
  0x31   : > { %346 = vmatpush.bf16.msra.mxu0 %v783_v6  ;;  %844 = vmatpush.bf16.msra.mxu1 %v783_v6 }
  0x34   : > { %848 = vmatpush.bf16.msra.mxu2 %v782_v7  ;;  %849 = vmatpush.bf16.msra.mxu3 %v782_v7 }
  0x35   : > { %347 = vmatpush.bf16.msra.mxu0 %v782_v7  ;;  %847 = vmatpush.bf16.msra.mxu1 %v782_v7 }
  0x37   : > { %358 = vmatmul.bf16.vlgmr.msra.gmra.mxu2 %v778_v8  ;;  %368 = vmatmul.bf16.vlgmr.msra.gmra.mxu3 %v780_v9 }
  0x38   : > { %348 = vmatmul.bf16.vlgmr.msra.gmra.mxu0 %v776_v10  ;;  %353 = vmatmul.bf16.vlgmr.msra.gmra.mxu1 %v777_v11 }
  0x47   : > { %363 = vmatmul.bf16.gmra.mxu2 %v779_v12  ;;  %373 = vmatmul.bf16.gmra.mxu3 %v781_v13 }
  0xb5   : > { %v349_v14 = vpop.f32.mrf.mxu0  ;;  %v354_v15 = vpop.f32.mrf.mxu1 }
  0xb6   : > { %v350_v19 = vadd.f32 %v963_v16, %v349_v14  ;;  %v355_v20 = vadd.f32 %v963_v16, %v354_v15 }
  0xb8   : > { %v379_v23 = vmax.f32 %v350_v19, 0.0  ;;  %v381_v24 = vmax.f32 %v355_v20, 0.0 }
  0xba   : > { %v359_v17 = vpop.f32.mrf.mxu2  ;;  %v369_v18 = vpop.f32.mrf.mxu3 }
  0xbb   : > { %v360_v29 = vadd.f32 %v963_v16, %v359_v17  ;;  %v370_v30 = vadd.f32 %v963_v16, %v369_v18 }
  0xbd   : > { %v351_v21 = vpop.f32.mrf.mxu0  ;;  %v356_v22 = vpop.f32.mrf.mxu1  ;;  %v383_v37 = vmax.f32 %v360_v29, 0.0  ;;  %v387_v38 = vmax.f32 %v370_v30, 0.0 }
  0xbe   : > { %v352_v25 = vadd.f32 %v963_v16, %v351_v21  ;;  %v357_v26 = vadd.f32 %v963_v16, %v356_v22 }
  0xc0   : > { %v380_v27 = vmax.f32 %v352_v25, 0.0  ;;  %v382_v28 = vmax.f32 %v357_v26, 0.0 }
  0xc2   : > { %v361_v31 = vpop.f32.mrf.mxu2  ;;  %v371_v32 = vpop.f32.mrf.mxu3  ;;  %v794_v33 = vpack.c.bf16 %v380_v27, %v379_v23  ;;  %v799_v34 = vpack.c.bf16 %v382_v28, %v381_v24 }
  0xc3   : > { %v362_v35 = vadd.f32 %v963_v16, %v361_v31  ;;  %v372_v36 = vadd.f32 %v963_v16, %v371_v32 }
  0xc4   : > { %795 = vst [vmem:[%s1213_s21] sm:$0xff] %v794_v33  }
  0xc5   : > { %v384_v39 = vmax.f32 %v362_v35, 0.0  ;;  %v388_v40 = vmax.f32 %v372_v36, 0.0  ;;  %821 = vst [vmem:[%s1213_s21 + $0x8] sm:$0xff] %v799_v34  }
  0xc7   : > { %v804_v41 = vpack.c.bf16 %v384_v39, %v383_v37  ;;  %v814_v42 = vpack.c.bf16 %v388_v40, %v387_v38 }
  0xc9   : > { %822 = vst [vmem:[%s1213_s21 + $0x10] sm:$0xff] %v804_v41  }
  0xca   : > { %824 = vst [vmem:[%s1213_s21 + $0x20] sm:$0xff] %v814_v42   ;;  %v364_v43 = vpop.f32.mrf.mxu2  ;;  %v374_v44 = vpop.f32.mrf.mxu3 }
  0xcb   : > { %v365_v45 = vadd.f32 %v963_v16, %v364_v43  ;;  %v375_v46 = vadd.f32 %v963_v16, %v374_v44 }
  0xcd   : > { %v385_v51 = vmax.f32 %v365_v45, 0.0  ;;  %v389_v52 = vmax.f32 %v375_v46, 0.0 }
  0xd2   : > { %v366_v47 = vpop.f32.mrf.mxu2  ;;  %v376_v48 = vpop.f32.mrf.mxu3 }
  0xd3   : > { %v367_v49 = vadd.f32 %v963_v16, %v366_v47  ;;  %v377_v50 = vadd.f32 %v963_v16, %v376_v48 }
  0xd5   : > { %v386_v53 = vmax.f32 %v367_v49, 0.0  ;;  %v390_v54 = vmax.f32 %v377_v50, 0.0 }
  0xd6   : > { %421 = sbr.rel (!%p1175_p4) target bundleno = 278 (0x116), region = 44 }
  0xd7   : > { %v809_v55 = vpack.c.bf16 %v386_v53, %v385_v51  ;;  %v819_v56 = vpack.c.bf16 %v390_v54, %v389_v52 }
  0xd9   : > { %823 = vst [vmem:[%s1213_s21 + $0x18] sm:$0xff] %v809_v55  }
  0xda   : > { %825 = vst [vmem:[%s1213_s21 + $0x28] sm:$0xff] %v819_v56  }
  0xdb   : > { %s1312_s12 = smov (!%p424_p11, %s423_s12), 12 }
  0xdc   : > { %s764_s26 = sshll.u32 %s1312_s12, 2 }
  0xdd   : > { %p767_p12 = scmp.eq.s32.totalorder %s764_s26, 0 }
  0xde   : > { %964 = sdivrem.u32 (!%p767_p12), %s1312_s12, 12 }
  0xdf   : > { %432 = sbr.rel (%p767_p12) target bundleno = 278 (0x116), region = 48 }
  0xe7   : > { %s1234_s20 = spop.drf %964 }
  0xe8   : > { %s966_s27 = spop.drf %964  ;;  %p768_p13 = scmp.le.s32.totalorder %s1234_s20, 0 }
  0xe9   : > { %s1304_s15 = smov (!%p768_p13), %s1228_s25  ;;  %s1305_s28 = smov (!%p768_p13), %s1213_s21 }
  0xea   : > { %637 = sbr.rel (%p768_p13) target bundleno = 252 (0xfc), region = 121  ;;  %s1243_s29 = smov (!%p768_p13), 0  }
  0xeb   : > { %s1245_s30 = smov (!%p768_p13), 0  }
  0xef LB: >> { %v450_v57 = vld [vmem:[%s1100_s28] sm:$0xf]  ;;  %v452_v58 = vld [vmem:[%s1100_s28 + $0x4] sm:$0xf]  ;;  %v454_v59 = vld [vmem:[%s1100_s28 + $0x8] sm:$0xf]  ;;  %s1108_s30 = sphi %s1245_s30, %s444_s30   ;;  %s1104_s29 = sphi %s1243_s29, %s1307_s29   ;;  %s1100_s28 = sphi %s1305_s28, %s479_s28   ;;  %s1096_s15 = sphi %s1304_s15, %s1306_s15  }
  0xf0   : >> { %451 = vst [vmem:[%s1096_s15] sm:$0xf] %v450_v57  ;;  %v456_v60 = vld [vmem:[%s1100_s28 + $0xc] sm:$0xf]  ;;  %s474_s4 = sadd.s32 1, %s1104_s29  ;;  %v458_v61 = vld [vmem:[%s1100_s28 + $0x10] sm:$0xf] }
  0xf1   : >> { %453 = vst [vmem:[%s1096_s15 + $0x4] sm:$0xf] %v452_v58  ;;  %p475_p0 = scmp.ge.s32.totalorder %s474_s4, %s1234_s20  ;;  %v460_v62 = vld [vmem:[%s1100_s28 + $0x14] sm:$0xf]  ;;  %v462_v63 = vld [vmem:[%s1100_s28 + $0x18] sm:$0xf] }
  0xf2   : >> { %455 = vst [vmem:[%s1096_s15 + $0x8] sm:$0xf] %v454_v59  ;;  %v464_v0 = vld [vmem:[%s1100_s28 + $0x1c] sm:$0xf]  ;;  %v466_v1 = vld [vmem:[%s1100_s28 + $0x20] sm:$0xf] }
  0xf3   : >> { %457 = vst [vmem:[%s1096_s15 + $0xc] sm:$0xf] %v456_v60  ;;  %s1314_s4 = smov (%p475_p0, %s474_s4), 0  ;;  %v468_v2 = vld [vmem:[%s1100_s28 + $0x24] sm:$0xf]  ;;  %s444_s30 = sadd.s32 1, %s1108_s30  }
  0xf4   : >> { %459 = vst [vmem:[%s1096_s15 + $0x10] sm:$0xf] %v458_v61  ;;  %s477_s5 = smul.u32 48, %s1314_s4  ;;  %v470_v3 = vld [vmem:[%s1100_s28 + $0x28] sm:$0xf]  ;;  %p443_p1 = scmp.ge.s32.totalorder %s444_s30, %s1234_s20 }
  0xf5   : >> { %461 = vst [vmem:[%s1096_s15 + $0x14] sm:$0xf] %v460_v62  ;;  %v472_v4 = vld [vmem:[%s1100_s28 + $0x2c] sm:$0xf]  ;;  %s1307_s29 = smov %s1314_s4 }
  0xf6   : >> { %463 = vst [vmem:[%s1096_s15 + $0x18] sm:$0xf] %v462_v63  ;;  %s479_s28 = scalar_lea.vmem %s1213_s21, %s477_s5 [#allocation6]   ;;  %s480_s6 = scalar_lea.vmem %s1228_s25, %s477_s5  }
  0xf7   : >> { %465 = vst [vmem:[%s1096_s15 + $0x1c] sm:$0xf] %v464_v0  ;;  %446 = sbr.rel (!%p443_p1) target bundleno = 239 (0xef), region = 127 }
  0xf8   : >> { %467 = vst [vmem:[%s1096_s15 + $0x20] sm:$0xf] %v466_v1 }
  0xf9   : >> { %469 = vst [vmem:[%s1096_s15 + $0x24] sm:$0xf] %v468_v2 }
  0xfa   : >> { %471 = vst [vmem:[%s1096_s15 + $0x28] sm:$0xf] %v470_v3 }
  0xfb   : >> { %473 = vst [vmem:[%s1096_s15 + $0x2c] sm:$0xf] %v472_v4  ;;  %s1306_s15 = smov %s480_s6 }
  0xfc PF: > { %967 = sdivrem.u32 %s1312_s12, 12 }
  0xfd   : > { %s769_s7 = smul.u32 48, %s1234_s20 }
  0xff   : > { %s1283_s8 = scalar_lea.vmem %s1213_s21, %s769_s7 [#allocation6]   ;;  %s487_s9 = scalar_lea.vmem %s1228_s25, %s769_s7  }
 0x105   : > { %s968_s10 = spop.drf %967 }
 0x106   : > { %s969_s11 = spop.drf %967 }
 0x107   : > { %p771_p2 = scmp.le.s32.totalorder %s969_s11, 0 }
 0x108   : > { %s1110_s14 = smov (!%p771_p2), %s487_s9   ;;  %s1114_s17 = smov (!%p771_p2), %s1283_s8  }
 0x109   : > { %651 = sbr.rel (%p771_p2) target bundleno = 278 (0x116), region = 132  ;;  %s1118_s18 = smov (!%p771_p2), 0  }
 0x10a   : > { %s1122_s22 = smov (!%p771_p2), 0  }
 0x10e LB: >> { %v497_v5 = vld [vmem:[%s1116_s17] sm:$0xf]  ;;  %s499_s21 = sadd.s32 1, %s1120_s18  ;;  %s491_s22 = sadd.s32 1, %s1124_s22   ;;  %s1124_s22 = sphi %s1122_s22, %s491_s22   ;;  %s1120_s18 = sphi %s1118_s18, %s1119_s18   ;;  %s1116_s17 = sphi %s1114_s17, %s504_s17   ;;  %s1112_s14 = sphi %s1110_s14, %s505_s14  }
 0x10f   : >> { %498 = vst [vmem:[%s1112_s14] sm:$0xf] %v497_v5  ;;  %p500_p3 = scmp.ge.s32.totalorder %s499_s21, %s969_s11  ;;  %p490_p4 = scmp.ge.s32.totalorder %s491_s22, %s969_s11 }
 0x111   : >> { %s1316_s21 = smov (%p500_p3, %s499_s21), 0  ;;  %493 = sbr.rel (!%p490_p4) target bundleno = 270 (0x10e), region = 138 }
 0x112   : >> { %s772_s12 = sshll.u32 %s1316_s21, 2  ;;  %s1119_s18 = smov %s1316_s21  }
 0x113   : >> { %s504_s17 = scalar_lea.vmem %s1283_s8, %s772_s12 [#allocation6]   ;;  %s505_s14 = scalar_lea.vmem %s487_s9, %s772_s12  }
 0x116 PF: > { %p12_p5 = scmp.ge.s32.totalorder %s1165_s16, 4   ;;  %s1308_s12 = smov %s1088_s13 }
 0x117   : > { %s1309_s13 = smov %s1173_s19  ;;  %s1310_s14 = smov %s1165_s16 }
 0x118   :  { %14 = sbr.rel (!%p12_p5) target bundleno = 3 (0x3), region = 149 }
 0x11d   :  { %590 = vsyncpa [#allocation3], 1 }
 0x11e   :  { %592 = vsyncpa [#allocation3 + $0x1], 1 }
 0x11f   :  { %593 = vsyncpa [#allocation5], 1 }

// kernel: decoder_forward_pallas.3
= control target key start
LH: loop header
LB: loop body
LE: loop exit
PB: predicated region body
PF: predicated region fallthrough
CT: control target
= control target key end

     0   :  { %10 = vsyncpa [#allocation4], 0  ;;  %s4119_s0 = inlined_call_operand.vmem [shape: f32[2,8,8,32], index: 0, kind: input, shape index: {}]   ;;  %s4120_s1 = inlined_call_operand.hbm [shape: bf16[9,32,32], index: 1, kind: input, shape index: {}]   ;;  %s4121_s2 = inlined_call_operand.hbm [shape: f32[1,32], index: 2, kind: input, shape index: {}]   ;;  %s4122_s3 = inlined_call_operand.hbm [shape: bf16[2,9,32,128], index: 3, kind: input, shape index: {}]   ;;  %s4123_s4 = inlined_call_operand.vmem [shape: bf16[2,128,32], index: 4, kind: input, shape index: {}]   ;;  %s4124_s5 = inlined_call_operand.vmem [shape: bf16[2,8,8,32], index: 5, kind: output, shape index: {}]  }
   0x1   :  { %11 = vsyncpa [#allocation6], 0  ;;  %s3436_s18 = smov 0  }
   0x2 LB: > { %s184_s21 = sshll.u32 %s4121_s2, 4  ;;  %s3445_s22 = sadd.s32 4294967295, %s3398_s18   ;;  %s3398_s18 = sphi %s3436_s18, %s17_s18   ;;  %s185_s21 = int_to_ptr.hbm [resolvable:$true] %s184_s21 }
   0x3   : > { %p2754_p0 = scmp.ge.s32.totalorder %s3398_s18, 1  ;;  %p158_p1 = scmp.lt.s32.totalorder %s3398_s18, 3 }
   0x4   : > { %p3273_p2 = scmp.eq.s32.totalorder %s3445_s22, 0  ;;  %s3400_s24 = smov [#allocation5]  }
   0x5   : > { %p3450_p3 = pnand %p2754_p0, %p158_p1  ;;  %s186_s25 = sshll.u32 %s3400_s24, 4  ;;  %s187_s25 = int_to_ptr.vmem [resolvable:$true] %s186_s25 }
   0x6   : > { %s169_s28 = sshll.u32 %s4120_s1, 4  ;;  %s3401_s29 = smov [#allocation3]   ;;  %s170_s28 = int_to_ptr.hbm [resolvable:$true] %s169_s28 }
   0x7   : > { %p3263_p4 = pneg %p3450_p3  ;;  %s171_s30 = sshll.u32 %s3401_s29, 4  ;;  %s172_s30 = int_to_ptr.vmem [resolvable:$true] %s171_s30 }
   0x8   : > { %s195_s8 = sshll.u32 %s4122_s3, 4  ;;  %s3402_s9 = smov 64   ;;  %s196_s8 = int_to_ptr.hbm [resolvable:$true] %s195_s8 }
   0x9   : > { %p3264_p5 = pnand %p3273_p2, %p3263_p4  ;;  %s3403_s10 = smov 4  }
   0xa   : > { %s3404_s11 = smov [#allocation7]   ;;  %224 = sbr.rel (%p3450_p3) target bundleno = 1168 (0x490), region = 40 }
   0xb   : > { %3269 = dma.hbm_to_vmem [thread:$0]  (!%p3264_p5), %s185_s21, 16, %s187_s25, [#allocation6]  }
   0xc   : > { %3266 = dma.hbm_to_vmem [thread:$0]  (!%p3264_p5), %s170_s28, 2304, %s172_s30, [#allocation4], %s3402_s9, %s3402_s9, %s3403_s10  }
   0xd   : > { %s197_s12 = sshll.u32 %s3404_s11, 4  ;;  %s198_s12 = int_to_ptr.vmem [resolvable:$true] %s197_s12 }
   0xe   : > { %3272 = dma.hbm_to_vmem [thread:$0]  (!%p3264_p5), %s196_s8, 4608, %s198_s12, [#allocation6], %s3402_s9, %s3402_s9, %s3403_s10  }
   0xf   : > { %3389 = dma.done.wait (%p3273_p2), [#allocation4], 2304  }
  0x10   : > { %3391 = vsyncadd (%p3273_p2), [#allocation4], 4294964992 }
  0x11   : > { %3393 = dma.done.wait (%p3273_p2), [#allocation6], 4624  }
  0x12   : > { %3395 = vsyncadd (%p3273_p2), [#allocation6], 4294962672  ;;  %p263_p6 = scmp.lt.s32.totalorder %s3445_s22, 1  ;;  %vm274_vm0 = vcmask 261120   ;;  %vm276_vm1 = vcmask 254976   ;;  %v3405_v0 = vmov 0.0  }
  0x13   : > { %275 = vst.msk [vmem:[#allocation2] sm:$0xff] %vm274_vm0, %v3405_v0  ;;  %v3178_v1 = vld [vmem:[#allocation3 + $0x18] sm:$0xff]  ;;  %v3176_v2 = vld [vmem:[#allocation3 + $0x8] sm:$0xff]  ;;  %v3177_v4 = vld [vmem:[#allocation3 + $0x10] sm:$0xff]  ;;  %vm2657_vm2 = vcmask 257024  }
  0x14   : > { %s4127_s22 = smov (!%p263_p6, %s3445_s22), 1  ;;  %277 = vst.msk [vmem:[#allocation2 + $0x8] sm:$0x3] %vm276_vm1, %v3405_v0  ;;  %376 = vmatpush.bf16.msra.mxu0 %v3178_v1  ;;  %3245 = vmatpush.bf16.msra.mxu2 %v3178_v1  ;;  %v3175_v5 = vld [vmem:[#allocation3] sm:$0xff]  ;;  %v3184_v6 = vld [vmem:[#allocation3 + $0x48] sm:$0xff]  ;;  %v3182_v8 = vld [vmem:[#allocation3 + $0x38] sm:$0xff] }
  0x15   : > { %278 = vst.msk [vmem:[#allocation2 + $0x10] sm:$0xff] %vm274_vm0, %v3405_v0  ;;  %s3173_s13 = sshll.u32 %s4127_s22, 6  ;;  %429 = vmatpush.bf16.msra.mxu1 %v3176_v2  ;;  %3247 = vmatpush.bf16.msra.mxu3 %v3176_v2  ;;  %v3180_v7 = vld [vmem:[#allocation3 + $0x28] sm:$0xff]  ;;  %v3179_v11 = vld [vmem:[#allocation3 + $0x20] sm:$0xff]  ;;  %v3181_v14 = vld [vmem:[#allocation3 + $0x30] sm:$0xff]  ;;  %s3174_s28 = sshll.u32 %s4127_s22, 5 }
  0x16   : > { %279 = vst.msk [vmem:[#allocation2 + $0x18] sm:$0x3] %vm276_vm1, %v3405_v0  ;;  %s3486_s16 = scalar_lea.vmem %s4119_s0, %s3173_s13  ;;  %v3183_v17 = vld [vmem:[#allocation3 + $0x40] sm:$0xff]  ;;  %v3188_v36 = vld [vmem:[#allocation3 + $0x68] sm:$0xff]  ;;  %v3190_v37 = vld [vmem:[#allocation3 + $0x78] sm:$0xff]  ;;  %s4091_s6 = scalar_lea.vmem %s4124_s5, %s3174_s28 }
  0x17   : > { %280 = vst.msk [vmem:[#allocation2 + $0x20] sm:$0xff] %vm274_vm0, %v3405_v0  ;;  %v296_v3 = vld [vmem:[%s3486_s16] sm:$0xff]  ;;  %v301_v18 = vld [vmem:[%s3486_s16 + $0x28] sm:$0xff]  ;;  %v302_v19 = vld [vmem:[%s3486_s16 + $0x30] sm:$0xff] }
  0x18   : > { %281 = vst.msk [vmem:[#allocation2 + $0x28] sm:$0x3] %vm276_vm1, %v3405_v0  ;;  %377 = vmatpush.bf16.msra.mxu0 %v3177_v4  ;;  %3246 = vmatpush.bf16.msra.mxu2 %v3177_v4  ;;  %v297_v20 = vld [vmem:[%s3486_s16 + $0x8] sm:$0xff]  ;;  %v298_v21 = vld [vmem:[%s3486_s16 + $0x10] sm:$0xff]  ;;  %v299_v22 = vld [vmem:[%s3486_s16 + $0x18] sm:$0xff] }
  0x19   : > { %282 = vst.msk [vmem:[#allocation2 + $0x30] sm:$0xff] %vm274_vm0, %v3405_v0  ;;  %430 = vmatpush.bf16.msra.mxu1 %v3175_v5  ;;  %3248 = vmatpush.bf16.msra.mxu3 %v3175_v5  ;;  %v300_v23 = vld [vmem:[%s3486_s16 + $0x20] sm:$0xff]  ;;  %v3186_v38 = vld [vmem:[#allocation3 + $0x58] sm:$0xff]  ;;  %v3185_v39 = vld [vmem:[#allocation3 + $0x50] sm:$0xff] }
  0x1a   : > { %283 = vst.msk [vmem:[#allocation2 + $0x38] sm:$0x3] %vm276_vm1, %v3405_v0  ;;  %v3501_v10 = vld [vmem:[#allocation2] sm:$0xff]  ;;  %v3192_v50 = vld [vmem:[#allocation3 + $0x88] sm:$0xff]  ;;  %v303_v51 = vld [vmem:[%s3486_s16 + $0x38] sm:$0xff] }
  0x1b   : > { %305 = vst.msk [vmem:[#allocation2 + $0x11] sm:$0xff] %vm274_vm0, %v296_v3  ;;  %v3498_v9 = vld [vmem:[#allocation2 + $0x1] sm:$0xff]  ;;  %v3189_v59 = vld [vmem:[#allocation3 + $0x70] sm:$0xff] }
  0x1c   : > { %284 = vst.msk [vmem:[#allocation2 + $0x40] sm:$0xff] %vm274_vm0, %v3405_v0  ;;  %655 = vmatpush.bf16.msrb.mxu0 %v3184_v6  ;;  %499 = vmatpush.bf16.msrb.mxu2 %v3180_v7  ;;  %v3560_v40 = vld [vmem:[#allocation2 + $0x2] sm:$0xff] }
  0x1d   : > { %285 = vst.msk [vmem:[#allocation2 + $0x48] sm:$0x3] %vm276_vm1, %v3405_v0  ;;  %577 = vmatpush.bf16.msrb.mxu3 %v3182_v8  ;;  %733 = vmatpush.bf16.msrb.mxu1 %v3186_v38  ;;  %v3187_v58 = vld [vmem:[#allocation3 + $0x60] sm:$0xff] }
  0x1e   : > { %286 = vst.msk [vmem:[#allocation2 + $0x50] sm:$0xff] %vm274_vm0, %v3405_v0  ;;  %v3191_v2 = vld [vmem:[#allocation3 + $0x80] sm:$0xff] }
  0x1f   : > { %287 = vst.msk [vmem:[#allocation2 + $0x58] sm:$0x3] %vm276_vm1, %v3405_v0 }
  0x20   : > { %288 = vst.msk [vmem:[#allocation2 + $0x60] sm:$0xff] %vm274_vm0, %v3405_v0  ;;  %500 = vmatpush.bf16.msrb.mxu2 %v3179_v11  ;;  %656 = vmatpush.bf16.msrb.mxu0 %v3183_v17 }
  0x21   : > { %289 = vst.msk [vmem:[#allocation2 + $0x68] sm:$0x3] %vm276_vm1, %v3405_v0  ;;  %578 = vmatpush.bf16.msrb.mxu3 %v3181_v14  ;;  %734 = vmatpush.bf16.msrb.mxu1 %v3185_v39  ;;  %v3196_v39 = vld [vmem:[#allocation7 + $0x18] sm:$0xff] }
  0x22   : > { %v3504_v12 = vld [vmem:[#allocation2 + $0x11] sm:$0xff]  ;;  %290 = vst.msk [vmem:[#allocation2 + $0x70] sm:$0xff] %vm274_vm0, %v3405_v0 }
  0x23   : > { %v3507_v13 = vld [vmem:[#allocation2 + $0x10] sm:$0xff]  ;;  %v337_v15 = vpack.c.bf16 %v3504_v12, %v3498_v9  ;;  %291 = vst.msk [vmem:[#allocation2 + $0x78] sm:$0x3] %vm276_vm1, %v3405_v0 }
  0x24   : > { %v321_v16 = vpack.c.bf16 %v3507_v13, %v3501_v10  ;;  %292 = vst.msk [vmem:[#allocation2 + $0x80] sm:$0xff] %vm274_vm0, %v3405_v0  ;;  %v453_v41 = vld [vmem:[#allocation2 + $0x12] sm:$0xff] }
  0x25   : > { %2775 = vmatmul.msk.bf16.vlgmr.msra.gmra.mxu0 %vm274_vm0, %v337_v15  ;;  %293 = vst.msk [vmem:[#allocation2 + $0x88] sm:$0x3] %vm276_vm1, %v3405_v0  ;;  %v460_v46 = vpack.c.bf16 %v453_v41, %v3560_v40 }
  0x26   : > { %2787 = vmatmul.msk.bf16.vlgmr.msra.gmra.mxu1 %vm274_vm0, %v321_v16  ;;  %294 = vst.msk [vmem:[#allocation2 + $0x90] sm:$0xff] %vm274_vm0, %v3405_v0  ;;  %968 = vmatpush.bf16.msra.mxu0 %v3192_v50 }
  0x27   : > { %295 = vst.msk [vmem:[#allocation2 + $0x98] sm:$0x3] %vm276_vm1, %v3405_v0  ;;  %1090 = vmatpush.bf16.msra.mxu1 %v3196_v39 }
  0x28   : > { %310 = vst.msk [vmem:[#allocation2 + $0x61] sm:$0xff] %vm274_vm0, %v301_v18 }
  0x29   : > { %311 = vst.msk [vmem:[#allocation2 + $0x71] sm:$0xff] %vm274_vm0, %v302_v19 }
  0x2a   : > { %306 = vst.msk [vmem:[#allocation2 + $0x21] sm:$0xff] %vm274_vm0, %v297_v20  ;;  %969 = vmatpush.bf16.msra.mxu0 %v3191_v2 }
  0x2b   : > { %307 = vst.msk [vmem:[#allocation2 + $0x31] sm:$0xff] %vm274_vm0, %v298_v21 }
  0x2c   : > { %308 = vst.msk [vmem:[#allocation2 + $0x41] sm:$0xff] %vm274_vm0, %v299_v22 }
  0x2d   : > { %309 = vst.msk [vmem:[#allocation2 + $0x51] sm:$0xff] %vm274_vm0, %v300_v23  ;;  %v3601_v18 = vld [vmem:[#allocation2 + $0x90] sm:$0xff] }
  0x2e   : > { %312 = vst.msk [vmem:[#allocation2 + $0x81] sm:$0xff] %vm274_vm0, %v303_v51  ;;  %v3603_v19 = vld [vmem:[#allocation2 + $0x91] sm:$0xff] }
  0x2f   : > { %v3532_v24 = vld [vmem:[#allocation2 + $0x61] sm:$0xff] }
  0x30   : > { %v3534_v25 = vld [vmem:[#allocation2 + $0x60] sm:$0xff]  ;;  %v3536_v26 = vld [vmem:[#allocation2 + $0x71] sm:$0xff] }
  0x31   : > { %v3538_v27 = vld [vmem:[#allocation2 + $0x70] sm:$0xff]  ;;  %v3542_v28 = vpack.c.bf16 %v3536_v26, %v3532_v24  ;;  %v331_v30 = vld [vmem:[#allocation2 + $0x21] sm:$0xff] }
  0x32   : > { %v3546_v29 = vpack.c.bf16 %v3538_v27, %v3534_v25  ;;  %v315_v31 = vld [vmem:[#allocation2 + $0x20] sm:$0xff]  ;;  %v332_v32 = vld [vmem:[#allocation2 + $0x31] sm:$0xff]  ;;  %v616_v56 = vpack.c.bf16 %v331_v30, %v3504_v12 }
  0x33   : > { %v316_v33 = vld [vmem:[#allocation2 + $0x30] sm:$0xff]  ;;  %2778 = vmatmul.msk.bf16.vlgmr.msra.gmra.mxu2 %vm274_vm0, %v3542_v28  ;;  %v3552_v34 = vpack.c.bf16 %v332_v32, %v331_v30  ;;  %v333_v42 = vld [vmem:[#allocation2 + $0x41] sm:$0xff]  ;;  %v538_v47 = vpack.c.bf16 %v315_v31, %v3507_v13 }
  0x34   : > { %2790 = vmatmul.msk.bf16.vlgmr.msra.gmra.mxu3 %vm274_vm0, %v3546_v29  ;;  %v3554_v35 = vpack.c.bf16 %v316_v33, %v315_v31  ;;  %812 = vmatpush.bf16.msra.mxu2 %v3188_v36  ;;  %v334_v43 = vld [vmem:[#allocation2 + $0x51] sm:$0xff]  ;;  %v317_v44 = vld [vmem:[#allocation2 + $0x40] sm:$0xff]  ;;  %v617_v0 = vpack.c.bf16 %v333_v42, %v332_v32 }
  0x35   : > { %2776 = vmatmul.msk.bf16.gmra.mxu0 %vm274_vm0, %v3552_v34  ;;  %890 = vmatpush.bf16.msra.mxu3 %v3190_v37  ;;  %v318_v45 = vld [vmem:[#allocation2 + $0x50] sm:$0xff]  ;;  %v339_v48 = vpack.c.bf16 %v334_v43, %v333_v42  ;;  %v454_v52 = vld [vmem:[#allocation2 + $0x22] sm:$0xff]  ;;  %v539_v55 = vpack.c.bf16 %v317_v44, %v316_v33  ;;  %v618_v8 = vpack.c.bf16 %v3532_v24, %v334_v43 }
  0x36   : > { %2788 = vmatmul.msk.bf16.gmra.mxu1 %vm274_vm0, %v3554_v35  ;;  %v323_v49 = vpack.c.bf16 %v318_v45, %v317_v44  ;;  %v455_v53 = vld [vmem:[#allocation2 + $0x32] sm:$0xff]  ;;  %v694_v57 = vpack.c.bf16 %v454_v52, %v453_v41  ;;  %v456_v60 = vld [vmem:[#allocation2 + $0x42] sm:$0xff]  ;;  %v540_v63 = vpack.c.bf16 %v3534_v25, %v318_v45 }
  0x37   : > { %v461_v54 = vpack.c.bf16 %v455_v53, %v454_v52  ;;  %v457_v61 = vld [vmem:[#allocation2 + $0x52] sm:$0xff]  ;;  %v695_v1 = vpack.c.bf16 %v456_v60, %v455_v53  ;;  %v458_v3 = vld [vmem:[#allocation2 + $0x62] sm:$0xff] }
  0x38   : > { %813 = vmatpush.bf16.msra.mxu2 %v3187_v58  ;;  %v462_v62 = vpack.c.bf16 %v457_v61, %v456_v60  ;;  %v459_v4 = vld [vmem:[#allocation2 + $0x72] sm:$0xff]  ;;  %v537_v5 = vld [vmem:[#allocation2 + $0x80] sm:$0xff]  ;;  %v696_v11 = vpack.c.bf16 %v458_v3, %v457_v61 }
  0x39   : > { %891 = vmatpush.bf16.msra.mxu3 %v3189_v59  ;;  %v463_v6 = vpack.c.bf16 %v459_v4, %v458_v3  ;;  %v541_v7 = vpack.c.bf16 %v537_v5, %v3538_v27  ;;  %v615_v12 = vld [vmem:[#allocation2 + $0x81] sm:$0xff]  ;;  %v776_v20 = vpack.c.bf16 %v3601_v18, %v537_v5 }
  0x3a   : > { %v693_v13 = vld [vmem:[#allocation2 + $0x82] sm:$0xff]  ;;  %v619_v14 = vpack.c.bf16 %v615_v12, %v3536_v26  ;;  %v854_v21 = vpack.c.bf16 %v3603_v19, %v615_v12  ;;  %v3194_v3 = vld [vmem:[#allocation7 + $0x8] sm:$0xff] }
  0x3b   : > { %v697_v15 = vpack.c.bf16 %v693_v13, %v459_v4 }
  0x43   : > { %2799 = vmatmul.msk.bf16.vlgmr.msrb.gmra.mxu2 %vm274_vm0, %v460_v46 }
  0x44   : > { %2811 = vmatmul.msk.bf16.vlgmr.msrb.gmra.mxu3 %vm274_vm0, %v538_v47  ;;  %1143 = vmatpush.bf16.msrb.mxu2 %v3194_v3 }
  0x45   : > { %2777 = vmatmul.msk.bf16.gmra.mxu0 %vm274_vm0, %v339_v48 }
  0x46   : > { %2789 = vmatmul.msk.bf16.gmra.mxu1 %vm274_vm0, %v323_v49 }
  0x53   : > { %2800 = vmatmul.msk.bf16.gmra.mxu2 %vm274_vm0, %v461_v54 }
  0x54   : > { %2812 = vmatmul.msk.bf16.gmra.mxu3 %vm274_vm0, %v539_v55 }
  0x55   : > { %2823 = vmatmul.msk.bf16.vlgmr.msrb.gmra.mxu0 %vm274_vm0, %v616_v56 }
  0x56   : > { %2835 = vmatmul.msk.bf16.vlgmr.msrb.gmra.mxu1 %vm274_vm0, %v694_v57  ;;  %v3195_v57 = vld [vmem:[#allocation7 + $0x10] sm:$0xff] }
  0x57   : > { %1091 = vmatpush.bf16.msra.mxu1 %v3195_v57  ;;  %v3202_v57 = vld [vmem:[#allocation7 + $0x48] sm:$0xff] }
  0x5b   : > { %1369 = vmatpush.bf16.msrb.mxu1 %v3202_v57 }
  0x63   : > { %2801 = vmatmul.msk.bf16.gmra.mxu2 %vm274_vm0, %v462_v62 }
  0x64   : > { %2813 = vmatmul.msk.bf16.gmra.mxu3 %vm274_vm0, %v540_v63 }
  0x65   : > { %2824 = vmatmul.msk.bf16.gmra.mxu0 %vm274_vm0, %v617_v0 }
  0x66   : > { %2836 = vmatmul.msk.bf16.gmra.mxu1 %vm274_vm0, %v695_v1 }
  0x73   : > { %2802 = vmatmul.msk.bf16.gmra.mxu2 %vm274_vm0, %v463_v6 }
  0x74   : > { %2814 = vmatmul.msk.bf16.gmra.mxu3 %vm274_vm0, %v541_v7 }
  0x75   : > { %2825 = vmatmul.msk.bf16.gmra.mxu0 %vm274_vm0, %v618_v8 }
  0x76   : > { %2837 = vmatmul.msk.bf16.gmra.mxu1 %vm274_vm0, %v696_v11 }
  0x83   : > { %2847 = vmatmul.msk.bf16.vlgmr.msra.gmra.mxu2 %vm274_vm0, %v3554_v35 }
  0x84   : > { %2859 = vmatmul.msk.bf16.vlgmr.msra.gmra.mxu3 %vm274_vm0, %v3552_v34 }
  0x85   : > { %2826 = vmatmul.msk.bf16.gmra.mxu0 %vm274_vm0, %v619_v14 }
  0x86   : > { %2838 = vmatmul.msk.bf16.gmra.mxu1 %vm274_vm0, %v697_v15 }
  0x93   : > { %2848 = vmatmul.msk.bf16.gmra.mxu2 %vm274_vm0, %v323_v49 }
  0x94   : > { %2860 = vmatmul.msk.bf16.gmra.mxu3 %vm274_vm0, %v339_v48 }
  0x95   : > { %2871 = vmatmul.msk.bf16.vlgmr.msra.gmra.mxu0 %vm274_vm0, %v461_v54 }
  0xa2   : > { %v379_v16 = vpop.f32.mrf.mxu0 }
  0xa3   : > { %2849 = vmatmul.msk.bf16.gmra.mxu2 %vm274_vm0, %v3546_v29  ;;  %v3620_v29 = vld [vmem:[#allocation2 + $0x92] sm:$0xff]  ;;  %v432_v30 = vpop.f32.mrf.mxu1 }
  0xa4   : > { %2861 = vmatmul.msk.bf16.gmra.mxu3 %vm274_vm0, %v3542_v28  ;;  %v932_v31 = vpack.c.bf16 %v3620_v29, %v693_v13  ;;  %v433_v1 = vadd.f32 %v432_v30, %v379_v16  ;;  %v3198_v13 = vld [vmem:[#allocation7 + $0x28] sm:$0xff] }
  0xa5   : > { %2872 = vmatmul.msk.bf16.gmra.mxu0 %vm274_vm0, %v462_v62  ;;  %1213 = vmatpush.bf16.msrb.mxu3 %v3198_v13 }
  0xaa   : > { %v381_v17 = vpop.f32.mrf.mxu0 }
  0xab   : > { %v434_v35 = vpop.f32.mrf.mxu1 }
  0xac   : > { %v435_v11 = vadd.f32 %v434_v35, %v381_v17  ;;  %v3200_v17 = vld [vmem:[#allocation7 + $0x38] sm:$0xff] }
  0xad   : > { %1291 = vmatpush.bf16.msrb.mxu0 %v3200_v17 }
  0xb2   : > { %v3607_v22 = vpop.f32.mrf.mxu0 }
  0xb3   : > { %2850 = vmatmul.msk.bf16.gmra.mxu2 %vm274_vm0, %v776_v20  ;;  %v437_v42 = vpop.f32.mrf.mxu1 }
  0xb4   : > { %2862 = vmatmul.msk.bf16.gmra.mxu3 %vm274_vm0, %v854_v21  ;;  %v3193_v21 = vld [vmem:[#allocation7] sm:$0xff] }
  0xb5   : > { %2873 = vmatmul.msk.bf16.gmra.mxu0 %vm274_vm0, %v463_v6  ;;  %1144 = vmatpush.bf16.msrb.mxu2 %v3193_v21 }
  0xb6   : > { %v394_v23 = vpop.f32.mrf.mxu2 }
  0xb7   : > { %v447_v24 = vpop.f32.mrf.mxu3 }
  0xb8   : > { %v3612_v25 = vadd.f32 %v447_v24, %v394_v23  ;;  %v3197_v23 = vld [vmem:[#allocation7 + $0x20] sm:$0xff] }
  0xb9   : > { %1214 = vmatpush.bf16.msrb.mxu3 %v3197_v23 }
  0xba   : > { %v3614_v26 = vpop.f32.mrf.mxu0 }
  0xbb   : > { %v3628_v46 = vpop.f32.mrf.mxu1 }
  0xbe   : > { %v3616_v27 = vpop.f32.mrf.mxu2 }
  0xbf   : > { %v3618_v28 = vpop.f32.mrf.mxu3 }
  0xc2   : > { %v3623_v32 = vpop.f32.mrf.mxu0 }
  0xc3   : > { %v3638_v52 = vpop.f32.mrf.mxu1 }
  0xc5   : > { %2874 = vmatmul.msk.bf16.gmra.mxu0 %vm274_vm0, %v932_v31 }
  0xc6   : > { %v502_v33 = vpop.f32.mrf.mxu2 }
  0xc7   : > { %v580_v34 = vpop.f32.mrf.mxu3  ;;  %v522_v2 = vadd.f32 %v502_v33, %v433_v1 }
  0xc9   : > { %v600_v6 = vadd.f32 %v580_v34, %v522_v2  ;;  %v438_v34 = vadd.f32 %v437_v42, %v3607_v22  ;;  %v440_v42 = vadd.f32 %v3628_v46, %v3614_v26  ;;  %v443_v26 = vadd.f32 %v3638_v52, %v3623_v32 }
  0xca   : > { %v3626_v36 = vpop.f32.mrf.mxu0 }
  0xcb   : > { %v3646_v56 = vpop.f32.mrf.mxu1 }
  0xce   : > { %v504_v37 = vpop.f32.mrf.mxu2 }
  0xcf   : > { %v582_v38 = vpop.f32.mrf.mxu3  ;;  %v523_v14 = vadd.f32 %v504_v37, %v435_v11  ;;  %v3665_v37 = vld [vmem:[#allocation5] ss:$0 sm:$0xff] }
  0xd1   : > { %v601_v16 = vadd.f32 %v582_v38, %v523_v14  ;;  %v3199_v38 = vld [vmem:[#allocation7 + $0x30] sm:$0xff] }
  0xd2   : > { %v658_v41 = vpop.f32.mrf.mxu0  ;;  %1292 = vmatpush.bf16.msrb.mxu0 %v3199_v38 }
  0xd3   : > { %v736_v61 = vpop.f32.mrf.mxu1  ;;  %v678_v12 = vadd.f32 %v658_v41, %v600_v6 }
  0xd5   : > { %v756_v20 = vadd.f32 %v736_v61, %v678_v12 }
  0xd6   : > { %v507_v43 = vpop.f32.mrf.mxu2 }
  0xd7   : > { %v585_v44 = vpop.f32.mrf.mxu3  ;;  %v524_v35 = vadd.f32 %v507_v43, %v438_v34 }
  0xd9   : > { %v602_v3 = vadd.f32 %v585_v44, %v524_v35 }
  0xda   : > { %v660_v45 = vpop.f32.mrf.mxu0 }
  0xdb   : > { %v738_v5 = vpop.f32.mrf.mxu1  ;;  %v679_v39 = vadd.f32 %v660_v45, %v601_v16 }
  0xdd   : > { %v757_v1 = vadd.f32 %v738_v5, %v679_v39 }
  0xde   : > { %v3630_v47 = vpop.f32.mrf.mxu2 }
  0xdf   : > { %v3632_v48 = vpop.f32.mrf.mxu3  ;;  %v525_v5 = vadd.f32 %v3630_v47, %v440_v42 }
  0xe2   : > { %v663_v49 = vpop.f32.mrf.mxu0 }
  0xe3   : > { %v741_v24 = vpop.f32.mrf.mxu1  ;;  %v680_v43 = vadd.f32 %v663_v49, %v602_v3 }
  0xe5   : > { %v758_v13 = vadd.f32 %v741_v24, %v680_v43 }
  0xe6   : > { %v3634_v50 = vpop.f32.mrf.mxu2 }
  0xe7   : > { %v3636_v51 = vpop.f32.mrf.mxu3 }
  0xea   : > { %v3640_v53 = vpop.f32.mrf.mxu0 }
  0xee   : > { %v3642_v54 = vpop.f32.mrf.mxu2 }
  0xef   : > { %v3644_v55 = vpop.f32.mrf.mxu3 }
  0xf2   : > { %v3648_v58 = vpop.f32.mrf.mxu0 }
  0xf6   : > { %v3650_v59 = vpop.f32.mrf.mxu2 }
  0xf7   : > { %v3652_v60 = vpop.f32.mrf.mxu3 }
  0xfa   : > { %v3654_v62 = vpop.f32.mrf.mxu0 }
  0xfe   : > { %v3656_v63 = vpop.f32.mrf.mxu2 }
  0xff   : > { %v3658_v0 = vpop.f32.mrf.mxu3 }
 0x102   : > { %v3660_v4 = vpop.f32.mrf.mxu0 }
 0x106   : > { %v815_v7 = vpop.f32.mrf.mxu2 }
 0x107   : > { %v893_v8 = vpop.f32.mrf.mxu3  ;;  %v835_v30 = vadd.f32 %v815_v7, %v756_v20  ;;  %v603_v20 = vadd.f32 %v3632_v48, %v525_v5 }
 0x109   : > { %v913_v41 = vadd.f32 %v893_v8, %v835_v30  ;;  %v743_v8 = vpop.f32.mrf.mxu1  ;;  %v681_v16 = vadd.f32 %v3640_v53, %v603_v20  ;;  %v526_v30 = vadd.f32 %v3634_v50, %v443_v26 }
 0x10a   : > { %v3662_v15 = vpop.f32.mrf.mxu0 }
 0x10b   : > { %v759_v17 = vadd.f32 %v743_v8, %v681_v16  ;;  %v604_v35 = vadd.f32 %v3636_v51, %v526_v30  ;;  %v3204_v16 = vld [vmem:[#allocation7 + $0x58] sm:$0xff] }
 0x10c   : > { %1447 = vmatpush.bf16.msra.mxu2 %v3204_v16 }
 0x10d   : > { %v682_v57 = vadd.f32 %v3648_v58, %v604_v35 }
 0x10e   : > { %v817_v31 = vpop.f32.mrf.mxu2 }
 0x10f   : > { %v895_v33 = vpop.f32.mrf.mxu3  ;;  %v836_v6 = vadd.f32 %v817_v31, %v757_v1 }
 0x111   : > { %v914_v12 = vadd.f32 %v895_v33, %v836_v6  ;;  %v746_v53 = vpop.f32.mrf.mxu1  ;;  %v3201_v6 = vld [vmem:[#allocation7 + $0x40] sm:$0xff] }
 0x112   : > { %v971_v61 = vpop.f32.mrf.mxu0  ;;  %1370 = vmatpush.bf16.msrb.mxu1 %v3201_v6 }
 0x113   : > { %v991_v2 = vadd.f32 %v971_v61, %v913_v41 }
 0x115   : > { %v3668_v7 = vadd.f32 %v3665_v37, %v991_v2 }
 0x116   : > { %v820_v11 = vpop.f32.mrf.mxu2 }
 0x117   : > { %v898_v22 = vpop.f32.mrf.mxu3  ;;  %v1011_v45 = vmax.f32 %v3668_v7, 0.0  ;;  %v837_v21 = vadd.f32 %v820_v11, %v758_v13 }
 0x119   : > { %1019 = vst.msk [vmem:[#allocation2 + $0x11] sm:$0xff] %vm274_vm0, %v1011_v45  ;;  %v915_v48 = vadd.f32 %v898_v22, %v837_v21  ;;  %v760_v22 = vadd.f32 %v746_v53, %v682_v57  ;;  %v3203_v57 = vld [vmem:[#allocation7 + $0x50] sm:$0xff] }
 0x11a   : > { %v973_v44 = vpop.f32.mrf.mxu0  ;;  %1448 = vmatpush.bf16.msra.mxu2 %v3203_v57 }
 0x11b   : > { %v992_v14 = vadd.f32 %v973_v44, %v914_v12  ;;  %v528_v44 = vadd.f32 %v3650_v59, %v3612_v25 }
 0x11d   : > { %v3677_v23 = vadd.f32 %v3665_v37, %v992_v14  ;;  %v606_v30 = vadd.f32 %v3652_v60, %v528_v44  ;;  %v3210_v44 = vld [vmem:[#allocation7 + $0x88] sm:$0xff] }
 0x11e   : > { %v822_v46 = vpop.f32.mrf.mxu2 }
 0x11f   : > { %v900_v49 = vpop.f32.mrf.mxu3  ;;  %v1012_v47 = vmax.f32 %v3677_v23, 0.0  ;;  %v838_v41 = vadd.f32 %v822_v46, %v759_v17 }
 0x120   : > { %v3684_v31 = vld [vmem:[#allocation2 + $0x11] sm:$0xff] }
 0x121   : > { %v1028_v24 = vld [vmem:[#allocation2 + $0x10] sm:$0xff]  ;;  %1020 = vst.msk [vmem:[#allocation2 + $0x21] sm:$0xff] %vm274_vm0, %v1012_v47  ;;  %v1051_v34 = vpack.c.bf16 %v3684_v31, %v3498_v9  ;;  %v916_v3 = vadd.f32 %v900_v49, %v838_v41  ;;  %v3206_v47 = vld [vmem:[#allocation7 + $0x68] sm:$0xff] }
 0x122   : > { %v3686_v33 = vld [vmem:[#allocation2 + $0x12] sm:$0xff]  ;;  %v1035_v32 = vpack.c.bf16 %v1028_v24, %v3501_v10  ;;  %v976_v39 = vpop.f32.mrf.mxu0  ;;  %1525 = vmatpush.bf16.msra.mxu3 %v3206_v47 }
 0x123   : > { %v1174_v52 = vpack.c.bf16 %v3686_v33, %v3560_v40  ;;  %v993_v50 = vadd.f32 %v976_v39, %v915_v48  ;;  %2883 = vmatmul.msk.bf16.vlgmr.msra.gmra.mxu1 %vm274_vm0, %v1051_v34  ;;  %v445_v40 = vadd.f32 %v3646_v56, %v3626_v36  ;;  %v748_v36 = vpop.f32.mrf.mxu1 }
 0x124   : > { %2895 = vmatmul.msk.bf16.vlgmr.msrb.gmra.mxu2 %vm274_vm0, %v1035_v32  ;;  %v450_v32 = vadd.f32 %v3618_v28, %v3616_v27  ;;  %v3208_v27 = vld [vmem:[#allocation7 + $0x78] sm:$0xff]  ;;  %1681 = vmatpush.bf16.msra.mxu1 %v3210_v44 }
 0x125   : > { %2907 = vmatmul.msk.bf16.vlgmr.msrb.gmra.mxu3 %vm274_vm0, %v1174_v52  ;;  %v3699_v9 = vadd.f32 %v3665_v37, %v993_v50  ;;  %v527_v38 = vadd.f32 %v3642_v54, %v445_v40  ;;  %v684_v52 = vadd.f32 %v3660_v4, %v606_v30  ;;  %1603 = vmatpush.bf16.msra.mxu0 %v3208_v27 }
 0x126   : > { %v825_v10 = vpop.f32.mrf.mxu2  ;;  %v529_v50 = vadd.f32 %v3656_v63, %v450_v32 }
 0x127   : > { %v1013_v61 = vmax.f32 %v3699_v9, 0.0  ;;  %v903_v1 = vpop.f32.mrf.mxu3  ;;  %v605_v56 = vadd.f32 %v3644_v55, %v527_v38  ;;  %v839_v58 = vadd.f32 %v825_v10, %v760_v22 }
 0x128   : > { %v1245_v2 = vld [vmem:[#allocation2 + $0x20] sm:$0xff]  ;;  %v607_v4 = vadd.f32 %v3658_v0, %v529_v50 }
 0x129   : > { %1021 = vst.msk [vmem:[#allocation2 + $0x31] sm:$0xff] %vm274_vm0, %v1013_v61  ;;  %v1252_v51 = vpack.c.bf16 %v1245_v2, %v1028_v24  ;;  %v683_v54 = vadd.f32 %v3654_v62, %v605_v56  ;;  %v3714_v5 = vld [vmem:[#allocation2 + $0x21] sm:$0xff]  ;;  %v917_v20 = vadd.f32 %v903_v1, %v839_v58  ;;  %v3205_v61 = vld [vmem:[#allocation7 + $0x60] sm:$0xff] }
 0x12a   : > { %v978_v11 = vpop.f32.mrf.mxu0  ;;  %v3716_v12 = vld [vmem:[#allocation2 + $0x22] sm:$0xff]  ;;  %1526 = vmatpush.bf16.msra.mxu3 %v3205_v61  ;;  %v685_v63 = vadd.f32 %v3662_v15, %v607_v4  ;;  %v3209_v61 = vld [vmem:[#allocation7 + $0x80] sm:$0xff] }
 0x12b   : > { %v994_v42 = vadd.f32 %v978_v11, %v916_v3  ;;  %2919 = vmatmul.msk.bf16.vlgmr.msrb.gmra.mxu0 %vm274_vm0, %v1252_v51  ;;  %v761_v59 = vadd.f32 %v748_v36, %v683_v54  ;;  %v751_v34 = vpop.f32.mrf.mxu1  ;;  %v1408_v57 = vpack.c.bf16 %v3716_v12, %v3686_v33  ;;  %1682 = vmatpush.bf16.msra.mxu1 %v3209_v61 }
 0x12c   : > { %v762_v10 = vadd.f32 %v751_v34, %v684_v52 }
 0x12d   : > { %v3710_v43 = vadd.f32 %v3665_v37, %v994_v42 }
 0x12e   : > { %v827_v45 = vpop.f32.mrf.mxu2 }
 0x12f   : > { %v1014_v8 = vmax.f32 %v3710_v43, 0.0  ;;  %v905_v46 = vpop.f32.mrf.mxu3  ;;  %v840_v24 = vadd.f32 %v827_v45, %v761_v59 }
 0x130   : > { %v3720_v13 = vld [vmem:[#allocation2 + $0x31] sm:$0xff] }
 0x131   : > { %v1030_v14 = vld [vmem:[#allocation2 + $0x30] sm:$0xff]  ;;  %1022 = vst.msk [vmem:[#allocation2 + $0x41] sm:$0xff] %vm274_vm0, %v1014_v8  ;;  %v3727_v62 = vpack.c.bf16 %v3720_v13, %v3714_v5  ;;  %v918_v35 = vadd.f32 %v905_v46, %v840_v24 }
 0x132   : > { %v3722_v55 = vld [vmem:[#allocation2 + $0x32] sm:$0xff]  ;;  %v3729_v21 = vpack.c.bf16 %v1030_v14, %v1245_v2  ;;  %v981_v25 = vpop.f32.mrf.mxu0 }
 0x133   : > { %v3733_v26 = vpack.c.bf16 %v3722_v55, %v3716_v12  ;;  %v995_v49 = vadd.f32 %v981_v25, %v917_v20  ;;  %2884 = vmatmul.msk.bf16.gmra.mxu1 %vm274_vm0, %v3727_v62  ;;  %v753_v6 = vpop.f32.mrf.mxu1 }
 0x134   : > { %2896 = vmatmul.msk.bf16.gmra.mxu2 %vm274_vm0, %v3729_v21  ;;  %v763_v54 = vadd.f32 %v753_v6, %v685_v63 }
 0x135   : > { %2908 = vmatmul.msk.bf16.gmra.mxu3 %vm274_vm0, %v3733_v26  ;;  %v3743_v48 = vadd.f32 %v3665_v37, %v995_v49 }
 0x136   : > { %v830_v39 = vpop.f32.mrf.mxu2 }
 0x137   : > { %v1015_v53 = vmax.f32 %v3743_v48, 0.0  ;;  %v908_v28 = vpop.f32.mrf.mxu3  ;;  %v841_v1 = vadd.f32 %v830_v39, %v762_v10 }
 0x138   : > { %v1247_v17 = vld [vmem:[#allocation2 + $0x40] sm:$0xff] }
 0x139   : > { %1023 = vst.msk [vmem:[#allocation2 + $0x51] sm:$0xff] %vm274_vm0, %v1015_v53  ;;  %v1253_v60 = vpack.c.bf16 %v1247_v17, %v1030_v14  ;;  %v1047_v3 = vld [vmem:[#allocation2 + $0x41] sm:$0xff]  ;;  %v919_v0 = vadd.f32 %v908_v28, %v841_v1 }
 0x13a   : > { %v983_v41 = vpop.f32.mrf.mxu0  ;;  %v1170_v51 = vld [vmem:[#allocation2 + $0x42] sm:$0xff]  ;;  %v1331_v27 = vpack.c.bf16 %v1047_v3, %v3720_v13 }
 0x13b   : > { %v996_v40 = vadd.f32 %v983_v41, %v918_v35  ;;  %2920 = vmatmul.msk.bf16.gmra.mxu0 %vm274_vm0, %v1253_v60  ;;  %v3207_v14 = vld [vmem:[#allocation7 + $0x70] sm:$0xff]  ;;  %v1409_v28 = vpack.c.bf16 %v1170_v51, %v3722_v55 }
 0x13c   : > { %1604 = vmatpush.bf16.msra.mxu0 %v3207_v14 }
 0x13d   : > { %v3754_v2 = vadd.f32 %v3665_v37, %v996_v40  ;;  %v1330_v40 = vpack.c.bf16 %v3714_v5, %v3684_v31 }
 0x13e   : > { %v832_v15 = vpop.f32.mrf.mxu2 }
 0x13f   : > { %v1016_v38 = vmax.f32 %v3754_v2, 0.0  ;;  %v842_v20 = vadd.f32 %v832_v15, %v763_v54  ;;  %v910_v25 = vpop.f32.mrf.mxu3 }
 0x140   : > { %v3758_v11 = vld [vmem:[#allocation2 + $0x51] sm:$0xff] }
 0x141   : > { %v1032_v22 = vld [vmem:[#allocation2 + $0x50] sm:$0xff]  ;;  %1024 = vst.msk [vmem:[#allocation2 + $0x61] sm:$0xff] %vm274_vm0, %v1016_v38  ;;  %v1053_v36 = vpack.c.bf16 %v3758_v11, %v1047_v3  ;;  %v920_v16 = vadd.f32 %v910_v25, %v842_v20 }
 0x142   : > { %v3760_v42 = vld [vmem:[#allocation2 + $0x52] sm:$0xff]  ;;  %v1037_v56 = vpack.c.bf16 %v1032_v22, %v1247_v17  ;;  %v986_v45 = vpop.f32.mrf.mxu0 }
 0x143   : > { %v3765_v58 = vpack.c.bf16 %v3760_v42, %v1170_v51  ;;  %v997_v8 = vadd.f32 %v986_v45, %v919_v0  ;;  %2885 = vmatmul.msk.bf16.gmra.mxu1 %vm274_vm0, %v1053_v36 }
 0x144   : > { %2897 = vmatmul.msk.bf16.gmra.mxu2 %vm274_vm0, %v1037_v56 }
 0x145   : > { %2909 = vmatmul.msk.bf16.gmra.mxu3 %vm274_vm0, %v3765_v58  ;;  %v3772_v46 = vadd.f32 %v3665_v37, %v997_v8 }
 0x147   : > { %v1017_v59 = vmax.f32 %v3772_v46, 0.0 }
 0x148   : > { %v1249_v49 = vld [vmem:[#allocation2 + $0x60] sm:$0xff] }
 0x149   : > { %1025 = vst.msk [vmem:[#allocation2 + $0x71] sm:$0xff] %vm274_vm0, %v1017_v59  ;;  %v1254_v47 = vpack.c.bf16 %v1249_v49, %v1032_v22  ;;  %v1049_v52 = vld [vmem:[#allocation2 + $0x61] sm:$0xff] }
 0x14a   : > { %v988_v30 = vpop.f32.mrf.mxu0  ;;  %v1172_v53 = vld [vmem:[#allocation2 + $0x62] sm:$0xff]  ;;  %v1332_v31 = vpack.c.bf16 %v1049_v52, %v3758_v11 }
 0x14b   : > { %v998_v24 = vadd.f32 %v988_v30, %v920_v16  ;;  %2921 = vmatmul.msk.bf16.gmra.mxu0 %vm274_vm0, %v1254_v47  ;;  %v1410_v33 = vpack.c.bf16 %v1172_v53, %v3760_v42 }
 0x14d   : > { %v3778_v34 = vadd.f32 %v3665_v37, %v998_v24 }
 0x14f   : > { %v1018_v32 = vmax.f32 %v3778_v34, 0.0 }
 0x150   : > { %v1050_v39 = vld [vmem:[#allocation2 + $0x71] sm:$0xff] }
 0x151   : > { %v1034_v17 = vld [vmem:[#allocation2 + $0x70] sm:$0xff]  ;;  %1026 = vst.msk [vmem:[#allocation2 + $0x81] sm:$0xff] %vm274_vm0, %v1018_v32  ;;  %v1054_v35 = vpack.c.bf16 %v1050_v39, %v1049_v52 }
 0x152   : > { %v1173_v50 = vld [vmem:[#allocation2 + $0x72] sm:$0xff]  ;;  %v1038_v60 = vpack.c.bf16 %v1034_v17, %v1249_v49 }
 0x153   : > { %v1177_v41 = vpack.c.bf16 %v1173_v50, %v1172_v53  ;;  %2886 = vmatmul.msk.bf16.gmra.mxu1 %vm274_vm0, %v1054_v35 }
 0x154   : > { %2898 = vmatmul.msk.bf16.gmra.mxu2 %vm274_vm0, %v1038_v60 }
 0x155   : > { %2910 = vmatmul.msk.bf16.gmra.mxu3 %vm274_vm0, %v1177_v41 }
 0x158   : > { %v1251_v37 = vld [vmem:[#allocation2 + $0x80] sm:$0xff] }
 0x159   : > { %v1255_v10 = vpack.c.bf16 %v1251_v37, %v1034_v17  ;;  %v1329_v5 = vld [vmem:[#allocation2 + $0x81] sm:$0xff]  ;;  %v3218_v17 = vld [vmem:[%s4123_s4 + $0x38] sm:$0xff] }
 0x15a   : > { %v1407_v12 = vld [vmem:[#allocation2 + $0x82] sm:$0xff]  ;;  %v1333_v13 = vpack.c.bf16 %v1329_v5, %v1050_v39  ;;  %1788 = vmatpush.bf16.msrb.mxu2 %v3218_v17 }
 0x15b   : > { %2922 = vmatmul.msk.bf16.gmra.mxu0 %vm274_vm0, %v1255_v10  ;;  %v1411_v55 = vpack.c.bf16 %v1407_v12, %v1173_v50  ;;  %v1645_v39 = vpack.c.bf16 %v3620_v29, %v1407_v12  ;;  %v3217_v10 = vld [vmem:[%s4123_s4 + $0x30] sm:$0xff]  ;;  %v3214_v12 = vld [vmem:[%s4123_s4 + $0x18] sm:$0xff] }
 0x15e   : > { %1789 = vmatpush.bf16.msrb.mxu2 %v3217_v10 }
 0x163   : > { %2931 = vmatmul.msk.bf16.vlgmr.msrb.gmra.mxu1 %vm274_vm0, %v1330_v40 }
 0x164   : > { %2943 = vmatmul.msk.bf16.vlgmr.msra.gmra.mxu2 %vm274_vm0, %v1408_v57 }
 0x165   : > { %2955 = vmatmul.msk.bf16.vlgmr.msra.gmra.mxu3 %vm274_vm0, %v3729_v21  ;;  %v1567_v21 = vpack.c.bf16 %v3603_v19, %v1329_v5 }
 0x16b   : > { %2967 = vmatmul.msk.bf16.vlgmr.msra.gmra.mxu0 %vm274_vm0, %v3727_v62  ;;  %v1489_v62 = vpack.c.bf16 %v3601_v18, %v1251_v37 }
 0x173   : > { %2932 = vmatmul.msk.bf16.gmra.mxu1 %vm274_vm0, %v1331_v27  ;;  %v3216_v27 = vld [vmem:[%s4123_s4 + $0x28] sm:$0xff] }
 0x174   : > { %2944 = vmatmul.msk.bf16.gmra.mxu2 %vm274_vm0, %v1409_v28 }
 0x175   : > { %2956 = vmatmul.msk.bf16.gmra.mxu3 %vm274_vm0, %v1037_v56  ;;  %1790 = vmatpush.bf16.msrb.mxu2 %v3216_v27 }
 0x17b   : > { %2968 = vmatmul.msk.bf16.gmra.mxu0 %vm274_vm0, %v1053_v36 }
 0x183   : > { %2933 = vmatmul.msk.bf16.gmra.mxu1 %vm274_vm0, %v1332_v31  ;;  %v3215_v31 = vld [vmem:[%s4123_s4 + $0x20] sm:$0xff] }
 0x184   : > { %2945 = vmatmul.msk.bf16.gmra.mxu2 %vm274_vm0, %v1410_v33 }
 0x185   : > { %2957 = vmatmul.msk.bf16.gmra.mxu3 %vm274_vm0, %v1038_v60  ;;  %1791 = vmatpush.bf16.msrb.mxu2 %v3215_v31 }
 0x189   : > { %1792 = vmatpush.bf16.msrb.mxu2 %v3214_v12 }
 0x18b   : > { %2969 = vmatmul.msk.bf16.gmra.mxu0 %vm274_vm0, %v1054_v35 }
 0x193   : > { %2934 = vmatmul.msk.bf16.gmra.mxu1 %vm274_vm0, %v1333_v13 }
 0x194   : > { %2946 = vmatmul.msk.bf16.gmra.mxu2 %vm274_vm0, %v1411_v55  ;;  %v3213_v55 = vld [vmem:[%s4123_s4 + $0x10] sm:$0xff] }
 0x195   : > { %2958 = vmatmul.msk.bf16.gmra.mxu3 %vm274_vm0, %v1489_v62  ;;  %1793 = vmatpush.bf16.msrb.mxu2 %v3213_v55 }
 0x19b   : > { %2970 = vmatmul.msk.bf16.gmra.mxu0 %vm274_vm0, %v1567_v21 }
 0x1a0   : > { %v1093_v4 = vpop.f32.mrf.mxu1 }
 0x1a3   : > { %2979 = vmatmul.msk.bf16.vlgmr.msra.gmra.mxu1 %vm274_vm0, %v3733_v26 }
 0x1a7   : > { %v1146_v1 = vpop.f32.mrf.mxu2 }
 0x1a8   : > { %v1147_v63 = vadd.f32 %v1146_v1, %v1093_v4  ;;  %v1216_v38 = vpop.f32.mrf.mxu3  ;;  %v3816_v3 = vpop.f32.mrf.mxu1  ;;  %v3212_v1 = vld [vmem:[%s4123_s4 + $0x8] sm:$0xff] }
 0x1a9   : > { %v1294_v18 = vpop.f32.mrf.mxu0  ;;  %1794 = vmatpush.bf16.msrb.mxu2 %v3212_v1 }
 0x1aa   : > { %v1236_v51 = vadd.f32 %v1216_v38, %v1147_v63  ;;  %v3211_v38 = vld [vmem:[%s4123_s4] sm:$0xff] }
 0x1ac   : > { %v1314_v6 = vadd.f32 %v1294_v18, %v1236_v51 }
 0x1ad   : > { %1795 = vmatpush.bf16.msrb.mxu2 %v3211_v38 }
 0x1af   : > { %v3818_v11 = vpop.f32.mrf.mxu2 }
 0x1b0   : > { %v3820_v22 = vpop.f32.mrf.mxu3  ;;  %v1098_v42 = vpop.f32.mrf.mxu1 }
 0x1b1   : > { %v3822_v19 = vpop.f32.mrf.mxu0 }
 0x1b3   : > { %2980 = vmatmul.msk.bf16.gmra.mxu1 %vm274_vm0, %v3765_v58 }
 0x1b7   : > { %v1151_v0 = vpop.f32.mrf.mxu2 }
 0x1b8   : > { %v1152_v26 = vadd.f32 %v1151_v0, %v1098_v42  ;;  %v1221_v36 = vpop.f32.mrf.mxu3  ;;  %v3826_v56 = vpop.f32.mrf.mxu1 }
 0x1b9   : > { %v1299_v15 = vpop.f32.mrf.mxu0 }
 0x1ba   : > { %v1238_v45 = vadd.f32 %v1221_v36, %v1152_v26 }
 0x1bc   : > { %v1316_v54 = vadd.f32 %v1299_v15, %v1238_v45  ;;  %v1149_v45 = vadd.f32 %v3818_v11, %v3816_v3 }
 0x1bf   : > { %v3828_v8 = vpop.f32.mrf.mxu2 }
 0x1c0   : > { %v3830_v44 = vpop.f32.mrf.mxu3  ;;  %v1103_v14 = vpop.f32.mrf.mxu1 }
 0x1c1   : > { %v3832_v20 = vpop.f32.mrf.mxu0 }
 0x1c3   : > { %2981 = vmatmul.msk.bf16.gmra.mxu1 %vm274_vm0, %v1177_v41 }
 0x1c7   : > { %v1156_v25 = vpop.f32.mrf.mxu2 }
 0x1c8   : > { %v1157_v59 = vadd.f32 %v1156_v25, %v1103_v14  ;;  %v1226_v58 = vpop.f32.mrf.mxu3  ;;  %v3835_v49 = vpop.f32.mrf.mxu1  ;;  %v1237_v14 = vadd.f32 %v3820_v22, %v1149_v45 }
 0x1c9   : > { %v1304_v16 = vpop.f32.mrf.mxu0 }
 0x1ca   : > { %v1240_v47 = vadd.f32 %v1226_v58, %v1157_v59 }
 0x1cc   : > { %v1318_v30 = vadd.f32 %v1304_v16, %v1240_v47  ;;  %v1315_v16 = vadd.f32 %v3822_v19, %v1237_v14 }
 0x1cf   : > { %v3837_v24 = vpop.f32.mrf.mxu2 }
 0x1d0   : > { %v3839_v32 = vpop.f32.mrf.mxu3  ;;  %v1108_v52 = vpop.f32.mrf.mxu1 }
 0x1d1   : > { %v3841_v53 = vpop.f32.mrf.mxu0 }
 0x1d3   : > { %2982 = vmatmul.msk.bf16.gmra.mxu1 %vm274_vm0, %v1645_v39 }
 0x1d7   : > { %v1161_v50 = vpop.f32.mrf.mxu2 }
 0x1d8   : > { %v1162_v35 = vadd.f32 %v1161_v50, %v1108_v52  ;;  %v1231_v60 = vpop.f32.mrf.mxu3  ;;  %v3848_v41 = vpop.f32.mrf.mxu1 }
 0x1d9   : > { %v1309_v40 = vpop.f32.mrf.mxu0 }
 0x1da   : > { %v1242_v37 = vadd.f32 %v1231_v60, %v1162_v35  ;;  %v1154_v35 = vadd.f32 %v3828_v8, %v3826_v56 }
 0x1dc   : > { %v1320_v57 = vadd.f32 %v1309_v40, %v1242_v37  ;;  %v1239_v22 = vadd.f32 %v3830_v44, %v1154_v35  ;;  %v1159_v44 = vadd.f32 %v3837_v24, %v3835_v49 }
 0x1df   : > { %v3865_v62 = vpop.f32.mrf.mxu2 }
 0x1e0   : > { %v1372_v29 = vpop.f32.mrf.mxu1  ;;  %v3872_v63 = vpop.f32.mrf.mxu3 }
 0x1e1   : > { %v1392_v61 = vadd.f32 %v1372_v29, %v1314_v6  ;;  %v3877_v18 = vpop.f32.mrf.mxu0 }
 0x1e7   : > { %v1450_v51 = vpop.f32.mrf.mxu2 }
 0x1e8   : > { %v1374_v28 = vpop.f32.mrf.mxu1  ;;  %v1528_v42 = vpop.f32.mrf.mxu3  ;;  %v1470_v47 = vadd.f32 %v1450_v51, %v1392_v61  ;;  %v1317_v61 = vadd.f32 %v3832_v20, %v1239_v22 }
 0x1e9   : > { %v1606_v0 = vpop.f32.mrf.mxu0 }
 0x1ea   : > { %v1548_v50 = vadd.f32 %v1528_v42, %v1470_v47 }
 0x1ec   : > { %v1626_v37 = vadd.f32 %v1606_v0, %v1548_v50  ;;  %v1241_v0 = vadd.f32 %v3839_v32, %v1159_v44 }
 0x1ef   : > { %v1452_v26 = vpop.f32.mrf.mxu2 }
 0x1f0   : > { %v1377_v33 = vpop.f32.mrf.mxu1 }
 0x1f1   : > { %v1394_v5 = vadd.f32 %v1377_v33, %v1316_v54  ;;  %v1530_v54 = vpop.f32.mrf.mxu3  ;;  %v1608_v59 = vpop.f32.mrf.mxu0 }
 0x1f7   : > { %v1455_v58 = vpop.f32.mrf.mxu2 }
 0x1f8   : > { %v1379_v13 = vpop.f32.mrf.mxu1  ;;  %v1472_v31 = vadd.f32 %v1455_v58, %v1394_v5 }
 0x1f9   : > { %v1533_v39 = vpop.f32.mrf.mxu3  ;;  %v1611_v3 = vpop.f32.mrf.mxu0  ;;  %v1395_v33 = vadd.f32 %v1379_v13, %v1317_v61 }
 0x1fa   : > { %v1550_v1 = vadd.f32 %v1533_v39, %v1472_v31 }
 0x1fc   : > { %v1628_v42 = vadd.f32 %v1611_v3, %v1550_v1 }
 0x1ff   : > { %v1457_v11 = vpop.f32.mrf.mxu2 }
 0x200   : > { %v1382_v21 = vpop.f32.mrf.mxu1  ;;  %v1473_v8 = vadd.f32 %v1457_v11, %v1395_v33 }
 0x201   : > { %v3867_v4 = vadd.f32 %v1382_v21, %v1318_v30  ;;  %v1393_v30 = vadd.f32 %v1374_v28, %v1315_v16  ;;  %v1535_v19 = vpop.f32.mrf.mxu3  ;;  %v1613_v12 = vpop.f32.mrf.mxu0 }
 0x202   : > { %v1551_v38 = vadd.f32 %v1535_v19, %v1473_v8 }
 0x203   : > { %v1471_v52 = vadd.f32 %v1452_v26, %v1393_v30  ;;  %v3222_v30 = vld [vmem:[#allocation7 + $0xa8] sm:$0xff] }
 0x204   : > { %v1629_v20 = vadd.f32 %v1613_v12, %v1551_v38  ;;  %1905 = vmatpush.bf16.msrb.mxu3 %v3222_v30 }
 0x205   : > { %v1549_v60 = vadd.f32 %v1530_v54, %v1471_v52  ;;  %v1319_v54 = vadd.f32 %v3841_v53, %v1241_v0  ;;  %v3224_v52 = vld [vmem:[#allocation7 + $0xb8] sm:$0xff]  ;;  %v1164_v53 = vadd.f32 %v3865_v62, %v3848_v41  ;;  %v3219_v0 = vld [vmem:[#allocation7 + $0x90] sm:$0xff] }
 0x206   : > { %2028 = vmatpush.bf16.msrb.mxu1 %v3224_v52 }
 0x207   : > { %v1627_v10 = vadd.f32 %v1608_v59, %v1549_v60  ;;  %v1460_v56 = vpop.f32.mrf.mxu2 }
 0x208   : > { %v1384_v6 = vpop.f32.mrf.mxu1  ;;  %v1474_v58 = vadd.f32 %v1460_v56, %v3867_v4  ;;  %v1243_v4 = vadd.f32 %v3872_v63, %v1164_v53  ;;  %v3230_v53 = vld [vmem:[#allocation7 + $0xe8] sm:$0xff] }
 0x209   : > { %v1538_v51 = vpop.f32.mrf.mxu3  ;;  %v1616_v26 = vpop.f32.mrf.mxu0  ;;  %v1397_v16 = vadd.f32 %v1384_v6, %v1319_v54 }
 0x20a   : > { %v1552_v39 = vadd.f32 %v1538_v51, %v1474_v58  ;;  %v1981_v58 = vld [vmem:[#allocation2 + $0x2] sm:$0xff] }
 0x20c   : > { %v1630_v3 = vadd.f32 %v1616_v26, %v1552_v39  ;;  %v3225_v26 = vld [vmem:[#allocation7 + $0xc0] sm:$0xff] }
 0x20f   : > { %v1462_v5 = vpop.f32.mrf.mxu2 }
 0x210   : > { %v1387_v36 = vpop.f32.mrf.mxu1  ;;  %v1475_v24 = vadd.f32 %v1462_v5, %v1397_v16 }
 0x211   : > { %v3879_v15 = vadd.f32 %v1387_v36, %v1320_v57  ;;  %v1540_v49 = vpop.f32.mrf.mxu3  ;;  %v1618_v50 = vpop.f32.mrf.mxu0 }
 0x212   : > { %v1553_v60 = vadd.f32 %v1540_v49, %v1475_v24 }
 0x214   : > { %v1631_v6 = vadd.f32 %v1618_v50, %v1553_v60 }
 0x217   : > { %v1465_v35 = vpop.f32.mrf.mxu2 }
 0x218   : > { %v3884_v25 = vpop.f32.mrf.mxu1 }
 0x219   : > { %v1621_v19 = vpop.f32.mrf.mxu0 }
 0x21f   : > { %v1467_v61 = vpop.f32.mrf.mxu2 }
 0x220   : > { %v1684_v17 = vpop.f32.mrf.mxu1 }
 0x221   : > { %v1704_v40 = vadd.f32 %v1684_v17, %v1626_v37  ;;  %v3221_v17 = vld [vmem:[#allocation7 + $0xa0] sm:$0xff]  ;;  %v1543_v37 = vpop.f32.mrf.mxu3  ;;  %v1623_v56 = vpop.f32.mrf.mxu0 }
 0x222   : > { %1906 = vmatpush.bf16.msrb.mxu3 %v3221_v17 }
 0x223   : > { %v1712_v27 = vmax.f32 %v1704_v40, 0.0  ;;  %v1321_v40 = vadd.f32 %v3877_v18, %v1243_v4 }
 0x225   : > { %v1399_v41 = vadd.f32 %v3884_v25, %v1321_v40  ;;  %v3226_v25 = vld [vmem:[#allocation7 + $0xc8] sm:$0xff] }
 0x226   : > { %2106 = vmatpush.bf16.msra.mxu2 %v3226_v25 }
 0x228   : > { %v1686_v57 = vpop.f32.mrf.mxu1 }
 0x229   : > { %v1705_v29 = vadd.f32 %v1686_v57, %v1627_v10  ;;  %v1545_v33 = vpop.f32.mrf.mxu3 }
 0x22a   : > { %2107 = vmatpush.bf16.msra.mxu2 %v3225_v26 }
 0x22b   : > { %v1713_v28 = vmax.f32 %v1705_v29, 0.0 }
 0x22d   : > { %v1720_v55 = vpack.c.bf16 %v1713_v28, %v1712_v27  ;;  %v1476_v27 = vadd.f32 %v1465_v35, %v3879_v15  ;;  %v1477_v28 = vadd.f32 %v1467_v61, %v1399_v41  ;;  %v3220_v15 = vld [vmem:[#allocation7 + $0x98] sm:$0xff]  ;;  %v3229_v41 = vld [vmem:[#allocation7 + $0xe0] sm:$0xff] }
 0x22e   : > { %1958 = vmatpush.bf16.msrb.mxu0 %v3220_v15 }
 0x22f   : > { %1796 = vmatmul.bf16.vlgmr.msrb.gmra.mxu2 %v1720_v55  ;;  %v1554_v63 = vadd.f32 %v1543_v37, %v1476_v27  ;;  %v1555_v12 = vadd.f32 %v1545_v33, %v1477_v28 }
 0x230   : > { %v1689_v21 = vpop.f32.mrf.mxu1 }
 0x231   : > { %v1706_v36 = vadd.f32 %v1689_v21, %v1628_v42  ;;  %v1632_v55 = vadd.f32 %v1621_v19, %v1554_v63  ;;  %v1633_v8 = vadd.f32 %v1623_v56, %v1555_v12  ;;  %v3223_v42 = vld [vmem:[#allocation7 + $0xb0] sm:$0xff] }
 0x232   : > { %2029 = vmatpush.bf16.msrb.mxu1 %v3223_v42  ;;  %1959 = vmatpush.bf16.msrb.mxu0 %v3219_v0 }
 0x233   : > { %v1714_v14 = vmax.f32 %v1706_v36, 0.0 }
 0x236   : > { %3249 = vmatpush.bf16.msra.mxu1 %v3230_v53  ;;  %2262 = vmatpush.bf16.msra.mxu0 %v3230_v53 }
 0x238   : > { %v1691_v13 = vpop.f32.mrf.mxu1 }
 0x239   : > { %v1707_v45 = vadd.f32 %v1691_v13, %v1629_v20  ;;  %v3228_v20 = vld [vmem:[#allocation7 + $0xd8] sm:$0xff] }
 0x23a   : > { %2184 = vmatpush.bf16.msra.mxu3 %v3228_v20  ;;  %2263 = vmatpush.bf16.msra.mxu0 %v3229_v41 }
 0x23b   : > { %v1715_v59 = vmax.f32 %v1707_v45, 0.0  ;;  %3250 = vmatpush.bf16.msra.mxu1 %v3229_v41 }
 0x23d   : > { %v1721_v47 = vpack.c.bf16 %v1715_v59, %v1714_v14  ;;  %v1858_v14 = vld [vmem:[#allocation2 + $0x1] sm:$0xff] }
 0x23e   : > { %v1841_v59 = vld [vmem:[#allocation2] sm:$0xff] }
 0x23f   : > { %1801 = vmatmul.bf16.gmra.mxu2 %v1721_v47 }
 0x240   : > { %v1694_v32 = vpop.f32.mrf.mxu1 }
 0x241   : > { %v1708_v11 = vadd.f32 %v1694_v32, %v1630_v3  ;;  %v3227_v32 = vld [vmem:[#allocation7 + $0xd0] sm:$0xff] }
 0x242   : > { %2185 = vmatpush.bf16.msra.mxu3 %v3227_v32  ;;  %v3235_v32 = vld [vmem:[#allocation7 + $0x110] sm:$0xff] }
 0x243   : > { %v1716_v57 = vmax.f32 %v1708_v11, 0.0 }
 0x248   : > { %v1696_v22 = vpop.f32.mrf.mxu1 }
 0x249   : > { %v1709_v10 = vadd.f32 %v1696_v22, %v1631_v6 }
 0x24b   : > { %v1717_v29 = vmax.f32 %v1709_v10, 0.0 }
 0x24d   : > { %v1722_v62 = vpack.c.bf16 %v1717_v29, %v1716_v57 }
 0x24f   : > { %1806 = vmatmul.bf16.gmra.mxu2 %v1722_v62  ;;  %v3234_v62 = vld [vmem:[#allocation7 + $0x108] sm:$0xff] }
 0x250   : > { %v1699_v31 = vpop.f32.mrf.mxu1  ;;  %2418 = vmatpush.bf16.msrb.mxu2 %v3234_v62  ;;  %v2300_v62 = vld [vmem:[#allocation2 + $0x90] sm:$0xff] }
 0x251   : > { %v1710_v21 = vadd.f32 %v1699_v31, %v1632_v55 }
 0x253   : > { %v1718_v44 = vmax.f32 %v1710_v21, 0.0 }
 0x258   : > { %v1701_v18 = vpop.f32.mrf.mxu1 }
 0x259   : > { %v1711_v1 = vadd.f32 %v1701_v18, %v1633_v8 }
 0x25b   : > { %v1719_v38 = vmax.f32 %v1711_v1, 0.0  ;;  %v3236_v1 = vld [vmem:[#allocation7 + $0x118] sm:$0xff] }
 0x25d   : > { %v1723_v51 = vpack.c.bf16 %v1719_v38, %v1718_v44  ;;  %v3233_v44 = vld [vmem:[#allocation7 + $0x100] sm:$0xff] }
 0x25e   : > { %2419 = vmatpush.bf16.msrb.mxu2 %v3233_v44 }
 0x25f   : > { %1811 = vmatmul.bf16.gmra.mxu2 %v1723_v51 }
 0x2b2   : > { %v1797_v36 = vpop.f32.mrf.mxu2 }
 0x2b3   : > { %v3903_v5 = vadd.f32 %v1797_v36, %v3668_v7 }
 0x2b5   : > { %v1825_v13 = vmax.f32 %v3903_v5, 0.0 }
 0x2b7   : > { %1833 = vst.msk [vmem:[#allocation2 + $0x11] sm:$0xff] %vm274_vm0, %v1825_v13 }
 0x2ba   : > { %v1799_v45 = vpop.f32.mrf.mxu2 }
 0x2bb   : > { %v3908_v54 = vadd.f32 %v1799_v45, %v3677_v23 }
 0x2bd   : > { %v1826_v16 = vmax.f32 %v3908_v54, 0.0 }
 0x2be   : > { %v3911_v47 = vld [vmem:[#allocation2 + $0x11] sm:$0xff] }
 0x2bf   : > { %v1842_v49 = vld [vmem:[#allocation2 + $0x10] sm:$0xff]  ;;  %1834 = vst.msk [vmem:[#allocation2 + $0x21] sm:$0xff] %vm274_vm0, %v1826_v16  ;;  %v1866_v7 = vpack.c.bf16 %v3911_v47, %v1858_v14 }
 0x2c0   : > { %v3913_v24 = vld [vmem:[#allocation2 + $0x12] sm:$0xff]  ;;  %v1849_v30 = vpack.c.bf16 %v1842_v49, %v1841_v59 }
 0x2c1   : > { %v1989_v52 = vpack.c.bf16 %v3913_v24, %v1981_v58  ;;  %3023 = vmatmul.msk.bf16.vlgmr.msrb.gmra.mxu3 %vm274_vm0, %v1866_v7  ;;  %v3231_v7 = vld [vmem:[#allocation7 + $0xf0] sm:$0xff] }
 0x2c2   : > { %3035 = vmatmul.msk.bf16.vlgmr.msrb.gmra.mxu0 %vm274_vm0, %v1849_v30  ;;  %v1802_v23 = vpop.f32.mrf.mxu2  ;;  %2496 = vmatpush.bf16.msrb.mxu3 %v3236_v1 }
 0x2c3   : > { %3047 = vmatmul.msk.bf16.vlgmr.msrb.gmra.mxu1 %vm274_vm0, %v1989_v52  ;;  %v3922_v39 = vadd.f32 %v1802_v23, %v3699_v9 }
 0x2c5   : > { %v1827_v17 = vmax.f32 %v3922_v39, 0.0 }
 0x2c6   : > { %v2060_v50 = vld [vmem:[#allocation2 + $0x20] sm:$0xff]  ;;  %2497 = vmatpush.bf16.msrb.mxu3 %v3235_v32 }
 0x2c7   : > { %1835 = vst.msk [vmem:[#allocation2 + $0x31] sm:$0xff] %vm274_vm0, %v1827_v17  ;;  %v2067_v35 = vpack.c.bf16 %v2060_v50, %v1842_v49  ;;  %v3931_v9 = vld [vmem:[#allocation2 + $0x21] sm:$0xff]  ;;  %v3232_v49 = vld [vmem:[#allocation7 + $0xf8] sm:$0xff] }
 0x2c8   : > { %v3933_v6 = vld [vmem:[#allocation2 + $0x22] sm:$0xff]  ;;  %2340 = vmatpush.bf16.msrb.mxu1 %v3232_v49  ;;  %v2145_v30 = vpack.c.bf16 %v3931_v9, %v3911_v47 }
 0x2c9   : > { %3059 = vmatmul.msk.bf16.vlgmr.msra.gmra.mxu2 %vm274_vm0, %v2067_v35  ;;  %v2223_v52 = vpack.c.bf16 %v3933_v6, %v3913_v24 }
 0x2ca   : > { %v1804_v60 = vpop.f32.mrf.mxu2 }
 0x2cb   : > { %v3928_v3 = vadd.f32 %v1804_v60, %v3710_v43 }
 0x2cc   : > { %2341 = vmatpush.bf16.msrb.mxu1 %v3231_v7 }
 0x2cd   : > { %v1828_v4 = vmax.f32 %v3928_v3, 0.0 }
 0x2ce   : > { %v3935_v11 = vld [vmem:[#allocation2 + $0x31] sm:$0xff] }
 0x2cf   : > { %v1844_v37 = vld [vmem:[#allocation2 + $0x30] sm:$0xff]  ;;  %1836 = vst.msk [vmem:[#allocation2 + $0x41] sm:$0xff] %vm274_vm0, %v1828_v4  ;;  %v3942_v10 = vpack.c.bf16 %v3935_v11, %v3931_v9 }
 0x2d0   : > { %v3937_v22 = vld [vmem:[#allocation2 + $0x32] sm:$0xff]  ;;  %v3944_v40 = vpack.c.bf16 %v1844_v37, %v2060_v50 }
 0x2d1   : > { %v3948_v43 = vpack.c.bf16 %v3937_v22, %v3933_v6  ;;  %3024 = vmatmul.msk.bf16.gmra.mxu3 %vm274_vm0, %v3942_v10  ;;  %v2378_v4 = vld [vmem:[#allocation2 + $0x91] sm:$0xff] }
 0x2d2   : > { %3036 = vmatmul.msk.bf16.gmra.mxu0 %vm274_vm0, %v3944_v40  ;;  %v1807_v57 = vpop.f32.mrf.mxu2 }
 0x2d3   : > { %3048 = vmatmul.msk.bf16.gmra.mxu1 %vm274_vm0, %v3948_v43  ;;  %v3957_v29 = vadd.f32 %v1807_v57, %v3743_v48 }
 0x2d5   : > { %v1829_v19 = vmax.f32 %v3957_v29, 0.0 }
 0x2d6   : > { %v2062_v61 = vld [vmem:[#allocation2 + $0x40] sm:$0xff] }
 0x2d7   : > { %1837 = vst.msk [vmem:[#allocation2 + $0x51] sm:$0xff] %vm274_vm0, %v1829_v19  ;;  %v2068_v27 = vpack.c.bf16 %v2062_v61, %v1844_v37  ;;  %v1862_v63 = vld [vmem:[#allocation2 + $0x41] sm:$0xff] }
 0x2d8   : > { %v1985_v33 = vld [vmem:[#allocation2 + $0x42] sm:$0xff]  ;;  %v2146_v47 = vpack.c.bf16 %v1862_v63, %v3935_v11 }
 0x2d9   : > { %3060 = vmatmul.msk.bf16.gmra.mxu2 %vm274_vm0, %v2068_v27  ;;  %v2224_v50 = vpack.c.bf16 %v1985_v33, %v3937_v22 }
 0x2da   : > { %v1809_v28 = vpop.f32.mrf.mxu2 }
 0x2db   : > { %v3963_v31 = vadd.f32 %v1809_v28, %v3754_v2 }
 0x2dd   : > { %v1830_v48 = vmax.f32 %v3963_v31, 0.0 }
 0x2de   : > { %v1863_v12 = vld [vmem:[#allocation2 + $0x51] sm:$0xff] }
 0x2df   : > { %v1846_v55 = vld [vmem:[#allocation2 + $0x50] sm:$0xff]  ;;  %1838 = vst.msk [vmem:[#allocation2 + $0x61] sm:$0xff] %vm274_vm0, %v1830_v48  ;;  %v1868_v8 = vpack.c.bf16 %v1863_v12, %v1862_v63 }
 0x2e0   : > { %v1986_v56 = vld [vmem:[#allocation2 + $0x52] sm:$0xff]  ;;  %v1851_v21 = vpack.c.bf16 %v1846_v55, %v2062_v61 }
 0x2e1   : > { %v3967_v18 = vpack.c.bf16 %v1986_v56, %v1985_v33  ;;  %3025 = vmatmul.msk.bf16.gmra.mxu3 %vm274_vm0, %v1868_v8 }
 0x2e2   : > { %3037 = vmatmul.msk.bf16.gmra.mxu0 %vm274_vm0, %v1851_v21  ;;  %v1812_v2 = vpop.f32.mrf.mxu2 }
 0x2e3   : > { %3049 = vmatmul.msk.bf16.gmra.mxu1 %vm274_vm0, %v3967_v18  ;;  %v3974_v38 = vadd.f32 %v1812_v2, %v3772_v46 }
 0x2e5   : > { %v1831_v51 = vmax.f32 %v3974_v38, 0.0 }
 0x2e6   : > { %v2064_v15 = vld [vmem:[#allocation2 + $0x60] sm:$0xff] }
 0x2e7   : > { %1839 = vst.msk [vmem:[#allocation2 + $0x71] sm:$0xff] %vm274_vm0, %v1831_v51  ;;  %v2069_v42 = vpack.c.bf16 %v2064_v15, %v1846_v55  ;;  %v1864_v26 = vld [vmem:[#allocation2 + $0x61] sm:$0xff] }
 0x2e8   : > { %v1987_v36 = vld [vmem:[#allocation2 + $0x62] sm:$0xff]  ;;  %v2147_v35 = vpack.c.bf16 %v1864_v26, %v1863_v12 }
 0x2e9   : > { %3061 = vmatmul.msk.bf16.gmra.mxu2 %vm274_vm0, %v2069_v42  ;;  %v2225_v23 = vpack.c.bf16 %v1987_v36, %v1986_v56 }
 0x2ea   : > { %v1814_v25 = vpop.f32.mrf.mxu2 }
 0x2eb   : > { %v3980_v0 = vadd.f32 %v1814_v25, %v3778_v34 }
 0x2ed   : > { %v1832_v20 = vmax.f32 %v3980_v0, 0.0 }
 0x2ee   : > { %v1865_v46 = vld [vmem:[#allocation2 + $0x71] sm:$0xff] }
 0x2ef   : > { %v1848_v13 = vld [vmem:[#allocation2 + $0x70] sm:$0xff]  ;;  %1840 = vst.msk [vmem:[#allocation2 + $0x81] sm:$0xff] %vm274_vm0, %v1832_v20  ;;  %v1869_v14 = vpack.c.bf16 %v1865_v46, %v1864_v26 }
 0x2f0   : > { %v1988_v45 = vld [vmem:[#allocation2 + $0x72] sm:$0xff]  ;;  %v1852_v59 = vpack.c.bf16 %v1848_v13, %v2064_v15 }
 0x2f1   : > { %v3984_v58 = vpack.c.bf16 %v1988_v45, %v1987_v36  ;;  %3026 = vmatmul.msk.bf16.gmra.mxu3 %vm274_vm0, %v1869_v14 }
 0x2f2   : > { %3038 = vmatmul.msk.bf16.gmra.mxu0 %vm274_vm0, %v1852_v59 }
 0x2f3   : > { %3050 = vmatmul.msk.bf16.gmra.mxu1 %vm274_vm0, %v3984_v58 }
 0x2f6   : > { %v2066_v34 = vld [vmem:[#allocation2 + $0x80] sm:$0xff] }
 0x2f7   : > { %v2070_v16 = vpack.c.bf16 %v2066_v34, %v1848_v13  ;;  %v4000_v17 = vld [vmem:[#allocation2 + $0x82] sm:$0xff]  ;;  %v2304_v33 = vpack.c.bf16 %v2300_v62, %v2066_v34 }
 0x2f8   : > { %v2226_v24 = vpack.c.bf16 %v4000_v17, %v1988_v45  ;;  %v2144_v53 = vld [vmem:[#allocation2 + $0x81] sm:$0xff] }
 0x2f9   : > { %3062 = vmatmul.msk.bf16.gmra.mxu2 %vm274_vm0, %v2070_v16  ;;  %v2148_v60 = vpack.c.bf16 %v2144_v53, %v1865_v46  ;;  %v2382_v9 = vpack.c.bf16 %v2378_v4, %v2144_v53  ;;  %v3241_v62 = vld [vmem:[%s4123_s4 + $0x60] sm:$0xff] }
 0x301   : > { %3071 = vmatmul.msk.bf16.vlgmr.msra.gmra.mxu3 %vm274_vm0, %v2145_v30 }
 0x302   : > { %3083 = vmatmul.msk.bf16.vlgmr.msra.gmra.mxu0 %vm274_vm0, %v2223_v52 }
 0x303   : > { %3085 = vmatmul.msk.bf16.vlgmr.msra.gmra.mxu1 %vm274_vm0, %v2225_v23 }
 0x309   : > { %3107 = vmatmul.msk.bf16.vlgmr.msrb.gmra.mxu2 %vm274_vm0, %v3942_v10 }
 0x311   : > { %3072 = vmatmul.msk.bf16.gmra.mxu3 %vm274_vm0, %v2146_v47 }
 0x312   : > { %3084 = vmatmul.msk.bf16.gmra.mxu0 %vm274_vm0, %v2224_v50 }
 0x313   : > { %3086 = vmatmul.msk.bf16.gmra.mxu1 %vm274_vm0, %v2226_v24 }
 0x319   : > { %3108 = vmatmul.msk.bf16.gmra.mxu2 %vm274_vm0, %v1868_v8 }
 0x321   : > { %3073 = vmatmul.msk.bf16.gmra.mxu3 %vm274_vm0, %v2147_v35 }
 0x323   : > { %3095 = vmatmul.msk.bf16.vlgmr.msrb.gmra.mxu1 %vm274_vm0, %v3944_v40 }
 0x329   : > { %3109 = vmatmul.msk.bf16.gmra.mxu2 %vm274_vm0, %v1869_v14 }
 0x331   : > { %3074 = vmatmul.msk.bf16.gmra.mxu3 %vm274_vm0, %v2148_v60 }
 0x333   : > { %3096 = vmatmul.msk.bf16.gmra.mxu1 %vm274_vm0, %v1851_v21 }
 0x339   : > { %3110 = vmatmul.msk.bf16.gmra.mxu2 %vm274_vm0, %v2382_v9 }
 0x33f   : > { %v1961_v6 = vpop.f32.mrf.mxu0 }
 0x340   : > { %v2031_v11 = vpop.f32.mrf.mxu1 }
 0x341   : > { %3119 = vmatmul.msk.bf16.vlgmr.msrb.gmra.mxu3 %vm274_vm0, %v3948_v43 }
 0x343   : > { %3097 = vmatmul.msk.bf16.gmra.mxu1 %vm274_vm0, %v1852_v59  ;;  %v2456_v59 = vld [vmem:[#allocation2 + $0x92] sm:$0xff] }
 0x344   : > { %v1908_v37 = vpop.f32.mrf.mxu3  ;;  %v2460_v49 = vpack.c.bf16 %v2456_v59, %v4000_v17 }
 0x345   : > { %v1962_v22 = vadd.f32 %v1961_v6, %v1908_v37 }
 0x347   : > { %v1963_v10 = vpop.f32.mrf.mxu0  ;;  %v2051_v57 = vadd.f32 %v2031_v11, %v1962_v22 }
 0x348   : > { %v2033_v40 = vpop.f32.mrf.mxu1 }
 0x34c   : > { %v1910_v19 = vpop.f32.mrf.mxu3  ;;  %v2109_v61 = vpop.f32.mrf.mxu2 }
 0x34d   : > { %v1964_v27 = vadd.f32 %v1963_v10, %v1910_v19  ;;  %v2129_v41 = vadd.f32 %v2109_v61, %v2051_v57  ;;  %v3244_v10 = vld [vmem:[%s4123_s4 + $0x78] sm:$0xff]  ;;  %v3243_v19 = vld [vmem:[%s4123_s4 + $0x70] sm:$0xff] }
 0x34e   : > { %2604 = vmatpush.bf16.msrb.mxu0 %v3244_v10 }
 0x34f   : > { %v1966_v28 = vpop.f32.mrf.mxu0  ;;  %v4019_v63 = vadd.f32 %v2033_v40, %v1964_v27  ;;  %v3242_v27 = vld [vmem:[%s4123_s4 + $0x68] sm:$0xff] }
 0x350   : > { %v2036_v48 = vpop.f32.mrf.mxu1 }
 0x351   : > { %3120 = vmatmul.msk.bf16.gmra.mxu3 %vm274_vm0, %v3967_v18 }
 0x352   : > { %2605 = vmatpush.bf16.msrb.mxu0 %v3243_v19 }
 0x353   : > { %3098 = vmatmul.msk.bf16.gmra.mxu1 %vm274_vm0, %v2304_v33 }
 0x354   : > { %v1913_v43 = vpop.f32.mrf.mxu3  ;;  %v4024_v12 = vpop.f32.mrf.mxu2 }
 0x355   : > { %v1967_v55 = vadd.f32 %v1966_v28, %v1913_v43  ;;  %v3240_v28 = vld [vmem:[%s4123_s4 + $0x58] sm:$0xff] }
 0x356   : > { %2606 = vmatpush.bf16.msrb.mxu0 %v3242_v27 }
 0x357   : > { %v1968_v56 = vpop.f32.mrf.mxu0  ;;  %v2053_v21 = vadd.f32 %v2036_v48, %v1967_v55 }
 0x358   : > { %v2038_v8 = vpop.f32.mrf.mxu1 }
 0x35a   : > { %2607 = vmatpush.bf16.msrb.mxu0 %v3241_v62 }
 0x35c   : > { %v1915_v2 = vpop.f32.mrf.mxu3  ;;  %v2114_v1 = vpop.f32.mrf.mxu2 }
 0x35d   : > { %v1969_v44 = vadd.f32 %v1968_v56, %v1915_v2  ;;  %v2131_v51 = vadd.f32 %v2114_v1, %v2053_v21  ;;  %v3239_v56 = vld [vmem:[%s4123_s4 + $0x50] sm:$0xff]  ;;  %v3238_v21 = vld [vmem:[%s4123_s4 + $0x48] sm:$0xff] }
 0x35e   : > { %2608 = vmatpush.bf16.msrb.mxu0 %v3240_v28 }
 0x35f   : > { %v1971_v15 = vpop.f32.mrf.mxu0  ;;  %v4026_v25 = vadd.f32 %v2038_v8, %v1969_v44  ;;  %v3237_v44 = vld [vmem:[%s4123_s4 + $0x40] sm:$0xff] }
 0x360   : > { %v2041_v42 = vpop.f32.mrf.mxu1 }
 0x361   : > { %3121 = vmatmul.msk.bf16.gmra.mxu3 %vm274_vm0, %v3984_v58 }
 0x362   : > { %2609 = vmatpush.bf16.msrb.mxu0 %v3239_v56 }
 0x364   : > { %v1918_v18 = vpop.f32.mrf.mxu3  ;;  %v4030_v20 = vpop.f32.mrf.mxu2 }
 0x365   : > { %v1972_v26 = vadd.f32 %v1971_v15, %v1918_v18 }
 0x366   : > { %2610 = vmatpush.bf16.msrb.mxu0 %v3238_v21 }
 0x367   : > { %v1973_v36 = vpop.f32.mrf.mxu0  ;;  %v2055_v13 = vadd.f32 %v2041_v42, %v1972_v26 }
 0x368   : > { %v2043_v46 = vpop.f32.mrf.mxu1 }
 0x36a   : > { %2611 = vmatpush.bf16.msrb.mxu0 %v3237_v44 }
 0x36c   : > { %v1920_v45 = vpop.f32.mrf.mxu3  ;;  %v2119_v14 = vpop.f32.mrf.mxu2 }
 0x36d   : > { %v1974_v34 = vadd.f32 %v1973_v36, %v1920_v45  ;;  %v2133_v16 = vadd.f32 %v2119_v14, %v2055_v13  ;;  %v2130_v45 = vadd.f32 %v4024_v12, %v4019_v63 }
 0x36f   : > { %v4033_v7 = vadd.f32 %v2043_v46, %v1974_v34  ;;  %v1976_v30 = vpop.f32.mrf.mxu0 }
 0x370   : > { %v2046_v52 = vpop.f32.mrf.mxu1 }
 0x371   : > { %3122 = vmatmul.msk.bf16.gmra.mxu3 %vm274_vm0, %v2460_v49 }
 0x374   : > { %v1923_v58 = vpop.f32.mrf.mxu3  ;;  %v4036_v23 = vpop.f32.mrf.mxu2 }
 0x375   : > { %v1977_v32 = vadd.f32 %v1976_v30, %v1923_v58 }
 0x377   : > { %v2057_v47 = vadd.f32 %v2046_v52, %v1977_v32  ;;  %v1978_v50 = vpop.f32.mrf.mxu0 }
 0x378   : > { %v2048_v24 = vpop.f32.mrf.mxu1 }
 0x37c   : > { %v1925_v35 = vpop.f32.mrf.mxu3  ;;  %v2124_v53 = vpop.f32.mrf.mxu2 }
 0x37d   : > { %v1979_v60 = vadd.f32 %v1978_v50, %v1925_v35  ;;  %v2135_v4 = vadd.f32 %v2124_v53, %v2057_v47 }
 0x37f   : > { %v4038_v9 = vadd.f32 %v2048_v24, %v1979_v60  ;;  %v2265_v18 = vpop.f32.mrf.mxu0 }
 0x380   : > { %v2275_v11 = vpop.f32.mrf.mxu1 }
 0x384   : > { %v2187_v17 = vpop.f32.mrf.mxu3  ;;  %v4064_v8 = vpop.f32.mrf.mxu2 }
 0x385   : > { %v2207_v6 = vadd.f32 %v2187_v17, %v2129_v41  ;;  %v2132_v17 = vadd.f32 %v4030_v20, %v4026_v25  ;;  %v2134_v25 = vadd.f32 %v4036_v23, %v4033_v7  ;;  %v2136_v7 = vadd.f32 %v4064_v8, %v4038_v9 }
 0x387   : > { %v2267_v14 = vpop.f32.mrf.mxu0 }
 0x388   : > { %v4040_v22 = vpop.f32.mrf.mxu1 }
 0x38c   : > { %v2189_v37 = vpop.f32.mrf.mxu3 }
 0x38d   : > { %v2208_v59 = vadd.f32 %v2189_v37, %v2130_v45 }
 0x38f   : > { %v2286_v52 = vadd.f32 %v2267_v14, %v2208_v59  ;;  %v2270_v50 = vpop.f32.mrf.mxu0 }
 0x390   : > { %v2280_v61 = vpop.f32.mrf.mxu1 }
 0x394   : > { %v2192_v40 = vpop.f32.mrf.mxu3 }
 0x395   : > { %v2209_v57 = vadd.f32 %v2192_v40, %v2131_v51  ;;  %v2421_v51 = vpop.f32.mrf.mxu2 }
 0x397   : > { %v2287_v10 = vadd.f32 %v2270_v50, %v2209_v57  ;;  %v2272_v40 = vpop.f32.mrf.mxu0 }
 0x398   : > { %v4057_v48 = vpop.f32.mrf.mxu1 }
 0x39c   : > { %v2194_v41 = vpop.f32.mrf.mxu3 }
 0x39d   : > { %v2423_v13 = vpop.f32.mrf.mxu2 }
 0x3a0   : > { %v2343_v1 = vpop.f32.mrf.mxu1 }
 0x3a4   : > { %v2197_v33 = vpop.f32.mrf.mxu3 }
 0x3a5   : > { %v2211_v43 = vadd.f32 %v2197_v33, %v2133_v16  ;;  %v2285_v16 = vadd.f32 %v2265_v18, %v2207_v6  ;;  %v2426_v32 = vpop.f32.mrf.mxu2 }
 0x3a7   : > { %v4059_v55 = vadd.f32 %v2275_v11, %v2211_v43  ;;  %v2363_v30 = vadd.f32 %v2343_v1, %v2285_v16  ;;  %v2210_v11 = vadd.f32 %v2194_v41, %v2132_v17 }
 0x3a8   : > { %v2345_v36 = vpop.f32.mrf.mxu1 }
 0x3a9   : > { %v2364_v58 = vadd.f32 %v2345_v36, %v2286_v52  ;;  %v2441_v47 = vadd.f32 %v2421_v51, %v2363_v30  ;;  %v2288_v27 = vadd.f32 %v2272_v40, %v2210_v11 }
 0x3ab   : > { %v2442_v35 = vadd.f32 %v2423_v13, %v2364_v58 }
 0x3ac   : > { %v2199_v2 = vpop.f32.mrf.mxu3 }
 0x3ad   : > { %v2428_v6 = vpop.f32.mrf.mxu2  ;;  %v2212_v57 = vadd.f32 %v2199_v2, %v2134_v25 }
 0x3af   : > { %v2290_v36 = vadd.f32 %v4040_v22, %v2212_v57 }
 0x3b0   : > { %v2348_v34 = vpop.f32.mrf.mxu1 }
 0x3b4   : > { %v2202_v15 = vpop.f32.mrf.mxu3 }
 0x3b5   : > { %v2213_v42 = vadd.f32 %v2202_v15, %v2135_v4  ;;  %v2431_v21 = vpop.f32.mrf.mxu2 }
 0x3b7   : > { %v4072_v26 = vadd.f32 %v2280_v61, %v2213_v42  ;;  %v2365_v61 = vadd.f32 %v2348_v34, %v2287_v10 }
 0x3b8   : > { %v2350_v53 = vpop.f32.mrf.mxu1 }
 0x3b9   : > { %v2366_v28 = vadd.f32 %v2350_v53, %v2288_v27  ;;  %v2443_v33 = vadd.f32 %v2426_v32, %v2365_v61 }
 0x3bb   : > { %v2444_v56 = vadd.f32 %v2428_v6, %v2366_v28 }
 0x3bc   : > { %v2204_v46 = vpop.f32.mrf.mxu3 }
 0x3bd   : > { %v2433_v13 = vpop.f32.mrf.mxu2  ;;  %v2214_v58 = vadd.f32 %v2204_v46, %v2136_v7 }
 0x3bf   : > { %v2292_v50 = vadd.f32 %v4057_v48, %v2214_v58 }
 0x3c0   : > { %v2353_v62 = vpop.f32.mrf.mxu1 }
 0x3c1   : > { %v2367_v18 = vadd.f32 %v2353_v62, %v4059_v55 }
 0x3c3   : > { %v2445_v14 = vadd.f32 %v2431_v21, %v2367_v18 }
 0x3c4   : > { %v2499_v49 = vpop.f32.mrf.mxu3 }
 0x3c5   : > { %v2519_v24 = vadd.f32 %v2499_v49, %v2441_v47  ;;  %v2436_v52 = vpop.f32.mrf.mxu2 }
 0x3c7   : > { %v2527_v63 = vmax.f32 %v2519_v24, 0.0 }
 0x3c8   : > { %v2355_v51 = vpop.f32.mrf.mxu1 }
 0x3c9   : > { %v2368_v45 = vadd.f32 %v2355_v51, %v2290_v36 }
 0x3cb   : > { %v2446_v16 = vadd.f32 %v2433_v13, %v2368_v45 }
 0x3cc   : > { %v2501_v60 = vpop.f32.mrf.mxu3 }
 0x3cd   : > { %v2520_v4 = vadd.f32 %v2501_v60, %v2442_v35  ;;  %v2438_v53 = vpop.f32.mrf.mxu2 }
 0x3cf   : > { %v2528_v12 = vmax.f32 %v2520_v4, 0.0 }
 0x3d0   : > { %v2358_v59 = vpop.f32.mrf.mxu1 }
 0x3d1   : > { %v2535_v37 = vpack.c.bf16 %v2528_v12, %v2527_v63  ;;  %v2369_v47 = vadd.f32 %v2358_v59, %v4072_v26 }
 0x3d3   : > { %2612 = vmatmul.bf16.vlgmr.msrb.gmra.mxu0 %v2535_v37  ;;  %v2447_v35 = vadd.f32 %v2436_v52, %v2369_v47 }
 0x3d4   : > { %v2504_v19 = vpop.f32.mrf.mxu3 }
 0x3d5   : > { %v2521_v43 = vadd.f32 %v2504_v19, %v2443_v33 }
 0x3d7   : > { %v2529_v20 = vmax.f32 %v2521_v43, 0.0 }
 0x3d8   : > { %v2360_v55 = vpop.f32.mrf.mxu1 }
 0x3d9   : > { %v2370_v24 = vadd.f32 %v2360_v55, %v2292_v50 }
 0x3db   : > { %v2448_v4 = vadd.f32 %v2438_v53, %v2370_v24 }
 0x3dc   : > { %v2506_v1 = vpop.f32.mrf.mxu3 }
 0x3dd   : > { %v2522_v44 = vadd.f32 %v2506_v1, %v2444_v56 }
 0x3df   : > { %v2530_v41 = vmax.f32 %v2522_v44, 0.0 }
 0x3e1   : > { %v2536_v15 = vpack.c.bf16 %v2530_v41, %v2529_v20 }
 0x3e3   : > { %2617 = vmatmul.bf16.gmra.mxu0 %v2536_v15 }
 0x3e4   : > { %v2509_v42 = vpop.f32.mrf.mxu3 }
 0x3e5   : > { %v2523_v34 = vadd.f32 %v2509_v42, %v2445_v14 }
 0x3e7   : > { %v2531_v23 = vmax.f32 %v2523_v34, 0.0 }
 0x3ec   : > { %v2511_v49 = vpop.f32.mrf.mxu3 }
 0x3ed   : > { %v2524_v30 = vadd.f32 %v2511_v49, %v2446_v16 }
 0x3ef   : > { %v2532_v2 = vmax.f32 %v2524_v30, 0.0 }
 0x3f1   : > { %v2537_v32 = vpack.c.bf16 %v2532_v2, %v2531_v23 }
 0x3f3   : > { %2622 = vmatmul.bf16.gmra.mxu0 %v2537_v32 }
 0x3f4   : > { %v2514_v22 = vpop.f32.mrf.mxu3 }
 0x3f5   : > { %v2525_v60 = vadd.f32 %v2514_v22, %v2447_v35 }
 0x3f7   : > { %v2533_v8 = vmax.f32 %v2525_v60, 0.0 }
 0x3fc   : > { %v2516_v17 = vpop.f32.mrf.mxu3 }
 0x3fd   : > { %v2526_v9 = vadd.f32 %v2516_v17, %v2448_v4 }
 0x3ff   : > { %v2534_v63 = vmax.f32 %v2526_v9, 0.0 }
 0x401   : > { %v2538_v12 = vpack.c.bf16 %v2534_v63, %v2533_v8 }
 0x403   : > { %2627 = vmatmul.bf16.gmra.mxu0 %v2538_v12 }
 0x450   : > { %v2613_v46 = vpop.f32.mrf.mxu0 }
 0x451   : > { %v2633_v11 = vadd.f32 %v2613_v46, %v3903_v5 }
 0x453   : > { %v2641_v37 = vmax.f32 %v2633_v11, 0.0 }
 0x455   : > { %v2649_v48 = vpack.c.bf16 %v2641_v37, %v2641_v37 }
 0x457   : > { %2658 = vst.msk [vmem:[%s4091_s6] sm:$0xf] %vm2657_vm2, %v2649_v48 }
 0x458   : > { %v2615_v26 = vpop.f32.mrf.mxu0 }
 0x459   : > { %v2634_v6 = vadd.f32 %v2615_v26, %v3908_v54 }
 0x45b   : > { %v2642_v10 = vmax.f32 %v2634_v6, 0.0 }
 0x45d   : > { %v2650_v40 = vpack.c.bf16 %v2642_v10, %v2642_v10 }
 0x45f   : > { %2659 = vst.msk [vmem:[%s4091_s6 + $0x4] sm:$0xf] %vm2657_vm2, %v2650_v40 }
 0x460   : > { %v2618_v5 = vpop.f32.mrf.mxu0 }
 0x461   : > { %v2635_v19 = vadd.f32 %v2618_v5, %v3922_v39 }
 0x463   : > { %v2643_v61 = vmax.f32 %v2635_v19, 0.0 }
 0x465   : > { %v2651_v27 = vpack.c.bf16 %v2643_v61, %v2643_v61 }
 0x467   : > { %2660 = vst.msk [vmem:[%s4091_s6 + $0x8] sm:$0xf] %vm2657_vm2, %v2651_v27 }
 0x468   : > { %v2620_v62 = vpop.f32.mrf.mxu0 }
 0x469   : > { %v2636_v28 = vadd.f32 %v2620_v62, %v3928_v3 }
 0x46b   : > { %v2644_v33 = vmax.f32 %v2636_v28, 0.0 }
 0x46d   : > { %v2652_v43 = vpack.c.bf16 %v2644_v33, %v2644_v33 }
 0x46f   : > { %2661 = vst.msk [vmem:[%s4091_s6 + $0xc] sm:$0xf] %vm2657_vm2, %v2652_v43 }
 0x470   : > { %v2623_v54 = vpop.f32.mrf.mxu0 }
 0x471   : > { %v2637_v56 = vadd.f32 %v2623_v54, %v3957_v29 }
 0x473   : > { %v2645_v21 = vmax.f32 %v2637_v56, 0.0 }
 0x475   : > { %v2653_v1 = vpack.c.bf16 %v2645_v21, %v2645_v21 }
 0x477   : > { %2662 = vst.msk [vmem:[%s4091_s6 + $0x10] sm:$0xf] %vm2657_vm2, %v2653_v1 }
 0x478   : > { %v2625_v39 = vpop.f32.mrf.mxu0 }
 0x479   : > { %v2638_v44 = vadd.f32 %v2625_v39, %v3963_v31 }
 0x47b   : > { %v2646_v25 = vmax.f32 %v2638_v44, 0.0 }
 0x47d   : > { %v2654_v20 = vpack.c.bf16 %v2646_v25, %v2646_v25 }
 0x47f   : > { %2663 = vst.msk [vmem:[%s4091_s6 + $0x14] sm:$0xf] %vm2657_vm2, %v2654_v20 }
 0x480   : > { %v2628_v3 = vpop.f32.mrf.mxu0 }
 0x481   : > { %v2639_v41 = vadd.f32 %v2628_v3, %v3974_v38 }
 0x483   : > { %v2647_v51 = vmax.f32 %v2639_v41, 0.0 }
 0x485   : > { %v2655_v57 = vpack.c.bf16 %v2647_v51, %v2647_v51 }
 0x487   : > { %2664 = vst.msk [vmem:[%s4091_s6 + $0x18] sm:$0xf] %vm2657_vm2, %v2655_v57 }
 0x488   : > { %v2630_v29 = vpop.f32.mrf.mxu0 }
 0x489   : > { %v2640_v15 = vadd.f32 %v2630_v29, %v3980_v0 }
 0x48b   : > { %v2648_v42 = vmax.f32 %v2640_v15, 0.0 }
 0x48d   : > { %v2656_v18 = vpack.c.bf16 %v2648_v42, %v2648_v42 }
 0x48f   : > { %2665 = vst.msk [vmem:[%s4091_s6 + $0x1c] sm:$0xf] %vm2657_vm2, %v2656_v18 }
 0x490 PF: > { %s17_s18 = sadd.s32 1, %s3398_s18  }
 0x491   : > { %p14_p7 = scmp.ge.s32.totalorder %s17_s18, 4  }
 0x493   :  { %16 = sbr.rel (!%p14_p7) target bundleno = 2 (0x2), region = 111 }
 0x498   :  { %2687 = vsyncpa [#allocation4], 1 }
 0x499   :  { %2689 = vsyncpa [#allocation4 + $0x1], 1 }
 0x49a   :  { %2690 = vsyncpa [#allocation6], 1 }

// kernel: decoder_forward_pallas.5
= control target key start
LH: loop header
LB: loop body
LE: loop exit
PB: predicated region body
PF: predicated region fallthrough
CT: control target
= control target key end

     0   :  { %s1274_s12 = smov 0   ;;  %s1276_s13 = smov 0   ;;  %s1582_s0 = inlined_call_operand.vmem [shape: bf16[578,128], index: 0, kind: input, shape index: {}]   ;;  %s1583_s1 = inlined_call_operand.vmem [shape: bf16[128,128], index: 1, kind: input, shape index: {}]   ;;  %s1584_s2 = inlined_call_operand.vmem [shape: f32[1,128], index: 2, kind: input, shape index: {}]   ;;  %s1585_s3 = inlined_call_operand.vmem [shape: f32[578,128], index: 3, kind: output, shape index: {}]  }
   0x1   :  { %s1278_s14 = smov 0  }
   0x2 LB: > { %s1287_s15 = sadd.s32 4294967295, %s1220_s14   ;;  %s1289_s16 = sadd.s32 1, %s1220_s14   ;;  %s1220_s14 = sphi %s1278_s14, %s1594_s14   ;;  %s1216_s13 = sphi %s1276_s13, %s1593_s13   ;;  %s1212_s12 = sphi %s1274_s12, %s1592_s12  }
   0x3   : > { %s85_s17 = ssub.s32 %s1220_s14, %s1289_s16  ;;  %s88_s18 = sadd.s32 1, %s1216_s13 }
   0x4   : > { %p86_p0 = scmp.eq.s32.totalorder %s85_s17, 0  ;;  %p98_p1 = scmp.ne.s32.totalorder %s1216_s13, %s1212_s12 }
   0x5   : > { %p99_p2 = scmp.eq.s32.totalorder %s1287_s15, 1  ;;  %p897_p3 = scmp.ge.s32.totalorder %s1220_s14, 1 }
   0x6   : > { %s1297_s19 = scalar_select %p86_p0, %s1216_s13, %s88_s18  }
   0x7   : > { %p1299_p4 = por %p99_p2, %p98_p1  ;;  %p146_p5 = scmp.lt.s32.totalorder %s1220_s14, 3 }
   0x9   : > { %p147_p6 = pnand %p897_p3, %p146_p5 }
   0xa   : > { %s1316_s29 = smul.u32 (!%p147_p6), 38, %s1287_s15  ;;  %s170_s22 = sand.u32 (!%p147_p6), 1, %s1212_s12  }
   0xb   : > { %150 = sbr.rel (%p147_p6) target bundleno = 320 (0x140), region = 32 }
   0xc   : > { %p178_p7 = scmp.lt.s32.totalorder (!%p147_p6), %s1316_s29, 72  ;;  %s1076_s23 = smul.u32 (!%p147_p6), 304, %s170_s22 }
   0xe   : > { %s1364_s26 = scalar_lea.vmem (!%p147_p6), [#allocation2], %s1076_s23  }
  0x10   : > { %v1048_v0 = vld [vmem:[%s1583_s1 + $0x38] sm:$0xff]  ;;  %v1047_v1 = vld [vmem:[%s1583_s1 + $0x30] sm:$0xff]  ;;  %v1046_v2 = vld [vmem:[%s1583_s1 + $0x28] sm:$0xff]  ;;  %s179_s7 = scalar_select %p178_p7, %s1316_s29, 72 }
  0x11   : > { %1052 = vmatpush.bf16.msra.mxu1 %v1048_v0  ;;  %1053 = vmatpush.bf16.msra.mxu2 %v1048_v0  ;;  %v1045_v3 = vld [vmem:[%s1583_s1 + $0x20] sm:$0xff]  ;;  %v1044_v4 = vld [vmem:[%s1583_s1 + $0x18] sm:$0xff]  ;;  %v1043_v5 = vld [vmem:[%s1583_s1 + $0x10] sm:$0xff]  ;;  %s562_s12 = ssub.s32 (%p1299_p4), 73, %s1316_s29  ;;  %s1049_s27 = smul.u32 (%p1299_p4), 304, %s1287_s15 }
  0x12   : > { %1054 = vmatpush.bf16.msra.mxu3 %v1048_v0  ;;  %412 = vmatpush.bf16.msra.mxu0 %v1048_v0  ;;  %v1042_v6 = vld [vmem:[%s1583_s1 + $0x8] sm:$0xff]  ;;  %s898_s10 = sshll.u32 %s179_s7, 2  ;;  %v1041_v7 = vld [vmem:[%s1583_s1] sm:$0xff]  ;;  %p563_p8 = scmp.lt.s32.totalorder (%p1299_p4), %s562_s12, 38 }
  0x13   : > { %s1335_s21 = scalar_lea.vmem %s1582_s0, %s898_s10  ;;  %v1360_v27 = vld [vmem:[%s1584_s2] ss:$0 sm:$0xff]  ;;  %s1447_s4 = scalar_lea.vmem (%p1299_p4), %s1585_s3, %s1049_s27  }
  0x14   : > { %v1026_v8 = vld [vmem:[%s1335_s21 + $0x20] sm:$0xff]  ;;  %v1031_v9 = vld [vmem:[%s1335_s21 + $0x48] sm:$0xff]  ;;  %v1036_v10 = vld [vmem:[%s1335_s21 + $0x70] sm:$0xff] }
  0x15   : > { %1055 = vmatpush.bf16.msra.mxu1 %v1047_v1  ;;  %1056 = vmatpush.bf16.msra.mxu2 %v1047_v1  ;;  %v1022_v11 = vld [vmem:[%s1335_s21] sm:$0xff]  ;;  %v1027_v12 = vld [vmem:[%s1335_s21 + $0x28] sm:$0xff]  ;;  %v1032_v13 = vld [vmem:[%s1335_s21 + $0x50] sm:$0xff] }
  0x16   : > { %1057 = vmatpush.bf16.msra.mxu3 %v1047_v1  ;;  %413 = vmatpush.bf16.msra.mxu0 %v1047_v1  ;;  %v1037_v14 = vld [vmem:[%s1335_s21 + $0x78] sm:$0xff]  ;;  %v1023_v15 = vld [vmem:[%s1335_s21 + $0x8] sm:$0xff]  ;;  %v1028_v16 = vld [vmem:[%s1335_s21 + $0x30] sm:$0xff] }
  0x17   : > { %v1033_v17 = vld [vmem:[%s1335_s21 + $0x58] sm:$0xff]  ;;  %v1038_v18 = vld [vmem:[%s1335_s21 + $0x80] sm:$0xff]  ;;  %v1024_v19 = vld [vmem:[%s1335_s21 + $0x10] sm:$0xff] }
  0x18   : > { %v1029_v20 = vld [vmem:[%s1335_s21 + $0x38] sm:$0xff]  ;;  %v1034_v21 = vld [vmem:[%s1335_s21 + $0x60] sm:$0xff]  ;;  %v1039_v22 = vld [vmem:[%s1335_s21 + $0x88] sm:$0xff] }
  0x19   : > { %1058 = vmatpush.bf16.msra.mxu1 %v1046_v2  ;;  %1059 = vmatpush.bf16.msra.mxu2 %v1046_v2  ;;  %v1025_v23 = vld [vmem:[%s1335_s21 + $0x18] sm:$0xff]  ;;  %v1030_v24 = vld [vmem:[%s1335_s21 + $0x40] sm:$0xff]  ;;  %v1035_v25 = vld [vmem:[%s1335_s21 + $0x68] sm:$0xff] }
  0x1a   : > { %1060 = vmatpush.bf16.msra.mxu3 %v1046_v2  ;;  %414 = vmatpush.bf16.msra.mxu0 %v1046_v2  ;;  %v1040_v26 = vld [vmem:[%s1335_s21 + $0x90] sm:$0xff] }
  0x1d   : > { %1061 = vmatpush.bf16.msra.mxu1 %v1045_v3  ;;  %1062 = vmatpush.bf16.msra.mxu2 %v1045_v3 }
  0x1e   : > { %1063 = vmatpush.bf16.msra.mxu3 %v1045_v3  ;;  %415 = vmatpush.bf16.msra.mxu0 %v1045_v3 }
  0x21   : > { %1064 = vmatpush.bf16.msra.mxu1 %v1044_v4  ;;  %1065 = vmatpush.bf16.msra.mxu2 %v1044_v4 }
  0x22   : > { %1066 = vmatpush.bf16.msra.mxu3 %v1044_v4  ;;  %416 = vmatpush.bf16.msra.mxu0 %v1044_v4 }
  0x25   : > { %1067 = vmatpush.bf16.msra.mxu1 %v1043_v5  ;;  %1068 = vmatpush.bf16.msra.mxu2 %v1043_v5 }
  0x26   : > { %1069 = vmatpush.bf16.msra.mxu3 %v1043_v5  ;;  %417 = vmatpush.bf16.msra.mxu0 %v1043_v5 }
  0x29   : > { %1070 = vmatpush.bf16.msra.mxu1 %v1042_v6  ;;  %1071 = vmatpush.bf16.msra.mxu2 %v1042_v6 }
  0x2a   : > { %1072 = vmatpush.bf16.msra.mxu3 %v1042_v6  ;;  %418 = vmatpush.bf16.msra.mxu0 %v1042_v6 }
  0x2d   : > { %1073 = vmatpush.bf16.msra.mxu1 %v1041_v7  ;;  %1074 = vmatpush.bf16.msra.mxu2 %v1041_v7 }
  0x2e   : > { %1075 = vmatpush.bf16.msra.mxu3 %v1041_v7  ;;  %419 = vmatpush.bf16.msra.mxu0 %v1041_v7 }
  0x30   : > { %440 = vmatmul.bf16.vlgmr.msra.gmra.mxu1 %v1026_v8  ;;  %465 = vmatmul.bf16.vlgmr.msra.gmra.mxu2 %v1031_v9 }
  0x31   : > { %490 = vmatmul.bf16.vlgmr.msra.gmra.mxu3 %v1036_v10  ;;  %420 = vmatmul.bf16.vlgmr.msra.gmra.mxu0 %v1022_v11 }
  0x40   : > { %445 = vmatmul.bf16.gmra.mxu1 %v1027_v12  ;;  %470 = vmatmul.bf16.gmra.mxu2 %v1032_v13 }
  0x41   : > { %495 = vmatmul.bf16.gmra.mxu3 %v1037_v14  ;;  %425 = vmatmul.bf16.gmra.mxu0 %v1023_v15 }
  0x50   : > { %450 = vmatmul.bf16.gmra.mxu1 %v1028_v16  ;;  %475 = vmatmul.bf16.gmra.mxu2 %v1033_v17 }
  0x51   : > { %500 = vmatmul.bf16.gmra.mxu3 %v1038_v18  ;;  %430 = vmatmul.bf16.gmra.mxu0 %v1024_v19 }
  0x60   : > { %455 = vmatmul.bf16.gmra.mxu1 %v1029_v20  ;;  %480 = vmatmul.bf16.gmra.mxu2 %v1034_v21 }
  0x61   : > { %505 = vmatmul.bf16.gmra.mxu3 %v1039_v22  ;;  %435 = vmatmul.bf16.gmra.mxu0 %v1025_v23 }
  0x70   : > { %460 = vmatmul.bf16.gmra.mxu1 %v1030_v24  ;;  %485 = vmatmul.bf16.gmra.mxu2 %v1035_v25 }
  0x71   : > { %510 = vmatmul.bf16.gmra.mxu3 %v1040_v26 }
  0xad   : > { %v441_v28 = vpop.f32.mrf.mxu1 }
  0xae   : > { %v442_v29 = vadd.f32 %v1360_v27, %v441_v28  ;;  %v421_v30 = vpop.f32.mrf.mxu0 }
  0xaf   : > { %v422_v31 = vadd.f32 %v1360_v27, %v421_v30 }
  0xb0   : > { %524 = vst [vmem:[%s1364_s26 + $0x40] sm:$0xff] %v442_v29 }
  0xb1   : > { %516 = vst [vmem:[%s1364_s26] sm:$0xff] %v422_v31 }
  0xb3   : > { %v466_v32 = vpop.f32.mrf.mxu2 }
  0xb4   : > { %v467_v33 = vadd.f32 %v1360_v27, %v466_v32  ;;  %v491_v34 = vpop.f32.mrf.mxu3 }
  0xb5   : > { %v492_v35 = vadd.f32 %v1360_v27, %v491_v34  ;;  %v443_v36 = vpop.f32.mrf.mxu1 }
  0xb6   : > { %534 = vst [vmem:[%s1364_s26 + $0x90] sm:$0xff] %v467_v33  ;;  %v444_v37 = vadd.f32 %v1360_v27, %v443_v36  ;;  %v423_v38 = vpop.f32.mrf.mxu0 }
  0xb7   : > { %544 = vst [vmem:[%s1364_s26 + $0xe0] sm:$0xff] %v492_v35  ;;  %v424_v39 = vadd.f32 %v1360_v27, %v423_v38 }
  0xb8   : > { %525 = vst [vmem:[%s1364_s26 + $0x48] sm:$0xff] %v444_v37 }
  0xb9   : > { %517 = vst [vmem:[%s1364_s26 + $0x8] sm:$0xff] %v424_v39 }
  0xbb   : > { %v468_v40 = vpop.f32.mrf.mxu2 }
  0xbc   : > { %v469_v41 = vadd.f32 %v1360_v27, %v468_v40  ;;  %v493_v42 = vpop.f32.mrf.mxu3 }
  0xbd   : > { %v494_v43 = vadd.f32 %v1360_v27, %v493_v42  ;;  %v446_v44 = vpop.f32.mrf.mxu1 }
  0xbe   : > { %535 = vst [vmem:[%s1364_s26 + $0x98] sm:$0xff] %v469_v41  ;;  %v447_v45 = vadd.f32 %v1360_v27, %v446_v44  ;;  %v426_v46 = vpop.f32.mrf.mxu0 }
  0xbf   : > { %545 = vst [vmem:[%s1364_s26 + $0xe8] sm:$0xff] %v494_v43  ;;  %v427_v47 = vadd.f32 %v1360_v27, %v426_v46 }
  0xc0   : > { %526 = vst [vmem:[%s1364_s26 + $0x50] sm:$0xff] %v447_v45 }
  0xc1   : > { %518 = vst [vmem:[%s1364_s26 + $0x10] sm:$0xff] %v427_v47 }
  0xc3   : > { %v471_v48 = vpop.f32.mrf.mxu2 }
  0xc4   : > { %v472_v49 = vadd.f32 %v1360_v27, %v471_v48  ;;  %v496_v50 = vpop.f32.mrf.mxu3 }
  0xc5   : > { %v497_v51 = vadd.f32 %v1360_v27, %v496_v50  ;;  %v448_v52 = vpop.f32.mrf.mxu1 }
  0xc6   : > { %536 = vst [vmem:[%s1364_s26 + $0xa0] sm:$0xff] %v472_v49  ;;  %v449_v53 = vadd.f32 %v1360_v27, %v448_v52  ;;  %v428_v54 = vpop.f32.mrf.mxu0 }
  0xc7   : > { %546 = vst [vmem:[%s1364_s26 + $0xf0] sm:$0xff] %v497_v51  ;;  %v429_v55 = vadd.f32 %v1360_v27, %v428_v54 }
  0xc8   : > { %527 = vst [vmem:[%s1364_s26 + $0x58] sm:$0xff] %v449_v53 }
  0xc9   : > { %519 = vst [vmem:[%s1364_s26 + $0x18] sm:$0xff] %v429_v55 }
  0xcb   : > { %v473_v56 = vpop.f32.mrf.mxu2 }
  0xcc   : > { %v474_v57 = vadd.f32 %v1360_v27, %v473_v56  ;;  %v498_v58 = vpop.f32.mrf.mxu3 }
  0xcd   : > { %v499_v59 = vadd.f32 %v1360_v27, %v498_v58  ;;  %v451_v60 = vpop.f32.mrf.mxu1 }
  0xce   : > { %537 = vst [vmem:[%s1364_s26 + $0xa8] sm:$0xff] %v474_v57  ;;  %v452_v61 = vadd.f32 %v1360_v27, %v451_v60  ;;  %v431_v62 = vpop.f32.mrf.mxu0 }
  0xcf   : > { %547 = vst [vmem:[%s1364_s26 + $0xf8] sm:$0xff] %v499_v59  ;;  %v432_v63 = vadd.f32 %v1360_v27, %v431_v62 }
  0xd0   : > { %528 = vst [vmem:[%s1364_s26 + $0x60] sm:$0xff] %v452_v61 }
  0xd1   : > { %520 = vst [vmem:[%s1364_s26 + $0x20] sm:$0xff] %v432_v63 }
  0xd3   : > { %v476_v0 = vpop.f32.mrf.mxu2 }
  0xd4   : > { %v477_v1 = vadd.f32 %v1360_v27, %v476_v0  ;;  %v501_v2 = vpop.f32.mrf.mxu3 }
  0xd5   : > { %v502_v3 = vadd.f32 %v1360_v27, %v501_v2  ;;  %v453_v4 = vpop.f32.mrf.mxu1 }
  0xd6   : > { %538 = vst [vmem:[%s1364_s26 + $0xb0] sm:$0xff] %v477_v1  ;;  %v454_v5 = vadd.f32 %v1360_v27, %v453_v4  ;;  %v433_v6 = vpop.f32.mrf.mxu0 }
  0xd7   : > { %548 = vst [vmem:[%s1364_s26 + $0x100] sm:$0xff] %v502_v3  ;;  %v434_v7 = vadd.f32 %v1360_v27, %v433_v6 }
  0xd8   : > { %529 = vst [vmem:[%s1364_s26 + $0x68] sm:$0xff] %v454_v5 }
  0xd9   : > { %521 = vst [vmem:[%s1364_s26 + $0x28] sm:$0xff] %v434_v7 }
  0xdb   : > { %v478_v8 = vpop.f32.mrf.mxu2 }
  0xdc   : > { %v479_v9 = vadd.f32 %v1360_v27, %v478_v8  ;;  %v503_v10 = vpop.f32.mrf.mxu3 }
  0xdd   : > { %v504_v11 = vadd.f32 %v1360_v27, %v503_v10  ;;  %v456_v12 = vpop.f32.mrf.mxu1 }
  0xde   : > { %539 = vst [vmem:[%s1364_s26 + $0xb8] sm:$0xff] %v479_v9  ;;  %v457_v13 = vadd.f32 %v1360_v27, %v456_v12  ;;  %v436_v14 = vpop.f32.mrf.mxu0 }
  0xdf   : > { %549 = vst [vmem:[%s1364_s26 + $0x108] sm:$0xff] %v504_v11  ;;  %v437_v15 = vadd.f32 %v1360_v27, %v436_v14 }
  0xe0   : > { %530 = vst [vmem:[%s1364_s26 + $0x70] sm:$0xff] %v457_v13 }
  0xe1   : > { %522 = vst [vmem:[%s1364_s26 + $0x30] sm:$0xff] %v437_v15 }
  0xe3   : > { %v481_v16 = vpop.f32.mrf.mxu2 }
  0xe4   : > { %v482_v17 = vadd.f32 %v1360_v27, %v481_v16  ;;  %v506_v18 = vpop.f32.mrf.mxu3 }
  0xe5   : > { %v507_v19 = vadd.f32 %v1360_v27, %v506_v18  ;;  %v458_v20 = vpop.f32.mrf.mxu1 }
  0xe6   : > { %540 = vst [vmem:[%s1364_s26 + $0xc0] sm:$0xff] %v482_v17  ;;  %v459_v21 = vadd.f32 %v1360_v27, %v458_v20  ;;  %v438_v22 = vpop.f32.mrf.mxu0 }
  0xe7   : > { %550 = vst [vmem:[%s1364_s26 + $0x110] sm:$0xff] %v507_v19  ;;  %v439_v23 = vadd.f32 %v1360_v27, %v438_v22 }
  0xe8   : > { %531 = vst [vmem:[%s1364_s26 + $0x78] sm:$0xff] %v459_v21 }
  0xe9   : > { %523 = vst [vmem:[%s1364_s26 + $0x38] sm:$0xff] %v439_v23 }
  0xeb   : > { %v483_v24 = vpop.f32.mrf.mxu2 }
  0xec   : > { %v484_v25 = vadd.f32 %v1360_v27, %v483_v24  ;;  %v508_v26 = vpop.f32.mrf.mxu3 }
  0xed   : > { %v509_v28 = vadd.f32 %v1360_v27, %v508_v26  ;;  %v461_v29 = vpop.f32.mrf.mxu1 }
  0xee   : > { %541 = vst [vmem:[%s1364_s26 + $0xc8] sm:$0xff] %v484_v25  ;;  %v462_v30 = vadd.f32 %v1360_v27, %v461_v29 }
  0xef   : > { %551 = vst [vmem:[%s1364_s26 + $0x118] sm:$0xff] %v509_v28 }
  0xf0   : > { %532 = vst [vmem:[%s1364_s26 + $0x80] sm:$0xff] %v462_v30 }
  0xf3   : > { %v486_v31 = vpop.f32.mrf.mxu2 }
  0xf4   : > { %v487_v32 = vadd.f32 %v1360_v27, %v486_v31  ;;  %v511_v33 = vpop.f32.mrf.mxu3 }
  0xf5   : > { %v512_v34 = vadd.f32 %v1360_v27, %v511_v33  ;;  %v463_v35 = vpop.f32.mrf.mxu1 }
  0xf6   : > { %542 = vst [vmem:[%s1364_s26 + $0xd0] sm:$0xff] %v487_v32  ;;  %v464_v36 = vadd.f32 %v1360_v27, %v463_v35 }
  0xf7   : > { %552 = vst [vmem:[%s1364_s26 + $0x120] sm:$0xff] %v512_v34 }
  0xf8   : > { %533 = vst [vmem:[%s1364_s26 + $0x88] sm:$0xff] %v464_v36 }
  0xfb   : > { %v488_v37 = vpop.f32.mrf.mxu2  ;;  %560 = sbr.rel (!%p1299_p4) target bundleno = 320 (0x140), region = 36 }
  0xfc   : > { %v489_v38 = vadd.f32 %v1360_v27, %v488_v37  ;;  %v513_v39 = vpop.f32.mrf.mxu3 }
  0xfd   : > { %v514_v40 = vadd.f32 %v1360_v27, %v513_v39 }
  0xfe   : > { %543 = vst [vmem:[%s1364_s26 + $0xd8] sm:$0xff] %v489_v38 }
  0xff   : > { %553 = vst [vmem:[%s1364_s26 + $0x128] sm:$0xff] %v514_v40 }
 0x100   : > { %s1596_s12 = smov (!%p563_p8, %s562_s12), 38 }
 0x101   : > { %s1007_s5 = sshll.u32 %s1596_s12, 3 }
 0x102   : > { %p1010_p9 = scmp.eq.s32.totalorder %s1007_s5, 0 }
 0x103   : > { %s1453_s6 = sshrl.u32 (!%p1010_p9), %s1596_s12, 5 }
 0x104   : > { %571 = sbr.rel (%p1010_p9) target bundleno = 320 (0x140), region = 40  ;;  %p1011_p10 = scmp.le.s32.totalorder (!%p1010_p9), %s1453_s6, 0 }
 0x109   : > { %850 = sbr.rel (%p1011_p10) target bundleno = 303 (0x12f), region = 116  ;;  %s1587_s15 = smov (!%p1011_p10), %s1447_s4 }
 0x10a   : > { %s1588_s20 = smov (!%p1011_p10), %s1364_s26  ;;  %s1462_s29 = smov (!%p1011_p10), 0  }
 0x10b   : > { %s1464_s7 = smov (!%p1011_p10), 0  }
 0x10e LB: >> { %v696_v27 = vld [vmem:[%s1228_s20] sm:$0xff]  ;;  %v698_v41 = vld [vmem:[%s1228_s20 + $0x8] sm:$0xff]  ;;  %v700_v42 = vld [vmem:[%s1228_s20 + $0x10] sm:$0xff]  ;;  %s760_s8 = sadd.s32 1, %s1232_s29  ;;  %s690_s7 = sadd.s32 1, %s1236_s7   ;;  %s1236_s7 = sphi %s1464_s7, %s690_s7   ;;  %s1232_s29 = sphi %s1462_s29, %s1591_s29   ;;  %s1228_s20 = sphi %s1588_s20, %s1590_s20   ;;  %s1224_s15 = sphi %s1587_s15, %s1589_s15  }
 0x10f   : >> { %697 = vst [vmem:[%s1224_s15] sm:$0xff] %v696_v27  ;;  %v702_v43 = vld [vmem:[%s1228_s20 + $0x18] sm:$0xff]  ;;  %p761_p11 = scmp.ge.s32.totalorder %s760_s8, %s1453_s6  ;;  %v704_v44 = vld [vmem:[%s1228_s20 + $0x20] sm:$0xff]  ;;  %v706_v45 = vld [vmem:[%s1228_s20 + $0x28] sm:$0xff]  ;;  %p689_p12 = scmp.ge.s32.totalorder %s690_s7, %s1453_s6 }
 0x110   : >> { %699 = vst [vmem:[%s1224_s15 + $0x8] sm:$0xff] %v698_v41  ;;  %v708_v46 = vld [vmem:[%s1228_s20 + $0x30] sm:$0xff]  ;;  %v710_v47 = vld [vmem:[%s1228_s20 + $0x38] sm:$0xff]  ;;  %v712_v48 = vld [vmem:[%s1228_s20 + $0x40] sm:$0xff] }
 0x111   : >> { %701 = vst [vmem:[%s1224_s15 + $0x10] sm:$0xff] %v700_v42  ;;  %s1598_s8 = smov (%p761_p11, %s760_s8), 0  ;;  %v714_v49 = vld [vmem:[%s1228_s20 + $0x48] sm:$0xff]  ;;  %v716_v50 = vld [vmem:[%s1228_s20 + $0x50] sm:$0xff]  ;;  %v718_v51 = vld [vmem:[%s1228_s20 + $0x58] sm:$0xff] }
 0x112   : >> { %703 = vst [vmem:[%s1224_s15 + $0x18] sm:$0xff] %v702_v43  ;;  %s1012_s9 = sshll.u32 %s1598_s8, 8  ;;  %v720_v52 = vld [vmem:[%s1228_s20 + $0x60] sm:$0xff]  ;;  %v722_v53 = vld [vmem:[%s1228_s20 + $0x68] sm:$0xff]  ;;  %v724_v54 = vld [vmem:[%s1228_s20 + $0x70] sm:$0xff]  ;;  %s1591_s29 = smov %s1598_s8 }
 0x113   : >> { %705 = vst [vmem:[%s1224_s15 + $0x20] sm:$0xff] %v704_v44  ;;  %s1496_s10 = scalar_lea.vmem %s1364_s26, %s1012_s9 [#allocation2]   ;;  %s1499_s11 = scalar_lea.vmem %s1447_s4, %s1012_s9   ;;  %v726_v55 = vld [vmem:[%s1228_s20 + $0x78] sm:$0xff]  ;;  %v728_v56 = vld [vmem:[%s1228_s20 + $0x80] sm:$0xff]  ;;  %v730_v57 = vld [vmem:[%s1228_s20 + $0x88] sm:$0xff] }
 0x114   : >> { %707 = vst [vmem:[%s1224_s15 + $0x28] sm:$0xff] %v706_v45  ;;  %v732_v58 = vld [vmem:[%s1228_s20 + $0x90] sm:$0xff]  ;;  %v734_v59 = vld [vmem:[%s1228_s20 + $0x98] sm:$0xff]  ;;  %v736_v60 = vld [vmem:[%s1228_s20 + $0xa0] sm:$0xff] }
 0x115   : >> { %709 = vst [vmem:[%s1224_s15 + $0x30] sm:$0xff] %v708_v46  ;;  %v738_v61 = vld [vmem:[%s1228_s20 + $0xa8] sm:$0xff]  ;;  %v740_v62 = vld [vmem:[%s1228_s20 + $0xb0] sm:$0xff]  ;;  %v742_v63 = vld [vmem:[%s1228_s20 + $0xb8] sm:$0xff] }
 0x116   : >> { %711 = vst [vmem:[%s1224_s15 + $0x38] sm:$0xff] %v710_v47  ;;  %v744_v0 = vld [vmem:[%s1228_s20 + $0xc0] sm:$0xff]  ;;  %v746_v1 = vld [vmem:[%s1228_s20 + $0xc8] sm:$0xff]  ;;  %v748_v2 = vld [vmem:[%s1228_s20 + $0xd0] sm:$0xff] }
 0x117   : >> { %713 = vst [vmem:[%s1224_s15 + $0x40] sm:$0xff] %v712_v48  ;;  %v750_v3 = vld [vmem:[%s1228_s20 + $0xd8] sm:$0xff]  ;;  %v752_v4 = vld [vmem:[%s1228_s20 + $0xe0] sm:$0xff]  ;;  %v754_v5 = vld [vmem:[%s1228_s20 + $0xe8] sm:$0xff] }
 0x118   : >> { %715 = vst [vmem:[%s1224_s15 + $0x48] sm:$0xff] %v714_v49  ;;  %v756_v6 = vld [vmem:[%s1228_s20 + $0xf0] sm:$0xff]  ;;  %v758_v7 = vld [vmem:[%s1228_s20 + $0xf8] sm:$0xff]  ;;  %s1590_s20 = smov %s1496_s10 }
 0x119   : >> { %717 = vst [vmem:[%s1224_s15 + $0x50] sm:$0xff] %v716_v50 }
 0x11a   : >> { %719 = vst [vmem:[%s1224_s15 + $0x58] sm:$0xff] %v718_v51 }
 0x11b   : >> { %721 = vst [vmem:[%s1224_s15 + $0x60] sm:$0xff] %v720_v52 }
 0x11c   : >> { %723 = vst [vmem:[%s1224_s15 + $0x68] sm:$0xff] %v722_v53 }
 0x11d   : >> { %725 = vst [vmem:[%s1224_s15 + $0x70] sm:$0xff] %v724_v54 }
 0x11e   : >> { %727 = vst [vmem:[%s1224_s15 + $0x78] sm:$0xff] %v726_v55 }
 0x11f   : >> { %729 = vst [vmem:[%s1224_s15 + $0x80] sm:$0xff] %v728_v56 }
 0x120   : >> { %731 = vst [vmem:[%s1224_s15 + $0x88] sm:$0xff] %v730_v57 }
 0x121   : >> { %733 = vst [vmem:[%s1224_s15 + $0x90] sm:$0xff] %v732_v58 }
 0x122   : >> { %735 = vst [vmem:[%s1224_s15 + $0x98] sm:$0xff] %v734_v59 }
 0x123   : >> { %737 = vst [vmem:[%s1224_s15 + $0xa0] sm:$0xff] %v736_v60 }
 0x124   : >> { %739 = vst [vmem:[%s1224_s15 + $0xa8] sm:$0xff] %v738_v61 }
 0x125   : >> { %741 = vst [vmem:[%s1224_s15 + $0xb0] sm:$0xff] %v740_v62 }
 0x126   : >> { %743 = vst [vmem:[%s1224_s15 + $0xb8] sm:$0xff] %v742_v63 }
 0x127   : >> { %745 = vst [vmem:[%s1224_s15 + $0xc0] sm:$0xff] %v744_v0 }
 0x128   : >> { %747 = vst [vmem:[%s1224_s15 + $0xc8] sm:$0xff] %v746_v1 }
 0x129   : >> { %749 = vst [vmem:[%s1224_s15 + $0xd0] sm:$0xff] %v748_v2 }
 0x12a   : >> { %751 = vst [vmem:[%s1224_s15 + $0xd8] sm:$0xff] %v750_v3  ;;  %692 = sbr.rel (!%p689_p12) target bundleno = 270 (0x10e), region = 122 }
 0x12b   : >> { %753 = vst [vmem:[%s1224_s15 + $0xe0] sm:$0xff] %v752_v4 }
 0x12c   : >> { %755 = vst [vmem:[%s1224_s15 + $0xe8] sm:$0xff] %v754_v5 }
 0x12d   : >> { %757 = vst [vmem:[%s1224_s15 + $0xf0] sm:$0xff] %v756_v6 }
 0x12e   : >> { %759 = vst [vmem:[%s1224_s15 + $0xf8] sm:$0xff] %v758_v7  ;;  %s1589_s15 = smov %s1499_s11 }
 0x12f PF: > { %s1564_s14 = sand.u32 31, %s1596_s12   ;;  %s1050_s17 = sshll.u32 %s1453_s6, 8 }
 0x130   : > { %s771_s18 = scalar_lea.vmem %s1364_s26, %s1050_s17 [#allocation2]   ;;  %s773_s21 = scalar_lea.vmem %s1447_s4, %s1050_s17  }
 0x131   : > { %p1017_p13 = scmp.le.s32.totalorder %s1564_s14, 0 }
 0x132   : > { %s1238_s22 = smov (!%p1017_p13), %s773_s21   ;;  %s1242_s23 = smov (!%p1017_p13), %s771_s18  }
 0x133   : > { %864 = sbr.rel (%p1017_p13) target bundleno = 320 (0x140), region = 127  ;;  %s1246_s24 = smov (!%p1017_p13), 0  }
 0x134   : > { %s1250_s25 = smov (!%p1017_p13), 0  }
 0x138 LB: >> { %v783_v8 = vld [vmem:[%s1244_s23] sm:$0xff]  ;;  %s785_s12 = sadd.s32 1, %s1248_s24  ;;  %s777_s25 = sadd.s32 1, %s1252_s25   ;;  %s1252_s25 = sphi %s1250_s25, %s777_s25   ;;  %s1248_s24 = sphi %s1246_s24, %s1247_s24   ;;  %s1244_s23 = sphi %s1242_s23, %s790_s23   ;;  %s1240_s22 = sphi %s1238_s22, %s791_s22  }
 0x139   : >> { %784 = vst [vmem:[%s1240_s22] sm:$0xff] %v783_v8  ;;  %p786_p0 = scmp.ge.s32.totalorder %s785_s12, %s1564_s14  ;;  %p776_p1 = scmp.ge.s32.totalorder %s777_s25, %s1564_s14 }
 0x13b   : >> { %s1600_s12 = smov (%p786_p0, %s785_s12), 0  ;;  %779 = sbr.rel (!%p776_p1) target bundleno = 312 (0x138), region = 133 }
 0x13c   : >> { %s1018_s26 = sshll.u32 %s1600_s12, 3  ;;  %s1247_s24 = smov %s1600_s12  }
 0x13d   : >> { %s790_s23 = scalar_lea.vmem %s771_s18, %s1018_s26 [#allocation2]   ;;  %s791_s22 = scalar_lea.vmem %s773_s21, %s1018_s26  }
 0x140 PF: > { %p10_p2 = scmp.ge.s32.totalorder %s1289_s16, 4   ;;  %s1592_s12 = smov %s1216_s13 }
 0x141   : > { %s1593_s13 = smov %s1297_s19  ;;  %s1594_s14 = smov %s1289_s16 }
 0x142   :  { %12 = sbr.rel (!%p10_p2) target bundleno = 2 (0x2), region = 144 }

</bundles_post_ra>
